<compile_context>
chip_gen: v7x
topology: tpu7x:2x2x1
jax: 0.10.0
libtpu: 0.0.40
codegen_flags: <defaults>
</compile_context>

<pallas_src>
import math

import jax
import jax.numpy as jnp
from jax.experimental import pallas as pl
from jax.experimental.pallas import tpu as pltpu

LN_EPS = 1e-5
FF_HIDDEN = 2048   # FeedForward default hidden_dim in the PyTorch module
N_BLOCKS = 6

# Order of stacked per-block parameters (must match the kernel signature).
STACKED_KEYS = ("wqkv1", "wo1", "ln1w", "ln1b",
                "wq2", "wkv2", "wo2", "ln2w", "ln2b",
                "ffw1", "ffb1", "ffw2", "ffb2", "ln3w", "ln3b")


# ---------------------------------------------------------------------------
# Per-chip policy
# ---------------------------------------------------------------------------
def _device_kind():
    try:
        return jax.devices()[0].device_kind.lower()
    except Exception:
        return ""


def _chip_plan():
    kind = _device_kind()
    two_tc = ("v7" in kind) or ("7x" in kind)
    if two_tc:
        # v7x: 64 MiB VMEM, 2 TensorCores -> stream weights, big batch tiles.
        return dict(two_tc=True, vmem_limit=56 * 1024 * 1024,
                    resident_budget=0, target_rows=1024)
    if ("v5" in kind) or ("v6" in kind):
        # 128 MiB VMEM, 1 TC -> keep the whole stacked weight set VMEM-resident.
        return dict(two_tc=False, vmem_limit=100 * 1024 * 1024,
                    resident_budget=48 * 1024 * 1024, target_rows=256)
    # Unknown generation: conservative defaults (residency only for small models).
    return dict(two_tc=False, vmem_limit=None,
                resident_budget=8 * 1024 * 1024, target_rows=256)


def _choose_batch_tile(B, S, two_tc, target_rows):
    """Rows-per-step target; >=2 parallel steps only matters on 2-TC chips."""
    bt = max(1, min(B, max(1, target_rows // max(S, 1))))
    while bt > 1 and B % bt != 0:
        bt -= 1
    if two_tc:
        while bt > 1 and (B // bt) < 2:
            bt -= 1
        while bt > 1 and B % bt != 0:
            bt -= 1
    return bt


def _choose_vocab_tile(V):
    for t in (2048, 1024, 512, 256, 128):
        if V % t == 0:
            return t
    return V   # small vocab: single full-width tile (block dim == full dim)


# ---------------------------------------------------------------------------
# Kernel A: fused 6 decoder blocks
# ---------------------------------------------------------------------------
def _make_blocks_kernel(bt, S, Sy, D, H, n_blocks, resident):
    f32, bf16 = jnp.float32, jnp.bfloat16
    dh = D // H
    scale = 1.0 / float(dh) ** 0.5

    def layer_norm(v, w, b):                       # f32 (v5e VPU has no bf16 path)
        mu = jnp.mean(v, axis=-1, keepdims=True)
        var = jnp.mean((v - mu) ** 2, axis=-1, keepdims=True)
        return (v - mu) * jax.lax.rsqrt(var + LN_EPS) * w + b

    def split_heads(t2d, s_len, col0):
        # (bt*s_len, C) -> (H*bt, s_len, dh) bf16; folded batch index = h*bt + b.
        # TODO(synk): replace slice+concat with a (bt,S,H,dh) reshape and a
        # two-batch-dim einsum ('bqhd,bkhd->bhqk') once that dot_general form is
        # verified to lower on the target Mosaic version; this is the proven path.
        t3 = t2d.reshape(bt, s_len, t2d.shape[-1])
        heads = [t3[:, :, col0 + h * dh: col0 + (h + 1) * dh] for h in range(H)]
        return jnp.concatenate(heads, axis=0).astype(bf16)

    def merge_heads(ctx):
        # (H*bt, S, dh) f32 -> (bt*S, D) f32, head-major channels (torch concat_head)
        heads = [ctx[h * bt:(h + 1) * bt] for h in range(H)]
        return jnp.concatenate(heads, axis=-1).reshape(bt * S, D)

    def attend(qh, kh, vh, mask):
        # Single batched score / context matmuls over all (head, batch) pairs.
        s = jnp.einsum('bqd,bkd->bqk', qh, kh, preferred_element_type=f32) * scale
        if mask is not None:
            s = s + mask[None, :, :]               # additive mask, f32
        s = s - jnp.max(s, axis=-1, keepdims=True)
        p = jnp.exp(s)
        p = p * pl.reciprocal(jnp.sum(p, axis=-1, keepdims=True), approx=True)
        # attention dropout -> identity (eval mode)
        return jnp.einsum('bqk,bkd->bqd', p.astype(bf16), vh,
                          preferred_element_type=f32)

    def kernel(x_ref, y_ref, mask_ref,
               wqkv1_ref, wo1_ref, ln1w_ref, ln1b_ref,
               wq2_ref, wkv2_ref, wo2_ref, ln2w_ref, ln2b_ref,
               ffw1_ref, ffb1_ref, ffw2_ref, ffb2_ref, ln3w_ref, ln3b_ref,
               o_ref, act_ref):
        l = pl.program_id(1)                       # decoder-block index

        def W(ref):
            # resident: full stacked array in VMEM -> dynamic-index the block dim
            # streamed: the BlockSpec already delivers the l-th slice
            return ref[l] if resident else ref[0]

        @pl.when(l == 0)
        def _():                                   # load activation once per batch tile
            act_ref[...] = x_ref[...].reshape(bt * S, D)

        x = act_ref[...]                           # (bt*S, D) f32, VMEM-resident
        mask = mask_ref[...]

        # ---- masked multi-head self-attention + residual + LN1 ----
        xb = x.astype(bf16)                                        # hoisted cast
        qkv = jnp.dot(xb, W(wqkv1_ref), preferred_element_type=f32)   # (rows, 3D)
        qh = split_heads(qkv, S, 0)
        kh = split_heads(qkv, S, D)
        vh = split_heads(qkv, S, 2 * D)
        ctx = attend(qh, kh, vh, mask)
        a1 = jnp.dot(merge_heads(ctx).astype(bf16), W(wo1_ref),
                     preferred_element_type=f32)
        x1 = layer_norm(a1 + x, W(ln1w_ref), W(ln1b_ref))

        # ---- cross attention (K/V from encoder memory) + residual + LN2 ----
        x1b = x1.astype(bf16)
        q2 = jnp.dot(x1b, W(wq2_ref), preferred_element_type=f32)
        yb = y_ref[...].reshape(bt * Sy, D).astype(bf16)
        kv = jnp.dot(yb, W(wkv2_ref), preferred_element_type=f32)     # (rows_y, 2D)
        q2h = split_heads(q2, S, 0)
        k2h = split_heads(kv, Sy, 0)
        v2h = split_heads(kv, Sy, D)
        ctx2 = attend(q2h, k2h, v2h, None)
        a2 = jnp.dot(merge_heads(ctx2).astype(bf16), W(wo2_ref),
                     preferred_element_type=f32)
        x2 = layer_norm(a2 + x1, W(ln2w_ref), W(ln2b_ref))

        # ---- FeedForward: Linear -> ReLU -> (dropout=id) -> Linear, res + LN3 ----
        x2b = x2.astype(bf16)
        h = jnp.dot(x2b, W(ffw1_ref), preferred_element_type=f32) + W(ffb1_ref)
        h = jnp.maximum(h, 0.0)
        ff = (jnp.dot(h.astype(bf16), W(ffw2_ref), preferred_element_type=f32)
              + W(ffb2_ref))
        x3 = layer_norm(ff + x2, W(ln3w_ref), W(ln3b_ref))

        act_ref[...] = x3                          # carry to next block step

        @pl.when(l == pl.num_programs(1) - 1)
        def _():                                   # emit final block activation
            o_ref[...] = x3.reshape(bt, S, D)

    return kernel


# ---------------------------------------------------------------------------
# Kernel B: final vocab projection, tiled over V
# ---------------------------------------------------------------------------
def _make_vocab_kernel(bt, S, D, tile_v):
    f32, bf16 = jnp.float32, jnp.bfloat16

    def kernel(act_ref, w_ref, b_ref, o_ref):
        a = act_ref[...].reshape(bt * S, D).astype(bf16)
        logits = jnp.dot(a, w_ref[...], preferred_element_type=f32) + b_ref[...]
        o_ref[...] = logits.reshape(bt, S, tile_v)

    return kernel


# ---------------------------------------------------------------------------
# Wrapper (pallas_call plumbing)
# ---------------------------------------------------------------------------
def decoder_forward(params, x_ids, y, mask, dim, head_num):
    B, S = x_ids.shape
    Sy = y.shape[1]
    D = dim
    assert D % head_num == 0
    V = params["out_w"].shape[1]
    n_blocks = params["wqkv1"].shape[0]

    # Embedding gather + sqrt(dim) scale (plain-JAX glue).
    x = (params["embed"][x_ids] * (D ** 0.5)).astype(jnp.float32)
    # PyTorch quirk reproduced: pe indexed by x.size(0) == batch, broadcast over seq.
    x = x + params["pe"][:B]
    # self.dropout(x) -> identity (eval mode)

    plan = _chip_plan()
    bt = _choose_batch_tile(B, S, plan["two_tc"], plan["target_rows"])
    n_bt = B // bt

    stacked = [params[k] for k in STACKED_KEYS]
    weight_bytes = sum(int(a.size) * a.dtype.itemsize for a in stacked)
    resident = weight_bytes <= plan["resident_budget"]

    if resident:
        # Full stacked weight set stays in VMEM for the whole kernel (constant block
        # index -> fetched once); the kernel indexes the block dim with ref[l].
        w_specs = [pl.BlockSpec(tuple(a.shape), lambda b, l: (0, 0, 0))
                   for a in stacked]
    else:
        # Stream one block-slice per grid step (double-buffered by the pipeline).
        # TODO(synk): if still DMA-exposed on v7x after enlarging bt, deepen the
        # pipeline on the large weights with pipeline_mode=pl.Buffered(3).
        w_specs = [pl.BlockSpec((1,) + tuple(a.shape[1:]), lambda b, l: (l, 0, 0))
                   for a in stacked]

    cp_a = dict(dimension_semantics=("parallel", "arbitrary"))
    cp_b = dict(dimension_semantics=("parallel", "parallel"))
    if plan["vmem_limit"] is not None:
        cp_a["vmem_limit_bytes"] = plan["vmem_limit"]
        cp_b["vmem_limit_bytes"] = plan["vmem_limit"]

    blocks_kernel = _make_blocks_kernel(bt, S, Sy, D, head_num, n_blocks, resident)

    act = pl.pallas_call(
        blocks_kernel,
        out_shape=jax.ShapeDtypeStruct((B, S, D), jnp.float32),
        grid=(n_bt, n_blocks),
        in_specs=[pl.BlockSpec((bt, S, D), lambda b, l: (b, 0, 0)),    # decoder tokens
                  pl.BlockSpec((bt, Sy, D), lambda b, l: (b, 0, 0)),   # encoder memory
                  pl.BlockSpec((S, S), lambda b, l: (0, 0))            # additive mask
                  ] + w_specs,
        out_specs=pl.BlockSpec((bt, S, D), lambda b, l: (b, 0, 0)),
        scratch_shapes=[pltpu.VMEM((bt * S, D), jnp.float32)],         # resident act
        compiler_params=pltpu.CompilerParams(**cp_a),
    )(x, y.astype(jnp.float32), mask.astype(jnp.float32), *stacked)

    # Final vocab projection tiled over V; V-tiles on the outer grid axis so each
    # (D, TILE_V) weight tile is fetched once while the small activation re-streams.
    tile_v = _choose_vocab_tile(V)
    n_vt = V // tile_v
    vocab_kernel = _make_vocab_kernel(bt, S, D, tile_v)

    logits = pl.pallas_call(
        vocab_kernel,
        out_shape=jax.ShapeDtypeStruct((B, S, V), jnp.float32),
        grid=(n_vt, n_bt),
        in_specs=[pl.BlockSpec((bt, S, D), lambda v, b: (b, 0, 0)),
                  pl.BlockSpec((D, tile_v), lambda v, b: (0, v)),
                  pl.BlockSpec((1, tile_v), lambda v, b: (0, v))],
        out_specs=pl.BlockSpec((bt, S, tile_v), lambda v, b: (b, 0, v)),
        compiler_params=pltpu.CompilerParams(**cp_b),
    )(act, params["out_w"], params["out_b"])
    return logits


# ---------------------------------------------------------------------------
# Parameter construction (deterministic, synthetic)
# ---------------------------------------------------------------------------
def positional_encoding(max_len, dim):
    position = jnp.arange(max_len, dtype=jnp.float32)[:, None]
    div_term = jnp.exp(jnp.arange(0, dim, 2, dtype=jnp.float32)
                       * (-math.log(10000.0) / dim))
    pe = jnp.zeros((max_len, 1, dim), dtype=jnp.float32)
    pe = pe.at[:, 0, 0::2].set(jnp.sin(position * div_term))
    pe = pe.at[:, 0, 1::2].set(jnp.cos(position * div_term))
    return pe


def init_decoder_params(key, vocab, dim, head_num, n_blocks=N_BLOCKS,
                        max_len=5000, ff_hidden=FF_HIDDEN):
    ks = iter(jax.random.split(key, 16))

    def wf32(shape, scale=0.05):
        return (scale * jax.random.normal(next(ks), shape)).astype(jnp.float32)

    def wbf16(shape, scale=0.05):      # matmul weights stored bf16 (MXU-native)
        return wf32(shape, scale).astype(jnp.bfloat16)

    ones = lambda: jnp.ones((n_blocks, 1, dim), jnp.float32)
    zeros = lambda: jnp.zeros((n_blocks, 1, dim), jnp.float32)

    return {
        "embed": wf32((vocab, dim), 1.0),
        "pe": positional_encoding(max_len, dim),
        "out_w": wbf16((dim, vocab)),
        "out_b": wf32((1, vocab)),
        # stacked per-block weights; Q/K/V (self-attn) and K/V (cross-attn) pre-fused
        "wqkv1": wbf16((n_blocks, dim, 3 * dim)),
        "wo1": wbf16((n_blocks, dim, dim)),
        "ln1w": ones(), "ln1b": zeros(),
        "wq2": wbf16((n_blocks, dim, dim)),
        "wkv2": wbf16((n_blocks, dim, 2 * dim)),
        "wo2": wbf16((n_blocks, dim, dim)),
        "ln2w": ones(), "ln2b": zeros(),
        "ffw1": wbf16((n_blocks, dim, ff_hidden)),
        "ffb1": wf32((n_blocks, 1, ff_hidden)),
        "ffw2": wbf16((n_blocks, ff_hidden, dim)),
        "ffb2": wf32((n_blocks, 1, dim)),
        "ln3w": ones(), "ln3b": zeros(),
    }


if __name__ == "__main__":
    B, S, S_ENC = 2, 8, 8
    DIM, HEADS, VOCAB = 32, 4, 50
    # TODO(synk): toy shapes (S=8, D=32) under-fill the MXU; validate tuning at the
    # intended production dimensions (S>=128, dh>=64, D~512, V~32k).

    key = jax.random.PRNGKey(0)
    k_par, k_ids, k_y = jax.random.split(key, 3)

    params = init_decoder_params(k_par, VOCAB, DIM, HEADS)

    x_ids = jax.random.randint(k_ids, (B, S), 0, VOCAB, dtype=jnp.int32)
    y_mem = jax.random.normal(k_y, (B, S_ENC, DIM), dtype=jnp.float32)
    causal = jnp.tril(jnp.ones((S, S), dtype=bool))
    mask = jnp.where(causal, 0.0, -1e9).astype(jnp.float32)   # additive causal mask

    out = decoder_forward(params, x_ids, y_mem, mask, DIM, HEADS)
    out = jax.block_until_ready(out)
    assert out.shape == (B, S, VOCAB)
    assert bool(jnp.all(jnp.isfinite(out)))
    print("KERNEL_OK")
</pallas_src>

<mosaic_0001>
module attributes {stable_mosaic.version = 11 : i64} {
  func.func @kernel(%arg0: i32, %arg1: i32, %arg2: memref<2x8x32xf32, #tpu.memory_space<vmem>>, %arg3: memref<2x8x32xf32, #tpu.memory_space<vmem>>, %arg4: memref<8x8xf32, #tpu.memory_space<vmem>>, %arg5: memref<6x32x96xbf16, #tpu.memory_space<vmem>>, %arg6: memref<6x32x32xbf16, #tpu.memory_space<vmem>>, %arg7: memref<6x1x32xf32, #tpu.memory_space<vmem>>, %arg8: memref<6x1x32xf32, #tpu.memory_space<vmem>>, %arg9: memref<6x32x32xbf16, #tpu.memory_space<vmem>>, %arg10: memref<6x32x64xbf16, #tpu.memory_space<vmem>>, %arg11: memref<6x32x32xbf16, #tpu.memory_space<vmem>>, %arg12: memref<6x1x32xf32, #tpu.memory_space<vmem>>, %arg13: memref<6x1x32xf32, #tpu.memory_space<vmem>>, %arg14: memref<6x32x2048xbf16, #tpu.memory_space<vmem>>, %arg15: memref<6x1x2048xf32, #tpu.memory_space<vmem>>, %arg16: memref<6x2048x32xbf16, #tpu.memory_space<vmem>>, %arg17: memref<6x1x32xf32, #tpu.memory_space<vmem>>, %arg18: memref<6x1x32xf32, #tpu.memory_space<vmem>>, %arg19: memref<6x1x32xf32, #tpu.memory_space<vmem>>, %arg20: memref<2x8x32xf32, #tpu.memory_space<vmem>>, %arg21: memref<16x32xf32, #tpu.memory_space<vmem>>) attributes {dimension_semantics = [#tpu.dimension_semantics<parallel>, #tpu.dimension_semantics<arbitrary>], iteration_bounds = array<i64: 1, 6>, scalar_prefetch = 0 : i64, scratch_operands = 1 : i64, tpu.core_type = #tpu.core_type<tc>, window_params = [{transform_indices = @transform_0, window_bounds = array<i64: 2, 8, 32>}, {transform_indices = @transform_1, window_bounds = array<i64: 2, 8, 32>}, {pipeline_mode = #tpu.pipeline_mode<synchronous>, transform_indices = @transform_2, window_bounds = array<i64: 8, 8>}, {pipeline_mode = #tpu.pipeline_mode<synchronous>, transform_indices = @transform_3, window_bounds = array<i64: 6, 32, 96>}, {pipeline_mode = #tpu.pipeline_mode<synchronous>, transform_indices = @transform_4, window_bounds = array<i64: 6, 32, 32>}, {pipeline_mode = #tpu.pipeline_mode<synchronous>, transform_indices = @transform_5, window_bounds = array<i64: 6, 1, 32>}, {pipeline_mode = #tpu.pipeline_mode<synchronous>, transform_indices = @transform_6, window_bounds = array<i64: 6, 1, 32>}, {pipeline_mode = #tpu.pipeline_mode<synchronous>, transform_indices = @transform_7, window_bounds = array<i64: 6, 32, 32>}, {pipeline_mode = #tpu.pipeline_mode<synchronous>, transform_indices = @transform_8, window_bounds = array<i64: 6, 32, 64>}, {pipeline_mode = #tpu.pipeline_mode<synchronous>, transform_indices = @transform_9, window_bounds = array<i64: 6, 32, 32>}, {pipeline_mode = #tpu.pipeline_mode<synchronous>, transform_indices = @transform_10, window_bounds = array<i64: 6, 1, 32>}, {pipeline_mode = #tpu.pipeline_mode<synchronous>, transform_indices = @transform_11, window_bounds = array<i64: 6, 1, 32>}, {pipeline_mode = #tpu.pipeline_mode<synchronous>, transform_indices = @transform_12, window_bounds = array<i64: 6, 32, 2048>}, {pipeline_mode = #tpu.pipeline_mode<synchronous>, transform_indices = @transform_13, window_bounds = array<i64: 6, 1, 2048>}, {pipeline_mode = #tpu.pipeline_mode<synchronous>, transform_indices = @transform_14, window_bounds = array<i64: 6, 2048, 32>}, {pipeline_mode = #tpu.pipeline_mode<synchronous>, transform_indices = @transform_15, window_bounds = array<i64: 6, 1, 32>}, {pipeline_mode = #tpu.pipeline_mode<synchronous>, transform_indices = @transform_16, window_bounds = array<i64: 6, 1, 32>}, {pipeline_mode = #tpu.pipeline_mode<synchronous>, transform_indices = @transform_17, window_bounds = array<i64: 6, 1, 32>}, {transform_indices = @transform_18, window_bounds = array<i64: 2, 8, 32>}]} {
    %c0_i32 = arith.constant 0 : i32
    %0 = arith.cmpi eq, %arg1, %c0_i32 : i32
    %1 = arith.extui %0 : i1 to i32
    %c0_i32_0 = arith.constant 0 : i32
    %2 = arith.cmpi ne, %1, %c0_i32_0 : i32
    scf.if %2 {
      %c0_72 = arith.constant 0 : index
      %c0_73 = arith.constant 0 : index
      %c0_74 = arith.constant 0 : index
      %232 = vector.load %arg2[%c0_72, %c0_73, %c0_74] : memref<2x8x32xf32, #tpu.memory_space<vmem>>, vector<2x8x32xf32>
      %233 = vector.shape_cast %232 : vector<2x8x32xf32> to vector<16x32xf32>
      %c0_75 = arith.constant 0 : index
      %c0_76 = arith.constant 0 : index
      %234 = vector.load %arg21[%c0_75, %c0_76] : memref<16x32xf32, #tpu.memory_space<vmem>>, vector<16x32xf32>
      tpu.vector_store %arg21[%c0_75, %c0_76], %233 {strides = array<i32>} : memref<16x32xf32, #tpu.memory_space<vmem>>, vector<16x32xf32>,
    } else {
    }
    %c0 = arith.constant 0 : index
    %c0_1 = arith.constant 0 : index
    %3 = vector.load %arg21[%c0, %c0_1] : memref<16x32xf32, #tpu.memory_space<vmem>>, vector<16x32xf32>
    %c0_2 = arith.constant 0 : index
    %c0_3 = arith.constant 0 : index
    %4 = vector.load %arg4[%c0_2, %c0_3] : memref<8x8xf32, #tpu.memory_space<vmem>>, vector<8x8xf32>
    %5 = arith.truncf %3 : vector<16x32xf32> to vector<16x32xbf16>
    %6 = arith.index_cast %arg1 : i32 to index
    %c0_4 = arith.constant 0 : index
    %c0_5 = arith.constant 0 : index
    %7 = vector.load %arg5[%6, %c0_4, %c0_5] : memref<6x32x96xbf16, #tpu.memory_space<vmem>>, vector<1x32x96xbf16>
    %8 = vector.shape_cast %7 : vector<1x32x96xbf16> to vector<32x96xbf16>
    %cst = arith.constant dense<0.000000e+00> : vector<16x96xf32>
    %9 = tpu.matmul %5, %8, %cst {dimension_numbers = #tpu.dot_dimension_numbers<[1], [0], [0], [1], [0, 0, 1, 1], [], []>} : vector<16x32xbf16>, vector<32x96xbf16>, vector<16x96xf32> -> vector<16x96xf32>
    %10 = vector.shape_cast %9 : vector<16x96xf32> to vector<2x8x96xf32>
    %11 = vector.extract_strided_slice %10 {offsets = [0, 0, 0], sizes = [2, 8, 8], strides = [1, 1, 1]} : vector<2x8x96xf32> to vector<2x8x8xf32>
    %12 = vector.extract_strided_slice %10 {offsets = [0, 0, 8], sizes = [2, 8, 8], strides = [1, 1, 1]} : vector<2x8x96xf32> to vector<2x8x8xf32>
    %13 = vector.extract_strided_slice %10 {offsets = [0, 0, 16], sizes = [2, 8, 8], strides = [1, 1, 1]} : vector<2x8x96xf32> to vector<2x8x8xf32>
    %14 = vector.extract_strided_slice %10 {offsets = [0, 0, 24], sizes = [2, 8, 8], strides = [1, 1, 1]} : vector<2x8x96xf32> to vector<2x8x8xf32>
    %15 = tpu.concatenate %11, %12, %13, %14 in 0 : vector<2x8x8xf32>, vector<2x8x8xf32>, vector<2x8x8xf32>, vector<2x8x8xf32> -> vector<8x8x8xf32>
    %16 = arith.truncf %15 : vector<8x8x8xf32> to vector<8x8x8xbf16>
    %17 = vector.shape_cast %9 : vector<16x96xf32> to vector<2x8x96xf32>
    %18 = vector.extract_strided_slice %17 {offsets = [0, 0, 32], sizes = [2, 8, 8], strides = [1, 1, 1]} : vector<2x8x96xf32> to vector<2x8x8xf32>
    %19 = vector.extract_strided_slice %17 {offsets = [0, 0, 40], sizes = [2, 8, 8], strides = [1, 1, 1]} : vector<2x8x96xf32> to vector<2x8x8xf32>
    %20 = vector.extract_strided_slice %17 {offsets = [0, 0, 48], sizes = [2, 8, 8], strides = [1, 1, 1]} : vector<2x8x96xf32> to vector<2x8x8xf32>
    %21 = vector.extract_strided_slice %17 {offsets = [0, 0, 56], sizes = [2, 8, 8], strides = [1, 1, 1]} : vector<2x8x96xf32> to vector<2x8x8xf32>
    %22 = tpu.concatenate %18, %19, %20, %21 in 0 : vector<2x8x8xf32>, vector<2x8x8xf32>, vector<2x8x8xf32>, vector<2x8x8xf32> -> vector<8x8x8xf32>
    %23 = arith.truncf %22 : vector<8x8x8xf32> to vector<8x8x8xbf16>
    %24 = vector.shape_cast %9 : vector<16x96xf32> to vector<2x8x96xf32>
    %25 = vector.extract_strided_slice %24 {offsets = [0, 0, 64], sizes = [2, 8, 8], strides = [1, 1, 1]} : vector<2x8x96xf32> to vector<2x8x8xf32>
    %26 = vector.extract_strided_slice %24 {offsets = [0, 0, 72], sizes = [2, 8, 8], strides = [1, 1, 1]} : vector<2x8x96xf32> to vector<2x8x8xf32>
    %27 = vector.extract_strided_slice %24 {offsets = [0, 0, 80], sizes = [2, 8, 8], strides = [1, 1, 1]} : vector<2x8x96xf32> to vector<2x8x8xf32>
    %28 = vector.extract_strided_slice %24 {offsets = [0, 0, 88], sizes = [2, 8, 8], strides = [1, 1, 1]} : vector<2x8x96xf32> to vector<2x8x8xf32>
    %29 = tpu.concatenate %25, %26, %27, %28 in 0 : vector<2x8x8xf32>, vector<2x8x8xf32>, vector<2x8x8xf32>, vector<2x8x8xf32> -> vector<8x8x8xf32>
    %30 = arith.truncf %29 : vector<8x8x8xf32> to vector<8x8x8xbf16>
    "tpu.trace_start"() <{level = 10 : i32, message = "bqd,bkd->bqk"}> : () -> ()
    %cst_6 = arith.constant dense<0.000000e+00> : vector<8x8x8xf32>
    %31 = tpu.matmul %16, %23, %cst_6 {dimension_numbers = #tpu.dot_dimension_numbers<[2], [2], [1], [1], [0, 0, 0, 1, 1, 1], [0], [0]>} : vector<8x8x8xbf16>, vector<8x8x8xbf16>, vector<8x8x8xf32> -> vector<8x8x8xf32>
    "tpu.trace_stop"() : () -> ()
    %cst_7 = arith.constant 0.353553385 : f32
    %32 = vector.broadcast %cst_7 : f32 to vector<8x8x8xf32>
    %33 = arith.mulf %31, %32 : vector<8x8x8xf32>
    %34 = vector.shape_cast %4 : vector<8x8xf32> to vector<1x8x8xf32>
    %35 = vector.broadcast %34 : vector<1x8x8xf32> to vector<8x8x8xf32>
    %36 = arith.addf %33, %35 : vector<8x8x8xf32>
    %cst_8 = arith.constant dense<0xFF800000> : vector<8x8xf32>
    %37 = vector.multi_reduction <maximumf>, %36, %cst_8 [2] : vector<8x8x8xf32> to vector<8x8xf32>
    %38 = vector.shape_cast %37 : vector<8x8xf32> to vector<8x8x1xf32>
    %39 = vector.broadcast %38 : vector<8x8x1xf32> to vector<8x8x8xf32>
    %40 = arith.subf %36, %39 : vector<8x8x8xf32>
    %41 = math.exp %40 : vector<8x8x8xf32>
    %cst_9 = arith.constant dense<0.000000e+00> : vector<8x8xf32>
    %42 = vector.multi_reduction <add>, %41, %cst_9 [2] : vector<8x8x8xf32> to vector<8x8xf32>
    %43 = vector.shape_cast %42 : vector<8x8xf32> to vector<8x8x1xf32>
    %44 = tpu.reciprocal %43 {approx = true} : vector<8x8x1xf32> -> vector<8x8x1xf32>
    %45 = vector.broadcast %44 : vector<8x8x1xf32> to vector<8x8x8xf32>
    %46 = arith.mulf %41, %45 : vector<8x8x8xf32>
    %47 = arith.truncf %46 : vector<8x8x8xf32> to vector<8x8x8xbf16>
    "tpu.trace_start"() <{level = 10 : i32, message = "bqk,bkd->bqd"}> : () -> ()
    %cst_10 = arith.constant dense<0.000000e+00> : vector<8x8x8xf32>
    %48 = tpu.matmul %47, %30, %cst_10 {dimension_numbers = #tpu.dot_dimension_numbers<[2], [1], [1], [2], [0, 0, 0, 1, 1, 2], [0], [0]>} : vector<8x8x8xbf16>, vector<8x8x8xbf16>, vector<8x8x8xf32> -> vector<8x8x8xf32>
    "tpu.trace_stop"() : () -> ()
    %49 = vector.extract_strided_slice %48 {offsets = [0, 0, 0], sizes = [2, 8, 8], strides = [1, 1, 1]} : vector<8x8x8xf32> to vector<2x8x8xf32>
    %50 = vector.extract_strided_slice %48 {offsets = [2, 0, 0], sizes = [2, 8, 8], strides = [1, 1, 1]} : vector<8x8x8xf32> to vector<2x8x8xf32>
    %51 = vector.extract_strided_slice %48 {offsets = [4, 0, 0], sizes = [2, 8, 8], strides = [1, 1, 1]} : vector<8x8x8xf32> to vector<2x8x8xf32>
    %52 = vector.extract_strided_slice %48 {offsets = [6, 0, 0], sizes = [2, 8, 8], strides = [1, 1, 1]} : vector<8x8x8xf32> to vector<2x8x8xf32>
    %53 = tpu.concatenate %49, %50, %51, %52 in 2 : vector<2x8x8xf32>, vector<2x8x8xf32>, vector<2x8x8xf32>, vector<2x8x8xf32> -> vector<2x8x32xf32>
    %54 = vector.shape_cast %53 : vector<2x8x32xf32> to vector<16x32xf32>
    %55 = arith.truncf %54 : vector<16x32xf32> to vector<16x32xbf16>
    %56 = arith.index_cast %arg1 : i32 to index
    %c0_11 = arith.constant 0 : index
    %c0_12 = arith.constant 0 : index
    %57 = vector.load %arg6[%56, %c0_11, %c0_12] : memref<6x32x32xbf16, #tpu.memory_space<vmem>>, vector<1x32x32xbf16>
    %58 = vector.shape_cast %57 : vector<1x32x32xbf16> to vector<32x32xbf16>
    %cst_13 = arith.constant dense<0.000000e+00> : vector<16x32xf32>
    %59 = tpu.matmul %55, %58, %cst_13 {dimension_numbers = #tpu.dot_dimension_numbers<[1], [0], [0], [1], [0, 0, 1, 1], [], []>} : vector<16x32xbf16>, vector<32x32xbf16>, vector<16x32xf32> -> vector<16x32xf32>
    %60 = arith.addf %59, %3 : vector<16x32xf32>
    %61 = arith.index_cast %arg1 : i32 to index
    %c0_14 = arith.constant 0 : index
    %c0_15 = arith.constant 0 : index
    %62 = vector.load %arg7[%61, %c0_14, %c0_15] : memref<6x1x32xf32, #tpu.memory_space<vmem>>, vector<1x1x32xf32>
    %63 = vector.shape_cast %62 : vector<1x1x32xf32> to vector<1x32xf32>
    %64 = arith.index_cast %arg1 : i32 to index
    %c0_16 = arith.constant 0 : index
    %c0_17 = arith.constant 0 : index
    %65 = vector.load %arg8[%64, %c0_16, %c0_17] : memref<6x1x32xf32, #tpu.memory_space<vmem>>, vector<1x1x32xf32>
    %66 = vector.shape_cast %65 : vector<1x1x32xf32> to vector<1x32xf32>
    %cst_18 = arith.constant dense<0.000000e+00> : vector<16xf32>
    %67 = vector.multi_reduction <add>, %60, %cst_18 [1] : vector<16x32xf32> to vector<16xf32>
    %68 = vector.shape_cast %67 : vector<16xf32> to vector<16x1xf32>
    %cst_19 = arith.constant 3.200000e+01 : f32
    %69 = vector.broadcast %cst_19 : f32 to vector<16x1xf32>
    %70 = arith.divf %68, %69 : vector<16x1xf32>
    %71 = vector.broadcast %70 : vector<16x1xf32> to vector<16x32xf32>
    %72 = arith.subf %60, %71 : vector<16x32xf32>
    %73 = arith.mulf %72, %72 : vector<16x32xf32>
    %cst_20 = arith.constant dense<0.000000e+00> : vector<16xf32>
    %74 = vector.multi_reduction <add>, %73, %cst_20 [1] : vector<16x32xf32> to vector<16xf32>
    %75 = vector.shape_cast %74 : vector<16xf32> to vector<16x1xf32>
    %cst_21 = arith.constant 3.200000e+01 : f32
    %76 = vector.broadcast %cst_21 : f32 to vector<16x1xf32>
    %77 = arith.divf %75, %76 : vector<16x1xf32>
    %78 = vector.broadcast %70 : vector<16x1xf32> to vector<16x32xf32>
    %79 = arith.subf %60, %78 : vector<16x32xf32>
    %cst_22 = arith.constant 9.99999974E-6 : f32
    %80 = vector.broadcast %cst_22 : f32 to vector<16x1xf32>
    %81 = arith.addf %77, %80 : vector<16x1xf32>
    %82 = math.rsqrt %81 : vector<16x1xf32>
    %83 = vector.broadcast %82 : vector<16x1xf32> to vector<16x32xf32>
    %84 = arith.mulf %79, %83 : vector<16x32xf32>
    %85 = vector.broadcast %63 : vector<1x32xf32> to vector<16x32xf32>
    %86 = arith.mulf %84, %85 : vector<16x32xf32>
    %87 = vector.broadcast %66 : vector<1x32xf32> to vector<16x32xf32>
    %88 = arith.addf %86, %87 : vector<16x32xf32>
    %89 = arith.truncf %88 : vector<16x32xf32> to vector<16x32xbf16>
    %90 = arith.index_cast %arg1 : i32 to index
    %c0_23 = arith.constant 0 : index
    %c0_24 = arith.constant 0 : index
    %91 = vector.load %arg9[%90, %c0_23, %c0_24] : memref<6x32x32xbf16, #tpu.memory_space<vmem>>, vector<1x32x32xbf16>
    %92 = vector.shape_cast %91 : vector<1x32x32xbf16> to vector<32x32xbf16>
    %cst_25 = arith.constant dense<0.000000e+00> : vector<16x32xf32>
    %93 = tpu.matmul %89, %92, %cst_25 {dimension_numbers = #tpu.dot_dimension_numbers<[1], [0], [0], [1], [0, 0, 1, 1], [], []>} : vector<16x32xbf16>, vector<32x32xbf16>, vector<16x32xf32> -> vector<16x32xf32>
    %c0_26 = arith.constant 0 : index
    %c0_27 = arith.constant 0 : index
    %c0_28 = arith.constant 0 : index
    %94 = vector.load %arg3[%c0_26, %c0_27, %c0_28] : memref<2x8x32xf32, #tpu.memory_space<vmem>>, vector<2x8x32xf32>
    %95 = vector.shape_cast %94 : vector<2x8x32xf32> to vector<16x32xf32>
    %96 = arith.truncf %95 : vector<16x32xf32> to vector<16x32xbf16>
    %97 = arith.index_cast %arg1 : i32 to index
    %c0_29 = arith.constant 0 : index
    %c0_30 = arith.constant 0 : index
    %98 = vector.load %arg10[%97, %c0_29, %c0_30] : memref<6x32x64xbf16, #tpu.memory_space<vmem>>, vector<1x32x64xbf16>
    %99 = vector.shape_cast %98 : vector<1x32x64xbf16> to vector<32x64xbf16>
    %cst_31 = arith.constant dense<0.000000e+00> : vector<16x64xf32>
    %100 = tpu.matmul %96, %99, %cst_31 {dimension_numbers = #tpu.dot_dimension_numbers<[1], [0], [0], [1], [0, 0, 1, 1], [], []>} : vector<16x32xbf16>, vector<32x64xbf16>, vector<16x64xf32> -> vector<16x64xf32>
    %101 = vector.shape_cast %93 : vector<16x32xf32> to vector<2x8x32xf32>
    %102 = vector.extract_strided_slice %101 {offsets = [0, 0, 0], sizes = [2, 8, 8], strides = [1, 1, 1]} : vector<2x8x32xf32> to vector<2x8x8xf32>
    %103 = vector.extract_strided_slice %101 {offsets = [0, 0, 8], sizes = [2, 8, 8], strides = [1, 1, 1]} : vector<2x8x32xf32> to vector<2x8x8xf32>
    %104 = vector.extract_strided_slice %101 {offsets = [0, 0, 16], sizes = [2, 8, 8], strides = [1, 1, 1]} : vector<2x8x32xf32> to vector<2x8x8xf32>
    %105 = vector.extract_strided_slice %101 {offsets = [0, 0, 24], sizes = [2, 8, 8], strides = [1, 1, 1]} : vector<2x8x32xf32> to vector<2x8x8xf32>
    %106 = tpu.concatenate %102, %103, %104, %105 in 0 : vector<2x8x8xf32>, vector<2x8x8xf32>, vector<2x8x8xf32>, vector<2x8x8xf32> -> vector<8x8x8xf32>
    %107 = arith.truncf %106 : vector<8x8x8xf32> to vector<8x8x8xbf16>
    %108 = vector.shape_cast %100 : vector<16x64xf32> to vector<2x8x64xf32>
    %109 = vector.extract_strided_slice %108 {offsets = [0, 0, 0], sizes = [2, 8, 8], strides = [1, 1, 1]} : vector<2x8x64xf32> to vector<2x8x8xf32>
    %110 = vector.extract_strided_slice %108 {offsets = [0, 0, 8], sizes = [2, 8, 8], strides = [1, 1, 1]} : vector<2x8x64xf32> to vector<2x8x8xf32>
    %111 = vector.extract_strided_slice %108 {offsets = [0, 0, 16], sizes = [2, 8, 8], strides = [1, 1, 1]} : vector<2x8x64xf32> to vector<2x8x8xf32>
    %112 = vector.extract_strided_slice %108 {offsets = [0, 0, 24], sizes = [2, 8, 8], strides = [1, 1, 1]} : vector<2x8x64xf32> to vector<2x8x8xf32>
    %113 = tpu.concatenate %109, %110, %111, %112 in 0 : vector<2x8x8xf32>, vector<2x8x8xf32>, vector<2x8x8xf32>, vector<2x8x8xf32> -> vector<8x8x8xf32>
    %114 = arith.truncf %113 : vector<8x8x8xf32> to vector<8x8x8xbf16>
    %115 = vector.shape_cast %100 : vector<16x64xf32> to vector<2x8x64xf32>
    %116 = vector.extract_strided_slice %115 {offsets = [0, 0, 32], sizes = [2, 8, 8], strides = [1, 1, 1]} : vector<2x8x64xf32> to vector<2x8x8xf32>
    %117 = vector.extract_strided_slice %115 {offsets = [0, 0, 40], sizes = [2, 8, 8], strides = [1, 1, 1]} : vector<2x8x64xf32> to vector<2x8x8xf32>
    %118 = vector.extract_strided_slice %115 {offsets = [0, 0, 48], sizes = [2, 8, 8], strides = [1, 1, 1]} : vector<2x8x64xf32> to vector<2x8x8xf32>
    %119 = vector.extract_strided_slice %115 {offsets = [0, 0, 56], sizes = [2, 8, 8], strides = [1, 1, 1]} : vector<2x8x64xf32> to vector<2x8x8xf32>
    %120 = tpu.concatenate %116, %117, %118, %119 in 0 : vector<2x8x8xf32>, vector<2x8x8xf32>, vector<2x8x8xf32>, vector<2x8x8xf32> -> vector<8x8x8xf32>
    %121 = arith.truncf %120 : vector<8x8x8xf32> to vector<8x8x8xbf16>
    "tpu.trace_start"() <{level = 10 : i32, message = "bqd,bkd->bqk"}> : () -> ()
    %cst_32 = arith.constant dense<0.000000e+00> : vector<8x8x8xf32>
    %122 = tpu.matmul %107, %114, %cst_32 {dimension_numbers = #tpu.dot_dimension_numbers<[2], [2], [1], [1], [0, 0, 0, 1, 1, 1], [0], [0]>} : vector<8x8x8xbf16>, vector<8x8x8xbf16>, vector<8x8x8xf32> -> vector<8x8x8xf32>
    "tpu.trace_stop"() : () -> ()
    %cst_33 = arith.constant 0.353553385 : f32
    %123 = vector.broadcast %cst_33 : f32 to vector<8x8x8xf32>
    %124 = arith.mulf %122, %123 : vector<8x8x8xf32>
    %cst_34 = arith.constant dense<0xFF800000> : vector<8x8xf32>
    %125 = vector.multi_reduction <maximumf>, %124, %cst_34 [2] : vector<8x8x8xf32> to vector<8x8xf32>
    %126 = vector.shape_cast %125 : vector<8x8xf32> to vector<8x8x1xf32>
    %127 = vector.broadcast %126 : vector<8x8x1xf32> to vector<8x8x8xf32>
    %128 = arith.subf %124, %127 : vector<8x8x8xf32>
    %129 = math.exp %128 : vector<8x8x8xf32>
    %cst_35 = arith.constant dense<0.000000e+00> : vector<8x8xf32>
    %130 = vector.multi_reduction <add>, %129, %cst_35 [2] : vector<8x8x8xf32> to vector<8x8xf32>
    %131 = vector.shape_cast %130 : vector<8x8xf32> to vector<8x8x1xf32>
    %132 = tpu.reciprocal %131 {approx = true} : vector<8x8x1xf32> -> vector<8x8x1xf32>
    %133 = vector.broadcast %132 : vector<8x8x1xf32> to vector<8x8x8xf32>
    %134 = arith.mulf %129, %133 : vector<8x8x8xf32>
    %135 = arith.truncf %134 : vector<8x8x8xf32> to vector<8x8x8xbf16>
    "tpu.trace_start"() <{level = 10 : i32, message = "bqk,bkd->bqd"}> : () -> ()
    %cst_36 = arith.constant dense<0.000000e+00> : vector<8x8x8xf32>
    %136 = tpu.matmul %135, %121, %cst_36 {dimension_numbers = #tpu.dot_dimension_numbers<[2], [1], [1], [2], [0, 0, 0, 1, 1, 2], [0], [0]>} : vector<8x8x8xbf16>, vector<8x8x8xbf16>, vector<8x8x8xf32> -> vector<8x8x8xf32>
    "tpu.trace_stop"() : () -> ()
    %137 = vector.extract_strided_slice %136 {offsets = [0, 0, 0], sizes = [2, 8, 8], strides = [1, 1, 1]} : vector<8x8x8xf32> to vector<2x8x8xf32>
    %138 = vector.extract_strided_slice %136 {offsets = [2, 0, 0], sizes = [2, 8, 8], strides = [1, 1, 1]} : vector<8x8x8xf32> to vector<2x8x8xf32>
    %139 = vector.extract_strided_slice %136 {offsets = [4, 0, 0], sizes = [2, 8, 8], strides = [1, 1, 1]} : vector<8x8x8xf32> to vector<2x8x8xf32>
    %140 = vector.extract_strided_slice %136 {offsets = [6, 0, 0], sizes = [2, 8, 8], strides = [1, 1, 1]} : vector<8x8x8xf32> to vector<2x8x8xf32>
    %141 = tpu.concatenate %137, %138, %139, %140 in 2 : vector<2x8x8xf32>, vector<2x8x8xf32>, vector<2x8x8xf32>, vector<2x8x8xf32> -> vector<2x8x32xf32>
    %142 = vector.shape_cast %141 : vector<2x8x32xf32> to vector<16x32xf32>
    %143 = arith.truncf %142 : vector<16x32xf32> to vector<16x32xbf16>
    %144 = arith.index_cast %arg1 : i32 to index
    %c0_37 = arith.constant 0 : index
    %c0_38 = arith.constant 0 : index
    %145 = vector.load %arg11[%144, %c0_37, %c0_38] : memref<6x32x32xbf16, #tpu.memory_space<vmem>>, vector<1x32x32xbf16>
    %146 = vector.shape_cast %145 : vector<1x32x32xbf16> to vector<32x32xbf16>
    %cst_39 = arith.constant dense<0.000000e+00> : vector<16x32xf32>
    %147 = tpu.matmul %143, %146, %cst_39 {dimension_numbers = #tpu.dot_dimension_numbers<[1], [0], [0], [1], [0, 0, 1, 1], [], []>} : vector<16x32xbf16>, vector<32x32xbf16>, vector<16x32xf32> -> vector<16x32xf32>
    %148 = arith.addf %147, %88 : vector<16x32xf32>
    %149 = arith.index_cast %arg1 : i32 to index
    %c0_40 = arith.constant 0 : index
    %c0_41 = arith.constant 0 : index
    %150 = vector.load %arg12[%149, %c0_40, %c0_41] : memref<6x1x32xf32, #tpu.memory_space<vmem>>, vector<1x1x32xf32>
    %151 = vector.shape_cast %150 : vector<1x1x32xf32> to vector<1x32xf32>
    %152 = arith.index_cast %arg1 : i32 to index
    %c0_42 = arith.constant 0 : index
    %c0_43 = arith.constant 0 : index
    %153 = vector.load %arg13[%152, %c0_42, %c0_43] : memref<6x1x32xf32, #tpu.memory_space<vmem>>, vector<1x1x32xf32>
    %154 = vector.shape_cast %153 : vector<1x1x32xf32> to vector<1x32xf32>
    %cst_44 = arith.constant dense<0.000000e+00> : vector<16xf32>
    %155 = vector.multi_reduction <add>, %148, %cst_44 [1] : vector<16x32xf32> to vector<16xf32>
    %156 = vector.shape_cast %155 : vector<16xf32> to vector<16x1xf32>
    %cst_45 = arith.constant 3.200000e+01 : f32
    %157 = vector.broadcast %cst_45 : f32 to vector<16x1xf32>
    %158 = arith.divf %156, %157 : vector<16x1xf32>
    %159 = vector.broadcast %158 : vector<16x1xf32> to vector<16x32xf32>
    %160 = arith.subf %148, %159 : vector<16x32xf32>
    %161 = arith.mulf %160, %160 : vector<16x32xf32>
    %cst_46 = arith.constant dense<0.000000e+00> : vector<16xf32>
    %162 = vector.multi_reduction <add>, %161, %cst_46 [1] : vector<16x32xf32> to vector<16xf32>
    %163 = vector.shape_cast %162 : vector<16xf32> to vector<16x1xf32>
    %cst_47 = arith.constant 3.200000e+01 : f32
    %164 = vector.broadcast %cst_47 : f32 to vector<16x1xf32>
    %165 = arith.divf %163, %164 : vector<16x1xf32>
    %166 = vector.broadcast %158 : vector<16x1xf32> to vector<16x32xf32>
    %167 = arith.subf %148, %166 : vector<16x32xf32>
    %cst_48 = arith.constant 9.99999974E-6 : f32
    %168 = vector.broadcast %cst_48 : f32 to vector<16x1xf32>
    %169 = arith.addf %165, %168 : vector<16x1xf32>
    %170 = math.rsqrt %169 : vector<16x1xf32>
    %171 = vector.broadcast %170 : vector<16x1xf32> to vector<16x32xf32>
    %172 = arith.mulf %167, %171 : vector<16x32xf32>
    %173 = vector.broadcast %151 : vector<1x32xf32> to vector<16x32xf32>
    %174 = arith.mulf %172, %173 : vector<16x32xf32>
    %175 = vector.broadcast %154 : vector<1x32xf32> to vector<16x32xf32>
    %176 = arith.addf %174, %175 : vector<16x32xf32>
    %177 = arith.truncf %176 : vector<16x32xf32> to vector<16x32xbf16>
    %178 = arith.index_cast %arg1 : i32 to index
    %c0_49 = arith.constant 0 : index
    %c0_50 = arith.constant 0 : index
    %179 = vector.load %arg14[%178, %c0_49, %c0_50] : memref<6x32x2048xbf16, #tpu.memory_space<vmem>>, vector<1x32x2048xbf16>
    %180 = vector.shape_cast %179 : vector<1x32x2048xbf16> to vector<32x2048xbf16>
    %cst_51 = arith.constant dense<0.000000e+00> : vector<16x2048xf32>
    %181 = tpu.matmul %177, %180, %cst_51 {dimension_numbers = #tpu.dot_dimension_numbers<[1], [0], [0], [1], [0, 0, 1, 1], [], []>} : vector<16x32xbf16>, vector<32x2048xbf16>, vector<16x2048xf32> -> vector<16x2048xf32>
    %182 = arith.index_cast %arg1 : i32 to index
    %c0_52 = arith.constant 0 : index
    %c0_53 = arith.constant 0 : index
    %183 = vector.load %arg15[%182, %c0_52, %c0_53] : memref<6x1x2048xf32, #tpu.memory_space<vmem>>, vector<1x1x2048xf32>
    %184 = vector.shape_cast %183 : vector<1x1x2048xf32> to vector<1x2048xf32>
    %185 = vector.broadcast %184 : vector<1x2048xf32> to vector<16x2048xf32>
    %186 = arith.addf %181, %185 : vector<16x2048xf32>
    %cst_54 = arith.constant 0.000000e+00 : f32
    %187 = vector.broadcast %cst_54 : f32 to vector<16x2048xf32>
    %188 = arith.maximumf %186, %187 : vector<16x2048xf32>
    %189 = arith.truncf %188 : vector<16x2048xf32> to vector<16x2048xbf16>
    %190 = arith.index_cast %arg1 : i32 to index
    %c0_55 = arith.constant 0 : index
    %c0_56 = arith.constant 0 : index
    %191 = vector.load %arg16[%190, %c0_55, %c0_56] : memref<6x2048x32xbf16, #tpu.memory_space<vmem>>, vector<1x2048x32xbf16>
    %192 = vector.shape_cast %191 : vector<1x2048x32xbf16> to vector<2048x32xbf16>
    %cst_57 = arith.constant dense<0.000000e+00> : vector<16x32xf32>
    %193 = tpu.matmul %189, %192, %cst_57 {dimension_numbers = #tpu.dot_dimension_numbers<[1], [0], [0], [1], [0, 0, 1, 1], [], []>} : vector<16x2048xbf16>, vector<2048x32xbf16>, vector<16x32xf32> -> vector<16x32xf32>
    %194 = arith.index_cast %arg1 : i32 to index
    %c0_58 = arith.constant 0 : index
    %c0_59 = arith.constant 0 : index
    %195 = vector.load %arg17[%194, %c0_58, %c0_59] : memref<6x1x32xf32, #tpu.memory_space<vmem>>, vector<1x1x32xf32>
    %196 = vector.shape_cast %195 : vector<1x1x32xf32> to vector<1x32xf32>
    %197 = vector.broadcast %196 : vector<1x32xf32> to vector<16x32xf32>
    %198 = arith.addf %193, %197 : vector<16x32xf32>
    %199 = arith.addf %198, %176 : vector<16x32xf32>
    %200 = arith.index_cast %arg1 : i32 to index
    %c0_60 = arith.constant 0 : index
    %c0_61 = arith.constant 0 : index
    %201 = vector.load %arg18[%200, %c0_60, %c0_61] : memref<6x1x32xf32, #tpu.memory_space<vmem>>, vector<1x1x32xf32>
    %202 = vector.shape_cast %201 : vector<1x1x32xf32> to vector<1x32xf32>
    %203 = arith.index_cast %arg1 : i32 to index
    %c0_62 = arith.constant 0 : index
    %c0_63 = arith.constant 0 : index
    %204 = vector.load %arg19[%203, %c0_62, %c0_63] : memref<6x1x32xf32, #tpu.memory_space<vmem>>, vector<1x1x32xf32>
    %205 = vector.shape_cast %204 : vector<1x1x32xf32> to vector<1x32xf32>
    %cst_64 = arith.constant dense<0.000000e+00> : vector<16xf32>
    %206 = vector.multi_reduction <add>, %199, %cst_64 [1] : vector<16x32xf32> to vector<16xf32>
    %207 = vector.shape_cast %206 : vector<16xf32> to vector<16x1xf32>
    %cst_65 = arith.constant 3.200000e+01 : f32
    %208 = vector.broadcast %cst_65 : f32 to vector<16x1xf32>
    %209 = arith.divf %207, %208 : vector<16x1xf32>
    %210 = vector.broadcast %209 : vector<16x1xf32> to vector<16x32xf32>
    %211 = arith.subf %199, %210 : vector<16x32xf32>
    %212 = arith.mulf %211, %211 : vector<16x32xf32>
    %cst_66 = arith.constant dense<0.000000e+00> : vector<16xf32>
    %213 = vector.multi_reduction <add>, %212, %cst_66 [1] : vector<16x32xf32> to vector<16xf32>
    %214 = vector.shape_cast %213 : vector<16xf32> to vector<16x1xf32>
    %cst_67 = arith.constant 3.200000e+01 : f32
    %215 = vector.broadcast %cst_67 : f32 to vector<16x1xf32>
    %216 = arith.divf %214, %215 : vector<16x1xf32>
    %217 = vector.broadcast %209 : vector<16x1xf32> to vector<16x32xf32>
    %218 = arith.subf %199, %217 : vector<16x32xf32>
    %cst_68 = arith.constant 9.99999974E-6 : f32
    %219 = vector.broadcast %cst_68 : f32 to vector<16x1xf32>
    %220 = arith.addf %216, %219 : vector<16x1xf32>
    %221 = math.rsqrt %220 : vector<16x1xf32>
    %222 = vector.broadcast %221 : vector<16x1xf32> to vector<16x32xf32>
    %223 = arith.mulf %218, %222 : vector<16x32xf32>
    %224 = vector.broadcast %202 : vector<1x32xf32> to vector<16x32xf32>
    %225 = arith.mulf %223, %224 : vector<16x32xf32>
    %226 = vector.broadcast %205 : vector<1x32xf32> to vector<16x32xf32>
    %227 = arith.addf %225, %226 : vector<16x32xf32>
    %c0_69 = arith.constant 0 : index
    %c0_70 = arith.constant 0 : index
    %228 = vector.load %arg21[%c0_69, %c0_70] : memref<16x32xf32, #tpu.memory_space<vmem>>, vector<16x32xf32>
    tpu.vector_store %arg21[%c0_69, %c0_70], %227 {strides = array<i32>} : memref<16x32xf32, #tpu.memory_space<vmem>>, vector<16x32xf32>,
    %c5_i32 = arith.constant 5 : i32
    %229 = arith.cmpi eq, %arg1, %c5_i32 : i32
    %230 = arith.extui %229 : i1 to i32
    %c0_i32_71 = arith.constant 0 : i32
    %231 = arith.cmpi ne, %230, %c0_i32_71 : i32
    scf.if %231 {
      %232 = vector.shape_cast %227 : vector<16x32xf32> to vector<2x8x32xf32>
      %c0_72 = arith.constant 0 : index
      %c0_73 = arith.constant 0 : index
      %c0_74 = arith.constant 0 : index
      %233 = vector.load %arg20[%c0_72, %c0_73, %c0_74] : memref<2x8x32xf32, #tpu.memory_space<vmem>>, vector<2x8x32xf32>
      tpu.vector_store %arg20[%c0_72, %c0_73, %c0_74], %232 {strides = array<i32>} : memref<2x8x32xf32, #tpu.memory_space<vmem>>, vector<2x8x32xf32>,
    } else {
    }
    return
  }
  func.func @transform_0(%arg0: i32, %arg1: i32) -> (i32, i32, i32) {
    %c0_i32 = arith.constant 0 : i32
    %c0_i32_0 = arith.constant 0 : i32
    %c0_i32_1 = arith.constant 0 : i32
    return %arg0, %c0_i32, %c0_i32_0 : i32, i32, i32
  }
  func.func @transform_1(%arg0: i32, %arg1: i32) -> (i32, i32, i32) {
    %c0_i32 = arith.constant 0 : i32
    %c0_i32_0 = arith.constant 0 : i32
    %c0_i32_1 = arith.constant 0 : i32
    return %arg0, %c0_i32, %c0_i32_0 : i32, i32, i32
  }
  func.func @transform_2(%arg0: i32, %arg1: i32) -> (i32, i32) {
    %c0_i32 = arith.constant 0 : i32
    %c0_i32_0 = arith.constant 0 : i32
    %c0_i32_1 = arith.constant 0 : i32
    return %c0_i32, %c0_i32_0 : i32, i32
  }
  func.func @transform_3(%arg0: i32, %arg1: i32) -> (i32, i32, i32) {
    %c0_i32 = arith.constant 0 : i32
    %c0_i32_0 = arith.constant 0 : i32
    %c0_i32_1 = arith.constant 0 : i32
    %c0_i32_2 = arith.constant 0 : i32
    return %c0_i32, %c0_i32_0, %c0_i32_1 : i32, i32, i32
  }
  func.func @transform_4(%arg0: i32, %arg1: i32) -> (i32, i32, i32) {
    %c0_i32 = arith.constant 0 : i32
    %c0_i32_0 = arith.constant 0 : i32
    %c0_i32_1 = arith.constant 0 : i32
    %c0_i32_2 = arith.constant 0 : i32
    return %c0_i32, %c0_i32_0, %c0_i32_1 : i32, i32, i32
  }
  func.func @transform_5(%arg0: i32, %arg1: i32) -> (i32, i32, i32) {
    %c0_i32 = arith.constant 0 : i32
    %c0_i32_0 = arith.constant 0 : i32
    %c0_i32_1 = arith.constant 0 : i32
    %c0_i32_2 = arith.constant 0 : i32
    return %c0_i32, %c0_i32_0, %c0_i32_1 : i32, i32, i32
  }
  func.func @transform_6(%arg0: i32, %arg1: i32) -> (i32, i32, i32) {
    %c0_i32 = arith.constant 0 : i32
    %c0_i32_0 = arith.constant 0 : i32
    %c0_i32_1 = arith.constant 0 : i32
    %c0_i32_2 = arith.constant 0 : i32
    return %c0_i32, %c0_i32_0, %c0_i32_1 : i32, i32, i32
  }
  func.func @transform_7(%arg0: i32, %arg1: i32) -> (i32, i32, i32) {
    %c0_i32 = arith.constant 0 : i32
    %c0_i32_0 = arith.constant 0 : i32
    %c0_i32_1 = arith.constant 0 : i32
    %c0_i32_2 = arith.constant 0 : i32
    return %c0_i32, %c0_i32_0, %c0_i32_1 : i32, i32, i32
  }
  func.func @transform_8(%arg0: i32, %arg1: i32) -> (i32, i32, i32) {
    %c0_i32 = arith.constant 0 : i32
    %c0_i32_0 = arith.constant 0 : i32
    %c0_i32_1 = arith.constant 0 : i32
    %c0_i32_2 = arith.constant 0 : i32
    return %c0_i32, %c0_i32_0, %c0_i32_1 : i32, i32, i32
  }
  func.func @transform_9(%arg0: i32, %arg1: i32) -> (i32, i32, i32) {
    %c0_i32 = arith.constant 0 : i32
    %c0_i32_0 = arith.constant 0 : i32
    %c0_i32_1 = arith.constant 0 : i32
    %c0_i32_2 = arith.constant 0 : i32
    return %c0_i32, %c0_i32_0, %c0_i32_1 : i32, i32, i32
  }
  func.func @transform_10(%arg0: i32, %arg1: i32) -> (i32, i32, i32) {
    %c0_i32 = arith.constant 0 : i32
    %c0_i32_0 = arith.constant 0 : i32
    %c0_i32_1 = arith.constant 0 : i32
    %c0_i32_2 = arith.constant 0 : i32
    return %c0_i32, %c0_i32_0, %c0_i32_1 : i32, i32, i32
  }
  func.func @transform_11(%arg0: i32, %arg1: i32) -> (i32, i32, i32) {
    %c0_i32 = arith.constant 0 : i32
    %c0_i32_0 = arith.constant 0 : i32
    %c0_i32_1 = arith.constant 0 : i32
    %c0_i32_2 = arith.constant 0 : i32
    return %c0_i32, %c0_i32_0, %c0_i32_1 : i32, i32, i32
  }
  func.func @transform_12(%arg0: i32, %arg1: i32) -> (i32, i32, i32) {
    %c0_i32 = arith.constant 0 : i32
    %c0_i32_0 = arith.constant 0 : i32
    %c0_i32_1 = arith.constant 0 : i32
    %c0_i32_2 = arith.constant 0 : i32
    return %c0_i32, %c0_i32_0, %c0_i32_1 : i32, i32, i32
  }
  func.func @transform_13(%arg0: i32, %arg1: i32) -> (i32, i32, i32) {
    %c0_i32 = arith.constant 0 : i32
    %c0_i32_0 = arith.constant 0 : i32
    %c0_i32_1 = arith.constant 0 : i32
    %c0_i32_2 = arith.constant 0 : i32
    return %c0_i32, %c0_i32_0, %c0_i32_1 : i32, i32, i32
  }
  func.func @transform_14(%arg0: i32, %arg1: i32) -> (i32, i32, i32) {
    %c0_i32 = arith.constant 0 : i32
    %c0_i32_0 = arith.constant 0 : i32
    %c0_i32_1 = arith.constant 0 : i32
    %c0_i32_2 = arith.constant 0 : i32
    return %c0_i32, %c0_i32_0, %c0_i32_1 : i32, i32, i32
  }
  func.func @transform_15(%arg0: i32, %arg1: i32) -> (i32, i32, i32) {
    %c0_i32 = arith.constant 0 : i32
    %c0_i32_0 = arith.constant 0 : i32
    %c0_i32_1 = arith.constant 0 : i32
    %c0_i32_2 = arith.constant 0 : i32
    return %c0_i32, %c0_i32_0, %c0_i32_1 : i32, i32, i32
  }
  func.func @transform_16(%arg0: i32, %arg1: i32) -> (i32, i32, i32) {
    %c0_i32 = arith.constant 0 : i32
    %c0_i32_0 = arith.constant 0 : i32
    %c0_i32_1 = arith.constant 0 : i32
    %c0_i32_2 = arith.constant 0 : i32
    return %c0_i32, %c0_i32_0, %c0_i32_1 : i32, i32, i32
  }
  func.func @transform_17(%arg0: i32, %arg1: i32) -> (i32, i32, i32) {
    %c0_i32 = arith.constant 0 : i32
    %c0_i32_0 = arith.constant 0 : i32
    %c0_i32_1 = arith.constant 0 : i32
    %c0_i32_2 = arith.constant 0 : i32
    return %c0_i32, %c0_i32_0, %c0_i32_1 : i32, i32, i32
  }
  func.func @transform_18(%arg0: i32, %arg1: i32) -> (i32, i32, i32) {
    %c0_i32 = arith.constant 0 : i32
    %c0_i32_0 = arith.constant 0 : i32
    %c0_i32_1 = arith.constant 0 : i32
    return %arg0, %c0_i32, %c0_i32_0 : i32, i32, i32
  }
}

</mosaic_0001>

<bundles_post_ra>
// kernel: tpu_custom_call.1
= control target key start
LH: loop header
LB: loop body
LE: loop exit
PB: predicated region body
PF: predicated region fallthrough
CT: control target
= control target key end

     0   :  { %s7206_s0 = inlined_call_operand.vmem [shape: f32[2,8,32], index: 0, kind: input, shape index: {}]   ;;  %s7207_s1 = inlined_call_operand.vmem [shape: f32[2,8,32], index: 1, kind: input, shape index: {}]   ;;  %s7208_s2 = inlined_call_operand.vmem [shape: f32[8,8], index: 2, kind: input, shape index: {}]   ;;  %s7209_s3 = inlined_call_operand.vmem [shape: bf16[6,32,96], index: 3, kind: input, shape index: {}]   ;;  %s7210_s4 = inlined_call_operand.vmem [shape: bf16[6,32,32], index: 4, kind: input, shape index: {}]   ;;  %s7211_s5 = inlined_call_operand.vmem [shape: f32[6,1,32], index: 5, kind: input, shape index: {}]   ;;  %s7212_s6 = inlined_call_operand.vmem [shape: f32[6,1,32], index: 6, kind: input, shape index: {}]   ;;  %s7213_s7 = inlined_call_operand.vmem [shape: bf16[6,32,32], index: 7, kind: input, shape index: {}]   ;;  %s7214_s8 = inlined_call_operand.vmem [shape: bf16[6,32,64], index: 8, kind: input, shape index: {}]   ;;  %s7215_s9 = inlined_call_operand.vmem [shape: bf16[6,32,32], index: 9, kind: input, shape index: {}]   ;;  %s7216_s10 = inlined_call_operand.vmem [shape: f32[6,1,32], index: 10, kind: input, shape index: {}]   ;;  %s7217_s11 = inlined_call_operand.vmem [shape: f32[6,1,32], index: 11, kind: input, shape index: {}]   ;;  %s7218_s12 = inlined_call_operand.vmem [shape: bf16[6,32,2048], index: 12, kind: input, shape index: {}]   ;;  %s7219_s13 = inlined_call_operand.vmem [shape: f32[6,1,2048], index: 13, kind: input, shape index: {}]   ;;  %s7220_s14 = inlined_call_operand.vmem [shape: bf16[6,2048,32], index: 14, kind: input, shape index: {}]   ;;  %s7221_s15 = inlined_call_operand.vmem [shape: f32[6,1,32], index: 15, kind: input, shape index: {}]   ;;  %s7222_s16 = inlined_call_operand.vmem [shape: f32[6,1,32], index: 16, kind: input, shape index: {}]   ;;  %s7223_s17 = inlined_call_operand.vmem [shape: f32[6,1,32], index: 17, kind: input, shape index: {}]   ;;  %s7224_s18 = inlined_call_operand.hbm [shape: f32[2,8,32], index: 18, kind: output, shape index: {}]  }
   0x1   :  { %7237 = sst [smem:[#allocation6_spill]] %s7206_s0 }
   0x2   :  { %7238 = sst [smem:[#allocation7_spill]] %s7207_s1 }
   0x3   :  { %7239 = sst [smem:[#allocation8_spill]] %s7208_s2 }
   0x4   :  { %23 = vsyncpa [#allocation4], 0  ;;  %s6360_s27 = smov 0   ;;  %s6362_s28 = smov 0  }
   0x5   :  { %s6364_s29 = smov 0  }
   0x6 LB: > { %s38_s0 = sadd.s32 1, %s6246_s28  ;;  %p5132_p1 = scmp.ge.s32.totalorder %s6250_s29, 1  ;;  %s6250_s29 = sphi %s6364_s29, %s29_s29   ;;  %s6246_s28 = sphi %s6362_s28, %s7253_s28   ;;  %s6242_s27 = sphi %s6360_s27, %s7252_s27  }
   0x7   : > { %p39_p0 = scmp.ge.s32.totalorder %s38_s0, 6  ;;  %p537_p2 = scmp.lt.s32.totalorder %s6250_s29, 7 }
   0x9   : > { %s7255_s0 = smov (%p39_p0, %s38_s0), 0  ;;  %p538_p3 = pnand %p5132_p1, %p537_p2 }
   0xa   : > { %p5133_p4 = scmp.ne.s32.totalorder (!%p538_p3), %s6242_s27, 0 }
   0xb   : > { %541 = sbr.rel (%p538_p3) target bundleno = 4630 (0x1216), region = 92 }
  0x12   : > { %608 = sbr.rel (%p5133_p4) target bundleno = 26 (0x1a), region = 96  ;;  %s7240_s20 = sld [smem:[#allocation6_spill]] (!%p5133_p4)  ;;  %vm611_vm0 = vcmask (!%p5133_p4), 261120  }
  0x18   : > { %v609_v0 = vld [vmem:[%s7240_s20] sm:$0xff] (!%p5133_p4)  ;;  %v610_v1 = vld [vmem:[%s7240_s20 + $0x8] sm:$0xff] (!%p5133_p4) }
  0x19   : > { %612 = vst.msk [vmem:[#allocation2] sm:$0xff] %vm611_vm0, %v609_v0  ;;  %613 = vst.msk [vmem:[#allocation2 + $0x8] sm:$0xff] %vm611_vm0, %v610_v1 }
  0x1a PF: > { %s6389_s2 = sshll.u32 %s6242_s27, 4  ;;  %v6252_v2 = vmov 0.0   ;;  %vm6253_vm1 = vmmov 0   ;;  %vm637_vm2 = vcmask 261120   ;;  %s7232_s26 = smov 104   ;;  %vm713_vm3 = vcmask 64512  }
  0x1b   : > { %5634 = vmatprep.subr.bf16.mxu0 %v6252_v2  ;;  %s620_s25 = scalar_lea.vmem %s7209_s3, %s6389_s2  ;;  %5638 = vmatprep.mubr.msk.bf16.mxu0 %vm6253_vm1, %v6252_v2  ;;  %s6255_s19 = smov 120   ;;  %vm1220_vm4 = vcmask 1043456   ;;  %vm1626_vm5 = vcmask 130048   ;;  %vm1629_vm6 = vcmask 195584  }
  0x1c   : > { %v5984_v3 = vld [vmem:[%s620_s25] sm:$0xff]   ;;  %5642 = vmatprep.subr.bf16.mxu1 %v6252_v2  ;;  %5644 = vmatprep.mubr.msk.bf16.mxu1 %vm6253_vm1, %v6252_v2  ;;  %v5985_v4 = vld [vmem:[%s620_s25 + $0x8] sm:$0xff]   ;;  %s7230_s1 = smov 96   ;;  %s7234_s21 = smov 112  }
  0x1d   : > { %5635 = vmatpush3.bf16.msra.mxu0 %v5984_v3  ;;  %s6258_s22 = smov 64   ;;  %s7241_s25 = sld [smem:[#allocation8_spill]] }
  0x1e   : > { %5636 = vmatprep.subr.bf16.mxu0 %v6252_v2  ;;  %s7228_s30 = smov 16   ;;  %s7227_s23 = smov 24  }
  0x1f   : > { %s2822_s24 = scalar_lea.vmem %s7215_s9, %s6389_s2  ;;  %p5367_p5 = scmp.ne.s32.totalorder %s6242_s27, 5 }
  0x20   : > { %v6401_v5 = vld [vmem:[#allocation2] sm:$0xff]  ;;  %v6403_v6 = vld [vmem:[#allocation2 + $0x8] sm:$0xff] }
  0x21   : > { %v617_v7 = vpack.c.bf16 %v6403_v6, %v6401_v5  ;;  %5637 = vmatpush3.bf16.msra.mxu0 %v5985_v4 }
  0x22   : > { %5648 = vmatprep.subr.bf16.mxu0 %v6252_v2 }
  0x23   : > { %v616_v51 = vld [vmem:[%s7241_s25] sm:$0xff]  ;;  %s1634_s25 = scalar_lea.vmem %s7210_s4, %s6389_s2 }
  0x24   : > { %5639 = vmatmul.mubr.msk.bf16.vlgmr.msra.gmra.mrb[0].mxu0 %vm637_vm2, %v617_v7 }
  0x25   : > { %5650 = vmatprep.mubr.msk.bf16.mxu0 %vm6253_vm1, %v6252_v2 }
  0xf7   : > { %v675_v8 = vpop.f32.mrb[0].mxu0 }
  0xf8   : > { %v5640_v9 = vpop.f32.mrb[1].mxu0  ;;  %v702_v13 = vpack.c.bf16 %v675_v8, %v675_v8 }
  0xf9   : > { %v678_v10 = vpop.f32.mrb[2].mxu0 }
  0xfa   : > { %v5641_v11 = vpop.f32.mrb[3].mxu0  ;;  %v5919_v12 = vpack.i.bf16 %v678_v10, %v675_v8  ;;  %v703_v14 = vpack.c.bf16 %v678_v10, %v678_v10 }
  0xfc   : > { %5920 = vrot.lane.b32.xlu1 %v5919_v12, %s7232_s26  ;;  %5910 = vrot.lane.b32.xlu0 %v5919_v12, %s6255_s19  ;;  %s7245_s26 = smov 96  }
 0x100   : > { %711 = vrot.lane.b32.xlu1 %v702_v13, %s7230_s1  ;;  %5915 = vrot.lane.b32.xlu0 %v5919_v12, %s7234_s21  ;;  %s1695_s21 = scalar_lea.vmem %s7211_s5, %s6242_s27 }
 0x104   : > { %761 = vrot.lane.b32.xlu0 %v703_v14, %s7230_s1 }
 0x16e   : > { %v5921_v15 = vpop.permute.xlu1 %5920  ;;  %v5911_v16 = vpop.permute.xlu0 %5910 }
 0x16f   : > { %v5913_v17 = vunpack.i.h.bf16 %v5911_v16  ;;  %v5912_v18 = vunpack.i.l.bf16 %v5911_v16  ;;  %v5922_v26 = vunpack.i.l.bf16 %v5921_v15  ;;  %v5923_v29 = vunpack.i.h.bf16 %v5921_v15 }
 0x171   : > { %v6417_v19 = vpack.c.bf16 %v5913_v17, %v5913_v17  ;;  %v6419_v20 = vpack.c.bf16 %v5912_v18, %v5912_v18  ;;  %v6436_v32 = vpack.c.bf16 %v5922_v26, %v5922_v26  ;;  %v6439_v33 = vpack.c.bf16 %v5923_v29, %v5923_v29 }
 0x172   : > { %v712_v21 = vpop.permute.xlu1 %711  ;;  %v5916_v22 = vpop.permute.xlu0 %5915 }
 0x173   : > { %v5918_v23 = vunpack.i.h.bf16 %v5916_v22  ;;  %v5917_v24 = vunpack.i.l.bf16 %v5916_v22  ;;  %810 = vrot.lane.b32.xlu1 %v6419_v20, %s7230_s1  ;;  %859 = vrot.lane.b32.xlu0 %v6417_v19, %s7230_s1  ;;  %v718_v25 = vsel %vm713_vm3, %v712_v21, 0 }
 0x174   : > { %5643 = vmatpush3.bf16.xpose.msra.mxu1 %v718_v25 }
 0x175   : > { %v6426_v27 = vpack.c.bf16 %v5918_v23, %v5918_v23  ;;  %v6428_v28 = vpack.c.bf16 %v5917_v24, %v5917_v24  ;;  %5654 = vmatprep.subr.bf16.mxu1 %v6252_v2 }
 0x176   : > { %v762_v30 = vpop.permute.xlu0 %761 }
 0x177   : > { %v767_v31 = vsel %vm713_vm3, %v762_v30, 0  ;;  %908 = vrot.lane.b32.xlu1 %v6428_v28, %s7230_s1  ;;  %957 = vrot.lane.b32.xlu0 %v6426_v27, %s7230_s1 }
 0x178   : > { %5649 = vmatpush3.bf16.xpose.msra.mxu0 %v767_v31 }
 0x179   : > { %5660 = vmatprep.subr.bf16.mxu0 %v6252_v2 }
 0x17b   : > { %5645 = vmatmul.mubr.msk.bf16.vlgmr.msra.gmra.mrb[0].mxu1 %vm713_vm3, %v702_v13  ;;  %1006 = vrot.lane.b32.xlu1 %v6436_v32, %s7230_s1 }
 0x17c   : > { %1055 = vrot.lane.b32.xlu0 %v6439_v33, %s7230_s1  ;;  %5656 = vmatprep.mubr.msk.bf16.mxu1 %vm6253_vm1, %v6252_v2  ;;  %s7242_s1 = sld [smem:[#allocation7_spill]] }
 0x17f   : > { %1264 = vrot.lane.b32.xlu1 %v703_v14, %s6258_s22  ;;  %5651 = vmatmul.mubr.msk.bf16.vlgmr.msra.gmra.mrb[4].mxu0 %vm713_vm3, %v703_v14 }
 0x180   : > { %1215 = vrot.lane.b32.xlu0 %v702_v13, %s6258_s22  ;;  %5662 = vmatprep.mubr.msk.bf16.mxu0 %vm6253_vm1, %v6252_v2 }
 0x1e5   : > { %v811_v34 = vpop.permute.xlu1 %810  ;;  %v860_v35 = vpop.permute.xlu0 %859 }
 0x1e6   : > { %v816_v36 = vsel %vm713_vm3, %v811_v34, 0  ;;  %v865_v37 = vsel %vm713_vm3, %v860_v35, 0 }
 0x1e7   : > { %5655 = vmatpush3.bf16.xpose.msra.mxu1 %v816_v36  ;;  %5661 = vmatpush3.bf16.xpose.msra.mxu0 %v865_v37 }
 0x1e8   : > { %5666 = vmatprep.subr.bf16.mxu1 %v6252_v2  ;;  %5672 = vmatprep.subr.bf16.mxu0 %v6252_v2 }
 0x1e9   : > { %v909_v38 = vpop.permute.xlu1 %908  ;;  %v958_v39 = vpop.permute.xlu0 %957 }
 0x1ea   : > { %v914_v40 = vsel %vm713_vm3, %v909_v38, 0  ;;  %v963_v41 = vsel %vm713_vm3, %v958_v39, 0 }
 0x1ed   : > { %v1007_v42 = vpop.permute.xlu1 %1006 }
 0x1ee   : > { %5657 = vmatmul.mubr.msk.bf16.vlgmr.msra.gmra.mrb[4].mxu1 %vm713_vm3, %v6419_v20  ;;  %5663 = vmatmul.mubr.msk.bf16.vlgmr.msra.gmra.mrb[8].mxu0 %vm713_vm3, %v6417_v19  ;;  %v1056_v43 = vpop.permute.xlu0 %1055  ;;  %v1012_v44 = vsel %vm713_vm3, %v1007_v42, 0 }
 0x1ef   : > { %5667 = vmatpush3.bf16.xpose.msra.mxu1 %v914_v40  ;;  %5673 = vmatpush3.bf16.xpose.msra.mxu0 %v963_v41  ;;  %v1061_v45 = vsel %vm713_vm3, %v1056_v43, 0 }
 0x1f0   : > { %5668 = vmatprep.mubr.msk.bf16.mxu1 %vm6253_vm1, %v6252_v2  ;;  %5674 = vmatprep.mubr.msk.bf16.mxu0 %vm6253_vm1, %v6252_v2 }
 0x1f1   : > { %5678 = vmatprep.subr.bf16.mxu1 %v6252_v2  ;;  %5684 = vmatprep.subr.bf16.mxu0 %v6252_v2  ;;  %v1265_v46 = vpop.permute.xlu1 %1264 }
 0x1f2   : > { %v1216_v47 = vpop.permute.xlu0 %1215  ;;  %v1270_v48 = vsel %vm1220_vm4, %v1265_v46, 0 }
 0x1f3   : > { %v1222_v49 = vsel %vm1220_vm4, %v1216_v47, 0 }
 0x1f6   : > { %5669 = vmatmul.mubr.msk.bf16.vlgmr.msra.gmra.mrb[8].mxu1 %vm713_vm3, %v6428_v28  ;;  %5675 = vmatmul.mubr.msk.bf16.vlgmr.msra.gmra.mrb[12].mxu0 %vm713_vm3, %v6426_v27 }
 0x1f7   : > { %5679 = vmatpush3.bf16.xpose.msra.mxu1 %v1012_v44  ;;  %5685 = vmatpush3.bf16.xpose.msra.mxu0 %v1061_v45 }
 0x1f8   : > { %5680 = vmatprep.mubr.msk.bf16.mxu1 %vm6253_vm1, %v6252_v2  ;;  %5686 = vmatprep.mubr.msk.bf16.mxu0 %vm6253_vm1, %v6252_v2 }
 0x1f9   : > { %5690 = vmatprep.subr.bf16.mxu1 %v6252_v2  ;;  %5696 = vmatprep.subr.bf16.mxu0 %v6252_v2 }
 0x1fe   : > { %5681 = vmatmul.mubr.msk.bf16.vlgmr.msra.gmra.mrb[12].mxu1 %vm713_vm3, %v6436_v32  ;;  %5687 = vmatmul.mubr.msk.bf16.vlgmr.msra.gmra.mrb[16].mxu0 %vm713_vm3, %v6439_v33 }
 0x1ff   : > { %5691 = vmatpush3.bf16.msra.mxu1 %v1222_v49  ;;  %5697 = vmatpush3.bf16.msra.mxu0 %v1270_v48 }
 0x200   : > { %5692 = vmatprep.mubr.msk.bf16.mxu1 %vm6253_vm1, %v6252_v2  ;;  %5698 = vmatprep.mubr.msk.bf16.mxu0 %vm6253_vm1, %v6252_v2 }
 0x201   : > { %5702 = vmatprep.subr.bf16.mxu1 %v6252_v2  ;;  %5708 = vmatprep.subr.bf16.mxu0 %v6252_v2 }
 0x24e   : > { %v754_v50 = vpop.f32.mrb[0].mxu1 }
 0x24f   : > { %v1103_v52 = vmul.f32 0.35355338, %v754_v50  ;;  %v5646_v53 = vpop.f32.mrb[1].mxu1 }
 0x250   : > { %v757_v54 = vpop.f32.mrb[2].mxu1 }
 0x251   : > { %v5647_v55 = vpop.f32.mrb[3].mxu1  ;;  %v6496_v56 = vadd.f32 %v1103_v52, %v616_v51 }
 0x252   : > { %v803_v57 = vpop.f32.mrb[4].mxu0 }
 0x253   : > { %v1104_v58 = vmul.f32 0.35355338, %v803_v57  ;;  %v5652_v59 = vpop.f32.mrb[5].mxu0  ;;  %v1119_v60 = vsel %vm713_vm3, %v6496_v56, -inf }
 0x254   : > { %1120 = vmax.xlane.f32.xlu1 %v1119_v60  ;;  %v806_v61 = vpop.f32.mrb[6].mxu0 }
 0x255   : > { %v5653_v62 = vpop.f32.mrb[7].mxu0  ;;  %v1112_v63 = vadd.f32 %v1104_v58, %v616_v51 }
 0x257   : > { %v1122_v0 = vsel %vm713_vm3, %v1112_v63, -inf }
 0x258   : > { %1123 = vmax.xlane.f32.xlu0 %v1122_v0 }
 0x2c1   : > { %v852_v1 = vpop.f32.mrb[4].mxu1  ;;  %v901_v3 = vpop.f32.mrb[8].mxu0 }
 0x2c2   : > { %v1105_v4 = vmul.f32 0.35355338, %v852_v1  ;;  %v1106_v7 = vmul.f32 0.35355338, %v901_v3  ;;  %v5658_v8 = vpop.f32.mrb[5].mxu1  ;;  %v5664_v9 = vpop.f32.mrb[9].mxu0 }
 0x2c3   : > { %v855_v10 = vpop.f32.mrb[6].mxu1  ;;  %v904_v11 = vpop.f32.mrb[10].mxu0 }
 0x2c4   : > { %v5659_v12 = vpop.f32.mrb[7].mxu1  ;;  %v5665_v13 = vpop.f32.mrb[11].mxu0  ;;  %v1113_v14 = vadd.f32 %v1105_v4, %v616_v51  ;;  %v1114_v15 = vadd.f32 %v1106_v7, %v616_v51 }
 0x2c6   : > { %v1125_v16 = vsel %vm713_vm3, %v1113_v14, -inf  ;;  %v1128_v17 = vsel %vm713_vm3, %v1114_v15, -inf }
 0x2c7   : > { %1126 = vmax.xlane.f32.xlu0 %v1125_v16  ;;  %1129 = vmax.xlane.f32.xlu1 %v1128_v17 }
 0x2c9   : > { %v950_v18 = vpop.f32.mrb[8].mxu1  ;;  %v999_v21 = vpop.f32.mrb[12].mxu0 }
 0x2ca   : > { %v1107_v22 = vmul.f32 0.35355338, %v950_v18  ;;  %v1108_v23 = vmul.f32 0.35355338, %v999_v21  ;;  %v5670_v24 = vpop.f32.mrb[9].mxu1  ;;  %v5676_v25 = vpop.f32.mrb[13].mxu0 }
 0x2cb   : > { %v953_v26 = vpop.f32.mrb[10].mxu1  ;;  %v1002_v29 = vpop.f32.mrb[14].mxu0 }
 0x2cc   : > { %v5671_v30 = vpop.f32.mrb[11].mxu1  ;;  %v5677_v31 = vpop.f32.mrb[15].mxu0  ;;  %v6503_v34 = vadd.f32 %v1107_v22, %v616_v51  ;;  %v1116_v35 = vadd.f32 %v1108_v23, %v616_v51 }
 0x2ce   : > { %v1131_v36 = vsel %vm713_vm3, %v6503_v34, -inf  ;;  %v1134_v37 = vsel %vm713_vm3, %v1116_v35, -inf }
 0x2cf   : > { %1132 = vmax.xlane.f32.xlu0 %v1131_v36  ;;  %1135 = vmax.xlane.f32.xlu1 %v1134_v37 }
 0x2d1   : > { %v1048_v38 = vpop.f32.mrb[12].mxu1  ;;  %v1097_v39 = vpop.f32.mrb[16].mxu0 }
 0x2d2   : > { %v1109_v40 = vmul.f32 0.35355338, %v1048_v38  ;;  %v1110_v41 = vmul.f32 0.35355338, %v1097_v39  ;;  %v5682_v42 = vpop.f32.mrb[13].mxu1  ;;  %v5688_v43 = vpop.f32.mrb[17].mxu0 }
 0x2d3   : > { %v1051_v44 = vpop.f32.mrb[14].mxu1  ;;  %v1100_v45 = vpop.f32.mrb[18].mxu0 }
 0x2d4   : > { %v5683_v46 = vpop.f32.mrb[15].mxu1  ;;  %v5689_v47 = vpop.f32.mrb[19].mxu0  ;;  %v1117_v48 = vadd.f32 %v1109_v40, %v616_v51  ;;  %v1118_v49 = vadd.f32 %v1110_v41, %v616_v51 }
 0x2d6   : > { %v1137_v50 = vsel %vm713_vm3, %v1117_v48, -inf  ;;  %v1140_v52 = vsel %vm713_vm3, %v1118_v49, -inf }
 0x2d7   : > { %1138 = vmax.xlane.f32.xlu0 %v1137_v50  ;;  %1141 = vmax.xlane.f32.xlu1 %v1140_v52 }
 0x2e1   : > { %v1121_v53 = vpop.xlane.xlu1 %1120 }
 0x2e2   : > { %v1143_v55 = vsub.f32 %v6496_v56, %v1121_v53 }
 0x2e4   : > { %v1151_v58 = vmul.f32 1.442695, %v1143_v55 }
 0x2e5   : > { %v1124_v54 = vpop.xlane.xlu0 %1123 }
 0x2e6   : > { %v1144_v57 = vsub.f32 %v1112_v63, %v1124_v54  ;;  %6122 = vpow2.f32 %v1151_v58 }
 0x2e8   : > { %1312 = vrot.lane.b32.xlu1 %v6419_v20, %s6258_s22  ;;  %v1153_v59 = vmul.f32 1.442695, %v1144_v57 }
 0x2ea   : > { %6124 = vpow2.f32 %v1153_v59 }
 0x2ed   : > { %1360 = vrot.lane.b32.xlu0 %v6417_v19, %s6258_s22 }
 0x2f0   : > { %v6123_v51 = vpop.eup %6122 }
 0x2f1   : > { %v1167_v61 = vsel %vm713_vm3, %v6123_v51, 0.0 }
 0x2f4   : > { %v6125_v60 = vpop.eup %6124 }
 0x2f5   : > { %v1170_v62 = vsel %vm713_vm3, %v6125_v60, 0.0 }
 0x30c   : > { %1168 = vadd.xlane.f32.xlu0 %v1167_v61  ;;  %1171 = vadd.xlane.f32.xlu1 %v1170_v62 }
 0x31d   : > { %1408 = vrot.lane.b32.xlu1 %v6428_v28, %s6258_s22 }
 0x354   : > { %v1127_v19 = vpop.xlane.xlu0 %1126  ;;  %v1130_v20 = vpop.xlane.xlu1 %1129 }
 0x355   : > { %v1145_v0 = vsub.f32 %v1113_v14, %v1127_v19  ;;  %v1146_v56 = vsub.f32 %v1114_v15, %v1130_v20 }
 0x357   : > { %v1155_v63 = vmul.f32 1.442695, %v1145_v0  ;;  %v1157_v1 = vmul.f32 1.442695, %v1146_v56 }
 0x359   : > { %6126 = vpow2.f32 %v1155_v63 }
 0x35a   : > { %6128 = vpow2.f32 %v1157_v1 }
 0x35c   : > { %v1136_v3 = vpop.xlane.xlu1 %1135  ;;  %v1133_v18 = vpop.xlane.xlu0 %1132 }
 0x35d   : > { %v1148_v4 = vsub.f32 %v1116_v35, %v1136_v3  ;;  %v1147_v21 = vsub.f32 %v6503_v34, %v1133_v18 }
 0x35f   : > { %v1161_v7 = vmul.f32 1.442695, %v1148_v4  ;;  %v1159_v23 = vmul.f32 1.442695, %v1147_v21 }
 0x361   : > { %6130 = vpow2.f32 %v1161_v7 }
 0x363   : > { %v6519_v8 = vpop.eup %6126 }
 0x364   : > { %v6521_v9 = vpop.eup %6128  ;;  %v1142_v10 = vpop.xlane.xlu1 %1141  ;;  %v1173_v28 = vsel %vm713_vm3, %v6519_v8, 0.0 }
 0x365   : > { %v1150_v11 = vsub.f32 %v1118_v49, %v1142_v10  ;;  %1174 = vadd.xlane.f32.xlu0 %v1173_v28  ;;  %v1176_v12 = vsel %vm713_vm3, %v6521_v9, 0.0  ;;  %v1139_v22 = vpop.xlane.xlu0 %1138 }
 0x366   : > { %1177 = vadd.xlane.f32.xlu1 %v1176_v12  ;;  %v1149_v24 = vsub.f32 %v1117_v48, %v1139_v22 }
 0x367   : > { %v1165_v13 = vmul.f32 1.442695, %v1150_v11 }
 0x368   : > { %v1163_v25 = vmul.f32 1.442695, %v1149_v24  ;;  %v1313_v29 = vpop.permute.xlu1 %1312 }
 0x369   : > { %6132 = vpow2.f32 %v1165_v13  ;;  %v1361_v26 = vpop.permute.xlu0 %1360  ;;  %v1318_v42 = vsel %vm1220_vm4, %v1313_v29, 0 }
 0x36a   : > { %6134 = vpow2.f32 %v1159_v23  ;;  %v1366_v43 = vsel %vm1220_vm4, %v1361_v26, 0 }
 0x36b   : > { %v6527_v14 = vpop.eup %6130  ;;  %6136 = vpow2.f32 %v1163_v25 }
 0x36c   : > { %v1182_v15 = vsel %vm713_vm3, %v6527_v14, 0.0 }
 0x36d   : > { %1183 = vadd.xlane.f32.xlu1 %v1182_v15 }
 0x373   : > { %v6531_v16 = vpop.eup %6132 }
 0x374   : > { %v1188_v17 = vsel %vm713_vm3, %v6531_v16, 0.0  ;;  %v6540_v30 = vpop.eup %6134 }
 0x375   : > { %1189 = vadd.xlane.f32.xlu1 %v1188_v17  ;;  %v6544_v36 = vpop.eup %6136 }
 0x37b   : > { %1456 = vrot.lane.b32.xlu0 %v6426_v27, %s6258_s22  ;;  %v1179_v27 = vsel %vm713_vm3, %v6540_v30, 0.0 }
 0x386   : > { %1504 = vrot.lane.b32.xlu1 %v6436_v32, %s6258_s22  ;;  %v1185_v32 = vsel %vm713_vm3, %v6544_v36, 0.0 }
 0x399   : > { %v1169_v31 = vpop.xlane.xlu0 %1168  ;;  %v1172_v35 = vpop.xlane.xlu1 %1171 }
 0x39a   : > { %6138 = vrcp.f32 %v1169_v31  ;;  %1180 = vadd.xlane.f32.xlu0 %v1179_v27 }
 0x39b   : > { %6140 = vrcp.f32 %v1172_v35 }
 0x39d   : > { %v1409_v44 = vpop.permute.xlu1 %1408 }
 0x39e   : > { %1186 = vadd.xlane.f32.xlu0 %v1185_v32  ;;  %v1414_v57 = vsel %vm1220_vm4, %v1409_v44, 0 }
 0x3a4   : > { %v6139_v34 = vpop.eup %6138 }
 0x3a5   : > { %v6141_v37 = vpop.eup %6140  ;;  %v1199_v38 = vmul.f32 %v6139_v34, %v6123_v51  ;;  %v5986_v34 = vld [vmem:[%s1634_s25] sm:$0xff]  }
 0x3a6   : > { %v1200_v39 = vmul.f32 %v6141_v37, %v6125_v60 }
 0x3a7   : > { %v1207_v40 = vpack.c.bf16 %v1199_v38, %v1199_v38 }
 0x3a8   : > { %v1208_v41 = vpack.c.bf16 %v1200_v39, %v1200_v39 }
 0x3a9   : > { %5693 = vmatmul.mubr.msk.bf16.vlgmr.msra.gmra.mrb[16].mxu1 %vm713_vm3, %v1207_v40 }
 0x3aa   : > { %5699 = vmatmul.mubr.msk.bf16.vlgmr.msra.gmra.mrb[20].mxu0 %vm713_vm3, %v1208_v41  ;;  %5703 = vmatpush3.bf16.msra.mxu1 %v1318_v42  ;;  %v5987_v42 = vld [vmem:[%s1634_s25 + $0x8] sm:$0xff]   ;;  %s1697_s25 = scalar_lea.vmem %s7212_s6, %s6242_s27 }
 0x3ab   : > { %5709 = vmatpush3.bf16.msra.mxu0 %v1366_v43  ;;  %5704 = vmatprep.mubr.msk.bf16.mxu1 %vm6253_vm1, %v6252_v2 }
 0x3ac   : > { %5710 = vmatprep.mubr.msk.bf16.mxu0 %vm6253_vm1, %v6252_v2  ;;  %5714 = vmatprep.subr.bf16.mxu1 %v6252_v2 }
 0x3ad   : > { %5720 = vmatprep.subr.bf16.mxu0 %v6252_v2 }
 0x3b4   : > { %1552 = vrot.lane.b32.xlu0 %v6439_v33, %s6258_s22  ;;  %s7229_s22 = smov 8  }
 0x3f2   : > { %v1175_v45 = vpop.xlane.xlu0 %1174 }
 0x3f3   : > { %6142 = vrcp.f32 %v1175_v45  ;;  %v1178_v46 = vpop.xlane.xlu1 %1177 }
 0x3f4   : > { %6144 = vrcp.f32 %v1178_v46 }
 0x3f6   : > { %v1457_v53 = vpop.permute.xlu0 %1456 }
 0x3f7   : > { %v1462_v33 = vsel %vm1220_vm4, %v1457_v53, 0 }
 0x3fa   : > { %v1184_v47 = vpop.xlane.xlu1 %1183 }
 0x3fb   : > { %6146 = vrcp.f32 %v1184_v47 }
 0x3fd   : > { %v6143_v48 = vpop.eup %6142 }
 0x3fe   : > { %v6145_v49 = vpop.eup %6144  ;;  %v1201_v50 = vmul.f32 %v6143_v48, %v6519_v8 }
 0x3ff   : > { %v1202_v52 = vmul.f32 %v6145_v49, %v6521_v9 }
 0x400   : > { %v1209_v54 = vpack.c.bf16 %v1201_v50, %v1201_v50 }
 0x401   : > { %v1210_v55 = vpack.c.bf16 %v1202_v52, %v1202_v52 }
 0x402   : > { %5705 = vmatmul.mubr.msk.bf16.vlgmr.msra.gmra.mrb[20].mxu1 %vm713_vm3, %v1209_v54  ;;  %v1190_v60 = vpop.xlane.xlu1 %1189 }
 0x403   : > { %5711 = vmatmul.mubr.msk.bf16.vlgmr.msra.gmra.mrb[24].mxu0 %vm713_vm3, %v1210_v55  ;;  %5715 = vmatpush3.bf16.msra.mxu1 %v1414_v57  ;;  %6148 = vrcp.f32 %v1190_v60 }
 0x404   : > { %5721 = vmatpush3.bf16.msra.mxu0 %v1462_v33  ;;  %5722 = vmatprep.mubr.msk.bf16.mxu0 %vm6253_vm1, %v6252_v2 }
 0x405   : > { %5732 = vmatprep.subr.bf16.mxu0 %v6252_v2  ;;  %5716 = vmatprep.mubr.msk.bf16.mxu1 %vm6253_vm1, %v6252_v2  ;;  %v6147_v58 = vpop.eup %6146 }
 0x406   : > { %5726 = vmatprep.subr.bf16.mxu1 %v6252_v2  ;;  %v1204_v59 = vmul.f32 %v6147_v58, %v6527_v14  ;;  %v1505_v4 = vpop.permute.xlu1 %1504 }
 0x407   : > { %v1510_v9 = vsel %vm1220_vm4, %v1505_v4, 0 }
 0x408   : > { %v1212_v51 = vpack.c.bf16 %v1204_v59, %v1204_v59 }
 0x40b   : > { %5723 = vmatmul.mubr.msk.bf16.vlgmr.msra.gmra.mrb[28].mxu0 %vm713_vm3, %v1212_v51 }
 0x40c   : > { %5734 = vmatprep.mubr.msk.bf16.mxu0 %vm6253_vm1, %v6252_v2 }
 0x40d   : > { %v6149_v62 = vpop.eup %6148 }
 0x40e   : > { %v1206_v20 = vmul.f32 %v6149_v62, %v6531_v16 }
 0x410   : > { %v1214_v1 = vpack.c.bf16 %v1206_v20, %v1206_v20 }
 0x427   : > { %v1181_v61 = vpop.xlane.xlu0 %1180 }
 0x428   : > { %6150 = vrcp.f32 %v1181_v61 }
 0x42b   : > { %v1187_v19 = vpop.xlane.xlu0 %1186 }
 0x42c   : > { %6152 = vrcp.f32 %v1187_v19 }
 0x42f   : > { %v1553_v0 = vpop.permute.xlu0 %1552 }
 0x430   : > { %v1558_v56 = vsel %vm1220_vm4, %v1553_v0, 0 }
 0x431   : > { %5733 = vmatpush3.bf16.msra.mxu0 %v1558_v56 }
 0x432   : > { %v6151_v63 = vpop.eup %6150  ;;  %5746 = vmatprep.subr.bf16.mxu0 %v6252_v2 }
 0x433   : > { %v1203_v3 = vmul.f32 %v6151_v63, %v6540_v30 }
 0x434   : > { %5735 = vmatmul.mubr.msk.bf16.vlgmr.msra.gmra.mrb[32].mxu0 %vm713_vm3, %v1214_v1 }
 0x435   : > { %v1211_v7 = vpack.c.bf16 %v1203_v3, %v1203_v3  ;;  %5750 = vmatprep.mubr.msk.bf16.mxu0 %vm6253_vm1, %v6252_v2 }
 0x436   : > { %v6153_v8 = vpop.eup %6152 }
 0x437   : > { %5717 = vmatmul.mubr.msk.bf16.vlgmr.msra.gmra.mrb[24].mxu1 %vm713_vm3, %v1211_v7  ;;  %v1205_v10 = vmul.f32 %v6153_v8, %v6544_v36 }
 0x438   : > { %5727 = vmatpush3.bf16.msra.mxu1 %v1510_v9  ;;  %5728 = vmatprep.mubr.msk.bf16.mxu1 %vm6253_vm1, %v6252_v2 }
 0x439   : > { %5738 = vmatprep.subr.bf16.mxu1 %v6252_v2  ;;  %v1213_v28 = vpack.c.bf16 %v1205_v10, %v1205_v10 }
 0x43f   : > { %5729 = vmatmul.mubr.msk.bf16.vlgmr.msra.gmra.mrb[28].mxu1 %vm713_vm3, %v1213_v28 }
 0x440   : > { %5742 = vmatprep.mubr.msk.bf16.mxu1 %vm6253_vm1, %v6252_v2  ;;  %5739 = vmatpush3.bf16.msra.mxu1 %v5986_v34 }
 0x441   : > { %5740 = vmatprep.subr.bf16.mxu1 %v6252_v2 }
 0x444   : > { %5741 = vmatpush3.bf16.msra.mxu1 %v5987_v42  ;;  %v5160_v42 = vld [vmem:[%s1697_s25] ss:$0 sm:$0xff]  ;;  %s7247_s25 = smov 16  }
 0x445   : > { %5754 = vmatprep.subr.bf16.mxu1 %v6252_v2 }
 0x47c   : > { %v1258_v11 = vpop.f32.mrb[16].mxu1 }
 0x47d   : > { %v1306_v12 = vpop.f32.mrb[20].mxu0  ;;  %v5694_v13 = vpop.f32.mrb[17].mxu1 }
 0x47e   : > { %v5700_v14 = vpop.f32.mrb[21].mxu0  ;;  %v1261_v15 = vpop.f32.mrb[18].mxu1 }
 0x47f   : > { %v1309_v16 = vpop.f32.mrb[22].mxu0  ;;  %v5695_v17 = vpop.f32.mrb[19].mxu1 }
 0x480   : > { %v5701_v18 = vpop.f32.mrb[23].mxu0 }
 0x4d5   : > { %v1354_v21 = vpop.f32.mrb[20].mxu1 }
 0x4d6   : > { %v1402_v22 = vpop.f32.mrb[24].mxu0  ;;  %v5706_v23 = vpop.f32.mrb[21].mxu1 }
 0x4d7   : > { %v5924_v24 = vpack.i.bf16 %v1402_v22, %v1354_v21  ;;  %v5712_v25 = vpop.f32.mrb[25].mxu0  ;;  %v1357_v26 = vpop.f32.mrb[22].mxu1  ;;  %v1805_v23 = vld [vmem:[%s7242_s1] sm:$0xff] }
 0x4d8   : > { %v1405_v29 = vpop.f32.mrb[26].mxu0  ;;  %v5707_v30 = vpop.f32.mrb[23].mxu1 }
 0x4d9   : > { %5925 = vrot.lane.b32.xlu1 %v5924_v24, %s7229_s22  ;;  %v5713_v31 = vpop.f32.mrb[27].mxu0  ;;  %v1806_v24 = vld [vmem:[%s7242_s1 + $0x8] sm:$0xff]  ;;  %s5378_s22 = sshll.u32 %s6242_s27, 10 }
 0x4da   : > { %v1807_v25 = vpack.c.bf16 %v1806_v24, %v1805_v23 }
 0x4de   : > { %v1498_v35 = vpop.f32.mrb[28].mxu0 }
 0x4df   : > { %v5724_v27 = vpop.f32.mrb[29].mxu0 }
 0x4e0   : > { %v1501_v36 = vpop.f32.mrb[30].mxu0 }
 0x4e1   : > { %v5725_v32 = vpop.f32.mrb[31].mxu0 }
 0x507   : > { %v1594_v37 = vpop.f32.mrb[32].mxu0 }
 0x508   : > { %v5736_v38 = vpop.f32.mrb[33].mxu0 }
 0x509   : > { %v1597_v39 = vpop.f32.mrb[34].mxu0  ;;  %v5159_v38 = vld [vmem:[%s1695_s21] ss:$0 sm:$0xff] }
 0x50a   : > { %v1450_v40 = vpop.f32.mrb[24].mxu1  ;;  %v5737_v41 = vpop.f32.mrb[35].mxu0 }
 0x50b   : > { %v5929_v43 = vpack.i.bf16 %v1498_v35, %v1450_v40  ;;  %v5718_v44 = vpop.f32.mrb[25].mxu1 }
 0x50c   : > { %v1453_v45 = vpop.f32.mrb[26].mxu1 }
 0x50d   : > { %v5719_v46 = vpop.f32.mrb[27].mxu1  ;;  %5930 = vrot.lane.b32.xlu0 %v5929_v43, %s7228_s30  ;;  %s7244_s30 = smov 104  }
 0x512   : > { %v1546_v47 = vpop.f32.mrb[28].mxu1 }
 0x513   : > { %v5934_v48 = vpack.i.bf16 %v1594_v37, %v1546_v47  ;;  %v5730_v49 = vpop.f32.mrb[29].mxu1 }
 0x514   : > { %v1549_v50 = vpop.f32.mrb[30].mxu1 }
 0x515   : > { %v5731_v52 = vpop.f32.mrb[31].mxu1  ;;  %5935 = vrot.lane.b32.xlu1 %v5934_v48, %s7227_s23  ;;  %s1809_s23 = scalar_lea.vmem %s7214_s8, %s6389_s2 }
 0x516   : > { %v5988_v21 = vld [vmem:[%s1809_s23] sm:$0xff]   ;;  %v5989_v22 = vld [vmem:[%s1809_s23 + $0x8] sm:$0xff]   ;;  %s1744_s23 = scalar_lea.vmem %s7213_s7, %s6389_s2 }
 0x517   : > { %v5990_v26 = vld [vmem:[%s1744_s23] sm:$0xff]   ;;  %v5991_v29 = vld [vmem:[%s1744_s23 + $0x8] sm:$0xff]   ;;  %s7243_s23 = smov 112  }
 0x518   : > { %5747 = vmatpush3.bf16.msra.mxu0 %v5990_v26 }
 0x519   : > { %5748 = vmatprep.subr.bf16.mxu0 %v6252_v2 }
 0x51c   : > { %5749 = vmatpush3.bf16.msra.mxu0 %v5991_v29 }
 0x51d   : > { %5762 = vmatprep.subr.bf16.mxu0 %v6252_v2 }
 0x54b   : > { %v5926_v53 = vpop.permute.xlu1 %5925 }
 0x54c   : > { %v5928_v55 = vunpack.i.h.bf16 %v5926_v53  ;;  %v5927_v57 = vunpack.i.l.bf16 %v5926_v53 }
 0x54e   : > { %v1625_v51 = vsel %vm713_vm3, %v1306_v12, %v5928_v55  ;;  %v1624_v60 = vsel %vm713_vm3, %v1258_v11, %v5927_v57 }
 0x57f   : > { %v5931_v54 = vpop.permute.xlu0 %5930 }
 0x580   : > { %v5933_v33 = vunpack.i.h.bf16 %v5931_v54  ;;  %v5932_v58 = vunpack.i.l.bf16 %v5931_v54 }
 0x582   : > { %v1628_v19 = vsel %vm1626_vm5, %v1625_v51, %v5933_v33  ;;  %v1627_v20 = vsel %vm1626_vm5, %v1624_v60, %v5932_v58 }
 0x587   : > { %v5936_v59 = vpop.permute.xlu1 %5935 }
 0x588   : > { %v5938_v61 = vunpack.i.h.bf16 %v5936_v59  ;;  %v5937_v62 = vunpack.i.l.bf16 %v5936_v59 }
 0x58a   : > { %v1631_v0 = vsel %vm1629_vm6, %v1628_v19, %v5938_v61  ;;  %v1630_v56 = vsel %vm1629_vm6, %v1627_v20, %v5937_v62 }
 0x58b   : > { %v1632_v63 = vpack.c.bf16 %v1631_v0, %v1630_v56 }
 0x58d   : > { %5743 = vmatmul.mubr.msk.bf16.vlgmr.msra.gmra.mrb[32].mxu1 %vm637_vm2, %v1632_v63 }
 0x58e   : > { %5758 = vmatprep.mubr.msk.bf16.mxu1 %vm6253_vm1, %v6252_v2  ;;  %5755 = vmatpush3.bf16.msra.mxu1 %v5988_v21 }
 0x58f   : > { %5756 = vmatprep.subr.bf16.mxu1 %v6252_v2 }
 0x592   : > { %5757 = vmatpush3.bf16.msra.mxu1 %v5989_v22 }
 0x593   : > { %5768 = vmatprep.subr.bf16.mxu1 %v6252_v2 }
 0x595   : > { %5759 = vmatmul.mubr.msk.bf16.vlgmr.msra.gmra.mrb[36].mxu1 %vm637_vm2, %v1807_v25 }
 0x596   : > { %5770 = vmatprep.mubr.msk.bf16.mxu1 %vm6253_vm1, %v6252_v2 }
 0x660   : > { %v1688_v1 = vpop.f32.mrb[32].mxu1 }
 0x661   : > { %v1689_v3 = vadd.f32 %v1688_v1, %v6401_v5  ;;  %v5744_v4 = vpop.f32.mrb[33].mxu1 }
 0x662   : > { %v1691_v7 = vpop.f32.mrb[34].mxu1 }
 0x663   : > { %v1692_v8 = vadd.f32 %v1691_v7, %v6403_v6  ;;  %v5745_v9 = vpop.f32.mrb[35].mxu1  ;;  %v1699_v10 = vsel %vm637_vm2, %v1689_v3, 0.0 }
 0x664   : > { %1700 = vadd.xlane.f32.xlu0 %v1699_v10 }
 0x665   : > { %v1702_v28 = vsel %vm637_vm2, %v1692_v8, 0.0 }
 0x666   : > { %1703 = vadd.xlane.f32.xlu1 %v1702_v28 }
 0x668   : > { %v1863_v47 = vpop.f32.mrb[36].mxu1 }
 0x669   : > { %v5760_v48 = vpop.f32.mrb[37].mxu1  ;;  %v1918_v49 = vpack.c.bf16 %v1863_v47, %v1863_v47 }
 0x66a   : > { %v1866_v50 = vpop.f32.mrb[38].mxu1 }
 0x66b   : > { %v5939_v52 = vpack.i.bf16 %v1866_v50, %v1863_v47  ;;  %v5761_v53 = vpop.f32.mrb[39].mxu1  ;;  %v1930_v54 = vsel %vm713_vm3, %v1918_v49, 0  ;;  %v6655_v55 = vpack.c.bf16 %v1866_v50, %v1866_v50 }
 0x66d   : > { %v1976_v57 = vsel %vm713_vm3, %v6655_v55, 0 }
 0x66e   : > { %5769 = vmatpush3.bf16.xpose.msra.mxu1 %v1976_v57 }
 0x66f   : > { %5780 = vmatprep.subr.bf16.mxu1 %v6252_v2 }
 0x677   : > { %5940 = vrot.lane.b32.xlu1 %v5939_v52, %s6255_s19 }
 0x67b   : > { %5950 = vrot.lane.b32.xlu1 %v5939_v52, %s7243_s23 }
 0x6f1   : > { %v1701_v11 = vpop.xlane.xlu0 %1700 }
 0x6f2   : > { %v1706_v12 = vmul.f32 0.03125, %v1701_v11 }
 0x6f3   : > { %v1704_v13 = vpop.xlane.xlu1 %1703 }
 0x6f4   : > { %v1708_v14 = vsub.f32 %v1689_v3, %v1706_v12  ;;  %v1707_v15 = vmul.f32 0.03125, %v1704_v13 }
 0x6f6   : > { %v1709_v16 = vsub.f32 %v1692_v8, %v1707_v15  ;;  %v1710_v17 = vmul.f32 %v1708_v14, %v1708_v14 }
 0x6f7   : > { %v5941_v33 = vpop.permute.xlu1 %5940 }
 0x6f8   : > { %v1712_v5 = vsel %vm637_vm2, %v1710_v17, 0.0  ;;  %v1711_v18 = vmul.f32 %v1709_v16, %v1709_v16  ;;  %v5942_v58 = vunpack.i.l.bf16 %v5941_v33  ;;  %v5943_v59 = vunpack.i.h.bf16 %v5941_v33 }
 0x6f9   : > { %1713 = vadd.xlane.f32.xlu0 %v1712_v5 }
 0x6fa   : > { %v1715_v6 = vsel %vm637_vm2, %v1711_v18, 0.0  ;;  %v6663_v51 = vpack.c.bf16 %v5942_v58, %v5942_v58  ;;  %v6665_v61 = vpack.c.bf16 %v5943_v59, %v5943_v59 }
 0x6fb   : > { %v5951_v4 = vpop.permute.xlu1 %5950 }
 0x6fc   : > { %v2022_v20 = vsel %vm713_vm3, %v6663_v51, 0  ;;  %v2068_v3 = vsel %vm713_vm3, %v6665_v61, 0  ;;  %v5953_v7 = vunpack.i.h.bf16 %v5951_v4  ;;  %v5952_v8 = vunpack.i.l.bf16 %v5951_v4 }
 0x6fd   : > { %1716 = vadd.xlane.f32.xlu0 %v1715_v6 }
 0x6fe   : > { %v6684_v10 = vpack.c.bf16 %v5953_v7, %v5953_v7  ;;  %v6686_v28 = vpack.c.bf16 %v5952_v8, %v5952_v8 }
 0x700   : > { %v2114_v18 = vsel %vm713_vm3, %v6686_v28, 0  ;;  %v2160_v6 = vsel %vm713_vm3, %v6684_v10, 0 }
 0x786   : > { %v1714_v30 = vpop.xlane.xlu0 %1713 }
 0x787   : > { %v1718_v31 = vmul.f32 0.03125, %v1714_v30 }
 0x789   : > { %v1720_v35 = vadd.f32 1e-05, %v1718_v31 }
 0x78a   : > { %v1717_v27 = vpop.xlane.xlu0 %1716 }
 0x78b   : > { %6154 = vrsqrt.f32 %v1720_v35  ;;  %v1719_v36 = vmul.f32 0.03125, %v1717_v27 }
 0x78d   : > { %v1721_v32 = vadd.f32 1e-05, %v1719_v36 }
 0x78f   : > { %6156 = vrsqrt.f32 %v1721_v32 }
 0x795   : > { %v6155_v34 = vpop.eup %6154 }
 0x796   : > { %v1724_v37 = vmul.f32 %v6155_v34, %v1708_v14 }
 0x798   : > { %v1732_v40 = vmul.f32 %v5159_v38, %v1724_v37 }
 0x799   : > { %v6157_v39 = vpop.eup %6156 }
 0x79a   : > { %v1725_v41 = vmul.f32 %v6157_v39, %v1709_v16  ;;  %v6645_v44 = vadd.f32 %v5160_v42, %v1732_v40 }
 0x79c   : > { %v1733_v43 = vmul.f32 %v5159_v38, %v1725_v41 }
 0x79e   : > { %v6647_v45 = vadd.f32 %v5160_v42, %v1733_v43 }
 0x7a0   : > { %v1742_v46 = vpack.c.bf16 %v6647_v45, %v6645_v44 }
 0x7a2   : > { %5751 = vmatmul.mubr.msk.bf16.vlgmr.msra.gmra.mrb[36].mxu0 %vm637_vm2, %v1742_v46 }
 0x7a3   : > { %5764 = vmatprep.mubr.msk.bf16.mxu0 %vm6253_vm1, %v6252_v2  ;;  %5763 = vmatpush3.bf16.xpose.msra.mxu0 %v1930_v54 }
 0x7a4   : > { %5774 = vmatprep.subr.bf16.mxu0 %v6252_v2 }
 0x875   : > { %v1798_v60 = vpop.f32.mrb[36].mxu0 }
 0x876   : > { %v1890_v62 = vpack.c.bf16 %v1798_v60, %v1798_v60  ;;  %v5752_v19 = vpop.f32.mrb[37].mxu0 }
 0x877   : > { %v1801_v0 = vpop.f32.mrb[38].mxu0 }
 0x878   : > { %v1891_v56 = vpack.c.bf16 %v1801_v0, %v1801_v0  ;;  %v5753_v63 = vpop.f32.mrb[39].mxu0  ;;  %5765 = vmatmul.mubr.msk.bf16.vlgmr.msra.gmra.mrb[40].mxu0 %vm713_vm3, %v1890_v62  ;;  %v5954_v1 = vpack.i.bf16 %v1801_v0, %v1798_v60 }
 0x879   : > { %5775 = vmatpush3.bf16.xpose.msra.mxu0 %v2022_v20  ;;  %5776 = vmatprep.mubr.msk.bf16.mxu0 %vm6253_vm1, %v6252_v2 }
 0x87a   : > { %5955 = vrot.lane.b32.xlu1 %v5954_v1, %s7243_s23  ;;  %5945 = vrot.lane.b32.xlu0 %v5954_v1, %s6255_s19  ;;  %s7246_s19 = smov 8   ;;  %s7248_s23 = smov 24  }
 0x87b   : > { %5771 = vmatmul.mubr.msk.bf16.vlgmr.msra.gmra.mrb[40].mxu1 %vm713_vm3, %v1891_v56  ;;  %5786 = vmatprep.subr.bf16.mxu0 %v6252_v2 }
 0x87c   : > { %5781 = vmatpush3.bf16.xpose.msra.mxu1 %v2068_v3  ;;  %5782 = vmatprep.mubr.msk.bf16.mxu1 %vm6253_vm1, %v6252_v2 }
 0x87d   : > { %5792 = vmatprep.subr.bf16.mxu1 %v6252_v2 }
 0x87e   : > { %5965 = vrot.lane.b32.xlu1 %v5954_v1, %s7244_s30  ;;  %5960 = vrot.lane.b32.xlu0 %v5939_v52, %s7244_s30  ;;  %s5377_s30 = sshll.u32 %s6242_s27, 8 }
 0x87f   : > { %s6858_s21 = scalar_lea.vmem %s7218_s12, %s5377_s30 }
 0x882   : > { %2399 = vrot.lane.b32.xlu1 %v1918_v49, %s7245_s26 }
 0x8ec   : > { %v5946_v9 = vpop.permute.xlu0 %5945  ;;  %v5956_v15 = vpop.permute.xlu1 %5955 }
 0x8ed   : > { %v5948_v11 = vunpack.i.h.bf16 %v5946_v9  ;;  %v5947_v12 = vunpack.i.l.bf16 %v5946_v9  ;;  %v5958_v21 = vunpack.i.h.bf16 %v5956_v15  ;;  %v5957_v22 = vunpack.i.l.bf16 %v5956_v15 }
 0x8ef   : > { %v1893_v13 = vpack.c.bf16 %v5948_v11, %v5948_v11  ;;  %v1892_v14 = vpack.c.bf16 %v5947_v12, %v5947_v12  ;;  %v1895_v25 = vpack.c.bf16 %v5958_v21, %v5958_v21  ;;  %v1894_v26 = vpack.c.bf16 %v5957_v22, %v5957_v22 }
 0x8f0   : > { %v5961_v16 = vpop.permute.xlu0 %5960  ;;  %v5966_v29 = vpop.permute.xlu1 %5965 }
 0x8f1   : > { %v5963_v17 = vunpack.i.h.bf16 %v5961_v16  ;;  %v5962_v5 = vunpack.i.l.bf16 %v5961_v16  ;;  %5777 = vmatmul.mubr.msk.bf16.vlgmr.msra.gmra.mrb[44].mxu0 %vm713_vm3, %v1892_v14  ;;  %5783 = vmatmul.mubr.msk.bf16.vlgmr.msra.gmra.mrb[44].mxu1 %vm713_vm3, %v1893_v13  ;;  %v5968_v35 = vunpack.i.h.bf16 %v5966_v29  ;;  %v5967_v27 = vunpack.i.l.bf16 %v5966_v29 }
 0x8f2   : > { %5787 = vmatpush3.bf16.xpose.msra.mxu0 %v2114_v18  ;;  %5793 = vmatpush3.bf16.xpose.msra.mxu1 %v2160_v6 }
 0x8f3   : > { %5788 = vmatprep.mubr.msk.bf16.mxu0 %vm6253_vm1, %v6252_v2  ;;  %5794 = vmatprep.mubr.msk.bf16.mxu1 %vm6253_vm1, %v6252_v2  ;;  %v6699_v23 = vpack.c.bf16 %v5963_v17, %v5963_v17  ;;  %v6701_v24 = vpack.c.bf16 %v5962_v5, %v5962_v5  ;;  %v1897_v32 = vpack.c.bf16 %v5968_v35, %v5968_v35 }
 0x8f4   : > { %5798 = vmatprep.subr.bf16.mxu0 %v6252_v2  ;;  %5804 = vmatprep.subr.bf16.mxu1 %v6252_v2  ;;  %v2400_v36 = vpop.permute.xlu1 %2399  ;;  %v1896_v34 = vpack.c.bf16 %v5967_v27, %v5967_v27 }
 0x8f5   : > { %v2206_v30 = vsel %vm713_vm3, %v6701_v24, 0  ;;  %v2252_v31 = vsel %vm713_vm3, %v6699_v23, 0  ;;  %v2405_v37 = vsel %vm1220_vm4, %v2400_v36, 0 }
 0x8f9   : > { %5789 = vmatmul.mubr.msk.bf16.vlgmr.msra.gmra.mrb[48].mxu0 %vm713_vm3, %v1894_v26  ;;  %5795 = vmatmul.mubr.msk.bf16.vlgmr.msra.gmra.mrb[48].mxu1 %vm713_vm3, %v1895_v25 }
 0x8fa   : > { %5799 = vmatpush3.bf16.xpose.msra.mxu0 %v2206_v30  ;;  %5805 = vmatpush3.bf16.xpose.msra.mxu1 %v2252_v31 }
 0x8fb   : > { %5800 = vmatprep.mubr.msk.bf16.mxu0 %vm6253_vm1, %v6252_v2  ;;  %5806 = vmatprep.mubr.msk.bf16.mxu1 %vm6253_vm1, %v6252_v2 }
 0x8fc   : > { %5810 = vmatprep.subr.bf16.mxu0 %v6252_v2  ;;  %5816 = vmatprep.subr.bf16.mxu1 %v6252_v2 }
 0x901   : > { %5801 = vmatmul.mubr.msk.bf16.vlgmr.msra.gmra.mrb[52].mxu0 %vm713_vm3, %v1896_v34  ;;  %5807 = vmatmul.mubr.msk.bf16.vlgmr.msra.gmra.mrb[52].mxu1 %vm713_vm3, %v1897_v32 }
 0x902   : > { %5811 = vmatpush3.bf16.msra.mxu0 %v2405_v37  ;;  %5818 = vmatprep.mubr.msk.bf16.mxu1 %vm6253_vm1, %v6252_v2 }
 0x903   : > { %5812 = vmatprep.mubr.msk.bf16.mxu0 %vm6253_vm1, %v6252_v2  ;;  %5822 = vmatprep.subr.bf16.mxu0 %v6252_v2 }
 0x94b   : > { %v1966_v38 = vpop.f32.mrb[40].mxu0 }
 0x94c   : > { %v6724_v39 = vmul.f32 0.35355338, %v1966_v38  ;;  %v5766_v40 = vpop.f32.mrb[41].mxu0 }
 0x94d   : > { %v1969_v41 = vpop.f32.mrb[42].mxu0 }
 0x94e   : > { %v2012_v42 = vpop.f32.mrb[40].mxu1  ;;  %v5767_v43 = vpop.f32.mrb[43].mxu0  ;;  %v2302_v46 = vsel %vm713_vm3, %v6724_v39, -inf }
 0x94f   : > { %v2295_v47 = vmul.f32 0.35355338, %v2012_v42  ;;  %v5772_v48 = vpop.f32.mrb[41].mxu1  ;;  %2303 = vmax.xlane.f32.xlu0 %v2302_v46 }
 0x950   : > { %v2015_v49 = vpop.f32.mrb[42].mxu1 }
 0x951   : > { %v5773_v50 = vpop.f32.mrb[43].mxu1  ;;  %v2305_v52 = vsel %vm713_vm3, %v2295_v47, -inf }
 0x952   : > { %2306 = vmax.xlane.f32.xlu1 %v2305_v52 }
 0x9c4   : > { %v2058_v53 = vpop.f32.mrb[44].mxu0  ;;  %v2104_v54 = vpop.f32.mrb[44].mxu1 }
 0x9c5   : > { %v2296_v57 = vmul.f32 0.35355338, %v2058_v53  ;;  %v5778_v33 = vpop.f32.mrb[45].mxu0  ;;  %v5784_v58 = vpop.f32.mrb[45].mxu1  ;;  %v2297_v62 = vmul.f32 0.35355338, %v2104_v54 }
 0x9c6   : > { %v2061_v59 = vpop.f32.mrb[46].mxu0  ;;  %v2107_v60 = vpop.f32.mrb[46].mxu1 }
 0x9c7   : > { %v5779_v19 = vpop.f32.mrb[47].mxu0  ;;  %v5785_v20 = vpop.f32.mrb[47].mxu1  ;;  %v2308_v0 = vsel %vm713_vm3, %v2296_v57, -inf  ;;  %v2311_v56 = vsel %vm713_vm3, %v2297_v62, -inf }
 0x9c8   : > { %2309 = vmax.xlane.f32.xlu0 %v2308_v0 }
 0x9cc   : > { %v2196_v63 = vpop.f32.mrb[48].mxu1  ;;  %2312 = vmax.xlane.f32.xlu0 %v2311_v56  ;;  %v2150_v1 = vpop.f32.mrb[48].mxu0 }
 0x9cd   : > { %v6731_v3 = vmul.f32 0.35355338, %v2196_v63  ;;  %v6733_v4 = vmul.f32 0.35355338, %v2150_v1  ;;  %v5790_v7 = vpop.f32.mrb[49].mxu0  ;;  %v5796_v8 = vpop.f32.mrb[49].mxu1 }
 0x9ce   : > { %v2153_v9 = vpop.f32.mrb[50].mxu0  ;;  %v2199_v11 = vpop.f32.mrb[50].mxu1 }
 0x9cf   : > { %v5791_v12 = vpop.f32.mrb[51].mxu0  ;;  %v5797_v13 = vpop.f32.mrb[51].mxu1  ;;  %v2317_v14 = vsel %vm713_vm3, %v6731_v3, -inf  ;;  %v2314_v15 = vsel %vm713_vm3, %v6733_v4, -inf }
 0x9d0   : > { %2318 = vmax.xlane.f32.xlu0 %v2317_v14  ;;  %2315 = vmax.xlane.f32.xlu1 %v2314_v15 }
 0x9d4   : > { %v2242_v16 = vpop.f32.mrb[52].mxu0  ;;  %v2288_v17 = vpop.f32.mrb[52].mxu1 }
 0x9d5   : > { %v2300_v5 = vmul.f32 0.35355338, %v2242_v16  ;;  %v2301_v18 = vmul.f32 0.35355338, %v2288_v17  ;;  %v5802_v6 = vpop.f32.mrb[53].mxu0  ;;  %v5808_v21 = vpop.f32.mrb[53].mxu1 }
 0x9d6   : > { %v2245_v22 = vpop.f32.mrb[54].mxu0  ;;  %v2291_v25 = vpop.f32.mrb[54].mxu1 }
 0x9d7   : > { %v5803_v26 = vpop.f32.mrb[55].mxu0  ;;  %v5809_v29 = vpop.f32.mrb[55].mxu1  ;;  %v2323_v30 = vsel %vm713_vm3, %v2301_v18, -inf  ;;  %v2320_v31 = vsel %vm713_vm3, %v2300_v5, -inf }
 0x9d8   : > { %2324 = vmax.xlane.f32.xlu0 %v2323_v30  ;;  %2321 = vmax.xlane.f32.xlu1 %v2320_v31 }
 0x9dc   : > { %v2304_v36 = vpop.xlane.xlu0 %2303 }
 0x9dd   : > { %v2326_v32 = vsub.f32 %v6724_v39, %v2304_v36 }
 0x9df   : > { %v2307_v35 = vpop.xlane.xlu1 %2306  ;;  %v2334_v37 = vmul.f32 1.442695, %v2326_v32 }
 0x9e0   : > { %v2327_v27 = vsub.f32 %v2295_v47, %v2307_v35 }
 0x9e2   : > { %v2336_v34 = vmul.f32 1.442695, %v2327_v27 }
 0x9e4   : > { %6158 = vpow2.f32 %v2336_v34 }
 0x9e5   : > { %6160 = vpow2.f32 %v2334_v37 }
 0x9e9   : > { %2497 = vrot.lane.b32.xlu1 %v6663_v51, %s7245_s26 }
 0x9ed   : > { %2546 = vrot.lane.b32.xlu1 %v6665_v61, %s7245_s26 }
 0x9ee   : > { %2448 = vrot.lane.b32.xlu0 %v6655_v55, %s7245_s26  ;;  %v6159_v38 = vpop.eup %6158 }
 0x9ef   : > { %v2353_v40 = vsel %vm713_vm3, %v6159_v38, 0.0  ;;  %v6749_v41 = vpop.eup %6160 }
 0x9f0   : > { %v2350_v51 = vsel %vm713_vm3, %v6749_v41, 0.0 }
 0xa0d   : > { %2354 = vadd.xlane.f32.xlu0 %v2353_v40 }
 0xa11   : > { %2351 = vadd.xlane.f32.xlu1 %v2350_v51 }
 0xa55   : > { %v2310_v55 = vpop.xlane.xlu0 %2309 }
 0xa56   : > { %v2328_v61 = vsub.f32 %v2296_v57, %v2310_v55 }
 0xa58   : > { %v2338_v42 = vmul.f32 1.442695, %v2328_v61 }
 0xa59   : > { %v2313_v43 = vpop.xlane.xlu0 %2312 }
 0xa5a   : > { %6162 = vpow2.f32 %v2338_v42  ;;  %v2329_v39 = vsub.f32 %v2297_v62, %v2313_v43 }
 0xa5c   : > { %v2340_v46 = vmul.f32 1.442695, %v2329_v39 }
 0xa5d   : > { %v2319_v47 = vpop.xlane.xlu0 %2318  ;;  %v2316_v33 = vpop.xlane.xlu1 %2315 }
 0xa5e   : > { %6164 = vpow2.f32 %v2340_v46  ;;  %v2330_v58 = vsub.f32 %v6733_v4, %v2316_v33  ;;  %v2331_v60 = vsub.f32 %v6731_v3, %v2319_v47 }
 0xa60   : > { %v2342_v62 = vmul.f32 1.442695, %v2330_v58  ;;  %v2344_v20 = vmul.f32 1.442695, %v2331_v60 }
 0xa62   : > { %6166 = vpow2.f32 %v2342_v62 }
 0xa63   : > { %6168 = vpow2.f32 %v2344_v20 }
 0xa64   : > { %v6753_v48 = vpop.eup %6162 }
 0xa65   : > { %v2325_v49 = vpop.xlane.xlu0 %2324  ;;  %v2356_v50 = vsel %vm713_vm3, %v6753_v48, 0.0  ;;  %v2322_v59 = vpop.xlane.xlu1 %2321 }
 0xa66   : > { %2357 = vadd.xlane.f32.xlu1 %v2356_v50  ;;  %v2332_v19 = vsub.f32 %v2300_v5, %v2322_v59  ;;  %v2333_v0 = vsub.f32 %v2301_v18, %v2325_v49 }
 0xa68   : > { %v6757_v52 = vpop.eup %6164  ;;  %v2346_v56 = vmul.f32 1.442695, %v2332_v19  ;;  %v2348_v63 = vmul.f32 1.442695, %v2333_v0 }
 0xa69   : > { %v2449_v53 = vpop.permute.xlu0 %2448  ;;  %v2359_v54 = vsel %vm713_vm3, %v6757_v52, 0.0  ;;  %v2498_v1 = vpop.permute.xlu1 %2497 }
 0xa6a   : > { %v2454_v57 = vsel %vm1220_vm4, %v2449_v53, 0  ;;  %2360 = vadd.xlane.f32.xlu0 %v2359_v54  ;;  %6170 = vpow2.f32 %v2346_v56  ;;  %v2503_v22 = vsel %vm1220_vm4, %v2498_v1, 0 }
 0xa6b   : > { %5817 = vmatpush3.bf16.msra.mxu1 %v2454_v57  ;;  %6172 = vpow2.f32 %v2348_v63 }
 0xa6c   : > { %5828 = vmatprep.subr.bf16.mxu1 %v6252_v2 }
 0xa6d   : > { %v2547_v7 = vpop.permute.xlu1 %2546 }
 0xa6e   : > { %v2552_v18 = vsel %vm1220_vm4, %v2547_v7, 0 }
 0xa77   : > { %2644 = vrot.lane.b32.xlu1 %v6684_v10, %s7245_s26  ;;  %v6769_v10 = vpop.eup %6166 }
 0xa78   : > { %v2362_v3 = vsel %vm713_vm3, %v6769_v10, 0.0 }
 0xa80   : > { %2595 = vrot.lane.b32.xlu0 %v6686_v28, %s7245_s26  ;;  %v6771_v28 = vpop.eup %6168 }
 0xa81   : > { %v6775_v8 = vpop.eup %6170  ;;  %v2365_v11 = vsel %vm713_vm3, %v6771_v28, 0.0 }
 0xa82   : > { %v2368_v12 = vsel %vm713_vm3, %v6775_v8, 0.0  ;;  %v6781_v13 = vpop.eup %6172 }
 0xa83   : > { %v2371_v14 = vsel %vm713_vm3, %v6781_v13, 0.0 }
 0xa9a   : > { %v2355_v4 = vpop.xlane.xlu0 %2354 }
 0xa9b   : > { %6174 = vrcp.f32 %v2355_v4  ;;  %2363 = vadd.xlane.f32.xlu1 %v2362_v3 }
 0xa9e   : > { %v2352_v9 = vpop.xlane.xlu1 %2351 }
 0xa9f   : > { %6176 = vrcp.f32 %v2352_v9  ;;  %2366 = vadd.xlane.f32.xlu0 %v2365_v11  ;;  %2369 = vadd.xlane.f32.xlu1 %v2368_v12  ;;  %v5992_v11 = vld [vmem:[%s2822_s24] sm:$0xff]  }
 0xaa3   : > { %2372 = vadd.xlane.f32.xlu0 %v2371_v14 }
 0xaa5   : > { %v6175_v15 = vpop.eup %6174 }
 0xaa6   : > { %v2383_v16 = vmul.f32 %v6175_v15, %v6159_v38 }
 0xaa8   : > { %v2391_v17 = vpack.c.bf16 %v2383_v16, %v2383_v16 }
 0xaa9   : > { %v6177_v5 = vpop.eup %6176 }
 0xaaa   : > { %v2382_v6 = vmul.f32 %v6177_v5, %v6749_v41  ;;  %5819 = vmatmul.mubr.msk.bf16.vlgmr.msra.gmra.mrb[56].mxu1 %vm713_vm3, %v2391_v17  ;;  %v5993_v17 = vld [vmem:[%s2822_s24 + $0x8] sm:$0xff]  }
 0xaab   : > { %5829 = vmatpush3.bf16.msra.mxu1 %v2552_v18  ;;  %5830 = vmatprep.mubr.msk.bf16.mxu1 %vm6253_vm1, %v6252_v2 }
 0xaac   : > { %v2390_v21 = vpack.c.bf16 %v2382_v6, %v2382_v6  ;;  %5840 = vmatprep.subr.bf16.mxu1 %v6252_v2 }
 0xaae   : > { %5813 = vmatmul.mubr.msk.bf16.vlgmr.msra.gmra.mrb[56].mxu0 %vm713_vm3, %v2390_v21 }
 0xaaf   : > { %5823 = vmatpush3.bf16.msra.mxu0 %v2503_v22  ;;  %5824 = vmatprep.mubr.msk.bf16.mxu0 %vm6253_vm1, %v6252_v2 }
 0xab0   : > { %2742 = vrot.lane.b32.xlu1 %v6699_v23, %s7245_s26  ;;  %5834 = vmatprep.subr.bf16.mxu0 %v6252_v2 }
 0xab9   : > { %2693 = vrot.lane.b32.xlu0 %v6701_v24, %s7245_s26  ;;  %s2966_s26 = scalar_lea.vmem %s7219_s13, %s6389_s2 }
 0xaf3   : > { %v2358_v25 = vpop.xlane.xlu1 %2357 }
 0xaf4   : > { %6178 = vrcp.f32 %v2358_v25 }
 0xaf7   : > { %v2361_v26 = vpop.xlane.xlu0 %2360  ;;  %v2645_v23 = vpop.permute.xlu1 %2644 }
 0xaf8   : > { %6180 = vrcp.f32 %v2361_v26  ;;  %v2650_v34 = vsel %vm1220_vm4, %v2645_v23, 0 }
 0xafb   : > { %v2596_v31 = vpop.permute.xlu0 %2595 }
 0xafc   : > { %v2601_v32 = vsel %vm1220_vm4, %v2596_v31, 0 }
 0xafe   : > { %v6179_v29 = vpop.eup %6178 }
 0xaff   : > { %v2384_v30 = vmul.f32 %v6179_v29, %v6753_v48 }
 0xb01   : > { %v2392_v35 = vpack.c.bf16 %v2384_v30, %v2384_v30 }
 0xb02   : > { %v6181_v27 = vpop.eup %6180 }
 0xb03   : > { %v2385_v36 = vmul.f32 %v6181_v27, %v6757_v52  ;;  %5825 = vmatmul.mubr.msk.bf16.vlgmr.msra.gmra.mrb[60].mxu0 %vm713_vm3, %v2392_v35 }
 0xb04   : > { %5835 = vmatpush3.bf16.msra.mxu0 %v2601_v32  ;;  %5836 = vmatprep.mubr.msk.bf16.mxu0 %vm6253_vm1, %v6252_v2 }
 0xb05   : > { %v2393_v24 = vpack.c.bf16 %v2385_v36, %v2385_v36  ;;  %5846 = vmatprep.subr.bf16.mxu0 %v6252_v2 }
 0xb07   : > { %5831 = vmatmul.mubr.msk.bf16.vlgmr.msra.gmra.mrb[60].mxu1 %vm713_vm3, %v2393_v24 }
 0xb08   : > { %5841 = vmatpush3.bf16.msra.mxu1 %v2650_v34  ;;  %5842 = vmatprep.mubr.msk.bf16.mxu1 %vm6253_vm1, %v6252_v2 }
 0xb09   : > { %5852 = vmatprep.subr.bf16.mxu1 %v6252_v2 }
 0xb28   : > { %v2364_v37 = vpop.xlane.xlu1 %2363 }
 0xb29   : > { %6182 = vrcp.f32 %v2364_v37 }
 0xb2c   : > { %v2367_v38 = vpop.xlane.xlu0 %2366  ;;  %v2370_v40 = vpop.xlane.xlu1 %2369 }
 0xb2d   : > { %6184 = vrcp.f32 %v2367_v38 }
 0xb2e   : > { %6186 = vrcp.f32 %v2370_v40 }
 0xb30   : > { %v2373_v41 = vpop.xlane.xlu0 %2372  ;;  %v2743_v48 = vpop.permute.xlu1 %2742 }
 0xb31   : > { %6188 = vrcp.f32 %v2373_v41  ;;  %v2748_v53 = vsel %vm1220_vm4, %v2743_v48, 0 }
 0xb33   : > { %v6183_v51 = vpop.eup %6182 }
 0xb34   : > { %v2386_v55 = vmul.f32 %v6183_v51, %v6769_v10  ;;  %v2694_v61 = vpop.permute.xlu0 %2693 }
 0xb35   : > { %v2699_v47 = vsel %vm1220_vm4, %v2694_v61, 0 }
 0xb36   : > { %v2394_v42 = vpack.c.bf16 %v2386_v55, %v2386_v55 }
 0xb37   : > { %v6185_v43 = vpop.eup %6184 }
 0xb38   : > { %v6187_v39 = vpop.eup %6186  ;;  %v2387_v46 = vmul.f32 %v6185_v43, %v6771_v28  ;;  %5837 = vmatmul.mubr.msk.bf16.vlgmr.msra.gmra.mrb[64].mxu0 %vm713_vm3, %v2394_v42 }
 0xb39   : > { %5847 = vmatpush3.bf16.msra.mxu0 %v2699_v47  ;;  %5848 = vmatprep.mubr.msk.bf16.mxu0 %vm6253_vm1, %v6252_v2  ;;  %v2388_v49 = vmul.f32 %v6187_v39, %v6775_v8 }
 0xb3a   : > { %v2395_v50 = vpack.c.bf16 %v2387_v46, %v2387_v46  ;;  %5858 = vmatprep.subr.bf16.mxu0 %v6252_v2 }
 0xb3b   : > { %v6189_v52 = vpop.eup %6188  ;;  %v2396_v57 = vpack.c.bf16 %v2388_v49, %v2388_v49 }
 0xb3c   : > { %5843 = vmatmul.mubr.msk.bf16.vlgmr.msra.gmra.mrb[64].mxu1 %vm713_vm3, %v2395_v50  ;;  %v2389_v54 = vmul.f32 %v6189_v52, %v6781_v13 }
 0xb3d   : > { %5853 = vmatpush3.bf16.msra.mxu1 %v2748_v53  ;;  %5854 = vmatprep.mubr.msk.bf16.mxu1 %vm6253_vm1, %v6252_v2 }
 0xb3e   : > { %v2397_v33 = vpack.c.bf16 %v2389_v54, %v2389_v54 }
 0xb40   : > { %5849 = vmatmul.mubr.msk.bf16.vlgmr.msra.gmra.mrb[68].mxu0 %vm713_vm3, %v2396_v57 }
 0xb41   : > { %5862 = vmatprep.mubr.msk.bf16.mxu0 %vm6253_vm1, %v6252_v2  ;;  %5859 = vmatpush3.bf16.msra.mxu0 %v5992_v11  ;;  %v2950_v11 = vld [vmem:[%s6858_s21 + $0x88] sm:$0xff] }
 0xb42   : > { %5860 = vmatprep.subr.bf16.mxu0 %v6252_v2 }
 0xb44   : > { %5855 = vmatmul.mubr.msk.bf16.vlgmr.msra.gmra.mrb[68].mxu1 %vm713_vm3, %v2397_v33 }
 0xb45   : > { %5861 = vmatpush3.bf16.msra.mxu0 %v5993_v17  ;;  %v2935_v17 = vld [vmem:[%s6858_s21 + $0x10] sm:$0xff] }
 0xb7d   : > { %v2490_v58 = vpop.f32.mrb[56].mxu1 }
 0xb7e   : > { %v5820_v59 = vpop.f32.mrb[57].mxu1 }
 0xb7f   : > { %v2493_v60 = vpop.f32.mrb[58].mxu1 }
 0xb80   : > { %v5821_v62 = vpop.f32.mrb[59].mxu1 }
 0xb81   : > { %v2441_v19 = vpop.f32.mrb[56].mxu0 }
 0xb82   : > { %v5814_v20 = vpop.f32.mrb[57].mxu0 }
 0xb83   : > { %v2444_v0 = vpop.f32.mrb[58].mxu0 }
 0xb84   : > { %v5815_v56 = vpop.f32.mrb[59].mxu0 }
 0xb85   : > { %v2933_v56 = vld [vmem:[%s6858_s21] sm:$0xff] }
 0xbd6   : > { %v2539_v63 = vpop.f32.mrb[60].mxu0 }
 0xbd7   : > { %v5826_v1 = vpop.f32.mrb[61].mxu0 }
 0xbd8   : > { %v2542_v10 = vpop.f32.mrb[62].mxu0  ;;  %v2934_v1 = vld [vmem:[%s6858_s21 + $0x8] sm:$0xff] }
 0xbd9   : > { %v5827_v28 = vpop.f32.mrb[63].mxu0 }
 0xbda   : > { %v2588_v7 = vpop.f32.mrb[60].mxu1  ;;  %v2942_v28 = vld [vmem:[%s6858_s21 + $0x48] sm:$0xff] }
 0xbdb   : > { %v5969_v4 = vpack.i.bf16 %v2588_v7, %v2539_v63  ;;  %v5832_v3 = vpop.f32.mrb[61].mxu1  ;;  %v2941_v63 = vld [vmem:[%s6858_s21 + $0x40] sm:$0xff] }
 0xbdc   : > { %v2591_v8 = vpop.f32.mrb[62].mxu1  ;;  %v5195_v10 = vcombine.high %v2933_v56, %v2941_v63  ;;  %v5194_v7 = vcombine.low %v2933_v56, %v2941_v63  ;;  %v5197_v3 = vcombine.high %v2934_v1, %v2942_v28  ;;  %v2939_v56 = vld [vmem:[%s6858_s21 + $0x30] sm:$0xff] }
 0xbdd   : > { %v5833_v9 = vpop.f32.mrb[63].mxu1  ;;  %5970 = vrot.lane.b32.xlu0 %v5969_v4, %s7246_s19  ;;  %v5196_v4 = vcombine.low %v2934_v1, %v2942_v28  ;;  %v2949_v8 = vld [vmem:[%s6858_s21 + $0x80] sm:$0xff]  ;;  %s2883_s19 = scalar_lea.vmem %s7216_s10, %s6242_s27  ;;  %v2947_v63 = vld [vmem:[%s6858_s21 + $0x70] sm:$0xff]  ;;  %v2940_v1 = vld [vmem:[%s6858_s21 + $0x38] sm:$0xff] }
 0xbde   : > { %3214 = vmatprep.subr.bf16.mxu1 %v5195_v10  ;;  %3257 = vmatprep.subr.bf16.mxu0 %v5197_v3  ;;  %v2957_v9 = vld [vmem:[%s6858_s21 + $0xc0] sm:$0xff]  ;;  %v2948_v10 = vld [vmem:[%s6858_s21 + $0x78] sm:$0xff] }
 0xbdf   : > { %3215 = vmatpush1.bf16.msra.mxu1 %v5194_v7  ;;  %v5209_v3 = vcombine.high %v2940_v1, %v2948_v10 }
 0xc0b   : > { %v2637_v12 = vpop.f32.mrb[64].mxu0 }
 0xc0c   : > { %v5838_v13 = vpop.f32.mrb[65].mxu0 }
 0xc0d   : > { %v2640_v14 = vpop.f32.mrb[66].mxu0  ;;  %v2958_v13 = vld [vmem:[%s6858_s21 + $0xc8] sm:$0xff] }
 0xc0e   : > { %v5839_v15 = vpop.f32.mrb[67].mxu0  ;;  %v5210_v14 = vcombine.low %v2949_v8, %v2957_v9 }
 0xc0f   : > { %v2686_v16 = vpop.f32.mrb[64].mxu1  ;;  %v5212_v15 = vcombine.low %v2950_v11, %v2958_v13 }
 0xc10   : > { %v5974_v5 = vpack.i.bf16 %v2686_v16, %v2637_v12  ;;  %v5844_v18 = vpop.f32.mrb[65].mxu1  ;;  %v5211_v12 = vcombine.high %v2949_v8, %v2957_v9  ;;  %v5213_v16 = vcombine.high %v2950_v11, %v2958_v13  ;;  %v2955_v8 = vld [vmem:[%s6858_s21 + $0xb0] sm:$0xff]  ;;  %v2956_v11 = vld [vmem:[%s6858_s21 + $0xb8] sm:$0xff]  ;;  %v5206_v13 = vcombine.low %v2939_v56, %v2947_v63 }
 0xc11   : > { %v2689_v6 = vpop.f32.mrb[66].mxu1  ;;  %v2936_v18 = vld [vmem:[%s6858_s21 + $0x18] sm:$0xff]  ;;  %v2963_v9 = vld [vmem:[%s6858_s21 + $0xf0] sm:$0xff] }
 0xc12   : > { %v5845_v21 = vpop.f32.mrb[67].mxu1  ;;  %5975 = vrot.lane.b32.xlu1 %v5974_v5, %s7247_s25  ;;  %3216 = vmatprep.subr.bf16.mxu1 %v5211_v12  ;;  %v2943_v5 = vld [vmem:[%s6858_s21 + $0x50] sm:$0xff]  ;;  %v6262_v6 = vmov 0   ;;  %s2885_s25 = scalar_lea.vmem %s7217_s11, %s6242_s27  ;;  %v2964_v12 = vld [vmem:[%s6858_s21 + $0xf8] sm:$0xff] }
 0xc13   : > { %v2735_v22 = vpop.f32.mrb[68].mxu0  ;;  %3217 = vmatpush1.bf16.msra.mxu1 %v5210_v14  ;;  %3246 = vmatprep.mubr.bf16.mxu1 %v6262_v6  ;;  %v5198_v21 = vcombine.low %v2935_v17, %v2943_v5  ;;  %v5208_v14 = vcombine.low %v2940_v1, %v2948_v10 }
 0xc14   : > { %v5850_v25 = vpop.f32.mrb[69].mxu0 }
 0xc15   : > { %v2738_v26 = vpop.f32.mrb[70].mxu0  ;;  %v2944_v25 = vld [vmem:[%s6858_s21 + $0x58] sm:$0xff] }
 0xc16   : > { %v5851_v29 = vpop.f32.mrb[71].mxu0  ;;  %v5200_v26 = vcombine.low %v2936_v18, %v2944_v25 }
 0xc17   : > { %v2784_v30 = vpop.f32.mrb[68].mxu1  ;;  %v5201_v29 = vcombine.high %v2936_v18, %v2944_v25 }
 0xc18   : > { %v5979_v31 = vpack.i.bf16 %v2784_v30, %v2735_v22  ;;  %v5856_v35 = vpop.f32.mrb[69].mxu1  ;;  %v5199_v22 = vcombine.high %v2935_v17, %v2943_v5  ;;  %v5222_v17 = vcombine.low %v2955_v8, %v2963_v9  ;;  %v5224_v5 = vcombine.low %v2956_v11, %v2964_v12 }
 0xc19   : > { %v2787_v2 = vpop.f32.mrb[70].mxu1 }
 0xc1a   : > { %v5857_v27 = vpop.f32.mrb[71].mxu1  ;;  %5980 = vrot.lane.b32.xlu0 %v5979_v31, %s7248_s23  ;;  %3300 = vmatprep.subr.bf16.mxu1 %v5199_v22  ;;  %s6878_s23 = scalar_lea.vmem %s7220_s14, %s5378_s22  ;;  %s3865_s22 = scalar_lea.vmem %s7221_s15, %s6242_s27 }
 0xc1b   : > { %v5994_v18 = vld [vmem:[%s6878_s23 + $0x40] sm:$0xff]  }
 0xc1c   : > { %v5996_v22 = vld [vmem:[%s6878_s23] sm:$0xff]  }
 0xc1d   : > { %v5997_v25 = vld [vmem:[%s6878_s23 + $0x80] sm:$0xff]  }
 0xc4f   : > { %v5971_v36 = vpop.permute.xlu0 %5970 }
 0xc50   : > { %v5973_v23 = vunpack.i.h.bf16 %v5971_v36  ;;  %v5972_v24 = vunpack.i.l.bf16 %v5971_v36 }
 0xc52   : > { %v2815_v40 = vsel %vm713_vm3, %v2490_v58, %v5973_v23  ;;  %v2814_v41 = vsel %vm713_vm3, %v2441_v19, %v5972_v24 }
 0xc84   : > { %v5976_v32 = vpop.permute.xlu1 %5975 }
 0xc85   : > { %v5978_v34 = vunpack.i.h.bf16 %v5976_v32  ;;  %v5977_v37 = vunpack.i.l.bf16 %v5976_v32  ;;  %v5189_v32 = vld [vmem:[%s2883_s19] ss:$0 sm:$0xff] }
 0xc87   : > { %v2817_v61 = vsel %vm1626_vm5, %v2815_v40, %v5978_v34  ;;  %v2816_v42 = vsel %vm1626_vm5, %v2814_v41, %v5977_v37  ;;  %v5190_v40 = vld [vmem:[%s2885_s25] ss:$0 sm:$0xff]  ;;  %s4971_s25 = scalar_lea.vmem %s7222_s16, %s6242_s27 }
 0xc8c   : > { %v5981_v38 = vpop.permute.xlu0 %5980 }
 0xc8d   : > { %v5983_v51 = vunpack.i.h.bf16 %v5981_v38  ;;  %v5982_v55 = vunpack.i.l.bf16 %v5981_v38 }
 0xc8f   : > { %v2819_v43 = vsel %vm1629_vm6, %v2817_v61, %v5983_v51  ;;  %v2818_v39 = vsel %vm1629_vm6, %v2816_v42, %v5982_v55  ;;  %v2951_v51 = vld [vmem:[%s6858_s21 + $0x90] sm:$0xff]  ;;  %v2952_v61 = vld [vmem:[%s6858_s21 + $0x98] sm:$0xff] }
 0xc90   : > { %v2820_v46 = vpack.c.bf16 %v2819_v43, %v2818_v39  ;;  %v2959_v55 = vld [vmem:[%s6858_s21 + $0xd0] sm:$0xff]  ;;  %v2960_v42 = vld [vmem:[%s6858_s21 + $0xd8] sm:$0xff] }
 0xc92   : > { %5863 = vmatmul.mubr.msk.bf16.vlgmr.msra.gmra.mrb[72].mxu0 %vm637_vm2, %v2820_v46 }
 0xc93   : > { %3258 = vmatpush1.bf16.msra.mxu0 %v5196_v4  ;;  %3289 = vmatprep.mubr.bf16.mxu0 %v6262_v6  ;;  %v5207_v4 = vcombine.high %v2939_v56, %v2947_v63 }
 0xc94   : > { %3259 = vmatprep.subr.bf16.mxu0 %v5213_v16  ;;  %v5225_v16 = vcombine.high %v2956_v11, %v2964_v12 }
 0xc97   : > { %3260 = vmatpush1.bf16.msra.mxu0 %v5212_v15  ;;  %v5223_v15 = vcombine.high %v2955_v8, %v2963_v9 }
 0xc98   : > { %3343 = vmatprep.subr.bf16.mxu0 %v5201_v29  ;;  %v5999_v29 = vld [vmem:[%s6878_s23 + $0xc8] sm:$0xff]  }
 0xd65   : > { %v2876_v47 = vpop.f32.mrb[72].mxu0 }
 0xd66   : > { %v2877_v48 = vadd.f32 %v2876_v47, %v6645_v44  ;;  %v5864_v49 = vpop.f32.mrb[73].mxu0  ;;  %v5215_v47 = vcombine.high %v2951_v51, %v2959_v55 }
 0xd67   : > { %v2879_v50 = vpop.f32.mrb[74].mxu0  ;;  %v2937_v49 = vld [vmem:[%s6858_s21 + $0x20] sm:$0xff] }
 0xd68   : > { %v2880_v52 = vadd.f32 %v2879_v50, %v6647_v45  ;;  %v5865_v53 = vpop.f32.mrb[75].mxu0  ;;  %v2887_v54 = vsel %vm637_vm2, %v2877_v48, 0.0  ;;  %v2945_v50 = vld [vmem:[%s6858_s21 + $0x60] sm:$0xff] }
 0xd69   : > { %2888 = vadd.xlane.f32.xlu1 %v2887_v54  ;;  %v2946_v53 = vld [vmem:[%s6858_s21 + $0x68] sm:$0xff]  ;;  %v5214_v54 = vcombine.low %v2951_v51, %v2959_v55 }
 0xd6a   : > { %v2890_v57 = vsel %vm637_vm2, %v2880_v52, 0.0  ;;  %v6015_v51 = vld [vmem:[%s6878_s23 + $0xe8] sm:$0xff]  }
 0xd6b   : > { %2891 = vadd.xlane.f32.xlu0 %v2890_v57  ;;  %v5216_v57 = vcombine.low %v2952_v61, %v2960_v42  ;;  %v6016_v55 = vld [vmem:[%s6878_s23 + $0x28] sm:$0xff]  }
 0xdf6   : > { %v2889_v33 = vpop.xlane.xlu1 %2888 }
 0xdf7   : > { %v2893_v58 = vmul.f32 0.03125, %v2889_v33  ;;  %v5203_v33 = vcombine.high %v2937_v49, %v2945_v50 }
 0xdf8   : > { %v2892_v59 = vpop.xlane.xlu0 %2891 }
 0xdf9   : > { %v2895_v60 = vsub.f32 %v2877_v48, %v2893_v58  ;;  %v2894_v62 = vmul.f32 0.03125, %v2892_v59  ;;  %v5217_v48 = vcombine.high %v2952_v61, %v2960_v42  ;;  %v2953_v59 = vld [vmem:[%s6858_s21 + $0xa0] sm:$0xff]  ;;  %v6017_v61 = vld [vmem:[%s6878_s23 + $0xa8] sm:$0xff]   ;;  %v6018_v42 = vld [vmem:[%s6878_s23 + $0x70] sm:$0xff]  }
 0xdfb   : > { %v6848_v19 = vsub.f32 %v2880_v52, %v2894_v62  ;;  %v2897_v44 = vmul.f32 %v2895_v60, %v2895_v60  ;;  %v2938_v52 = vld [vmem:[%s6858_s21 + $0x28] sm:$0xff] }
 0xdfc   : > { %v5205_v58 = vcombine.high %v2938_v52, %v2946_v53  ;;  %v2954_v62 = vld [vmem:[%s6858_s21 + $0xa8] sm:$0xff] }
 0xdfd   : > { %v2899_v20 = vsel %vm637_vm2, %v2897_v44, 0.0  ;;  %v2898_v45 = vmul.f32 %v6848_v19, %v6848_v19  ;;  %v5202_v44 = vcombine.low %v2937_v49, %v2945_v50  ;;  %v6022_v49 = vld [vmem:[%s6878_s23 + $0x78] sm:$0xff]  }
 0xdfe   : > { %2900 = vadd.xlane.f32.xlu0 %v2899_v20  ;;  %v5204_v20 = vcombine.low %v2938_v52, %v2946_v53  ;;  %v6023_v50 = vld [vmem:[%s6878_s23 + $0xf8] sm:$0xff]  }
 0xdff   : > { %v2902_v0 = vsel %vm637_vm2, %v2898_v45, 0.0  ;;  %v6024_v52 = vld [vmem:[%s6878_s23 + $0x38] sm:$0xff]  }
 0xe00   : > { %2903 = vadd.xlane.f32.xlu1 %v2902_v0  ;;  %v6025_v53 = vld [vmem:[%s6878_s23 + $0xb8] sm:$0xff]  }
 0xe8b   : > { %v2901_v30 = vpop.xlane.xlu0 %2900 }
 0xe8c   : > { %v2905_v31 = vmul.f32 0.03125, %v2901_v30  ;;  %v6001_v30 = vld [vmem:[%s6878_s23 + $0x88] sm:$0xff]  }
 0xe8d   : > { %v2904_v35 = vpop.xlane.xlu1 %2903 }
 0xe8e   : > { %v2907_v2 = vadd.f32 1e-05, %v2905_v31  ;;  %v2906_v27 = vmul.f32 0.03125, %v2904_v35  ;;  %v6002_v31 = vld [vmem:[%s6878_s23 + $0x50] sm:$0xff]  }
 0xe8f   : > { %v6003_v35 = vld [vmem:[%s6878_s23 + $0xd0] sm:$0xff]  }
 0xe90   : > { %6190 = vrsqrt.f32 %v2907_v2  ;;  %v2908_v36 = vadd.f32 1e-05, %v2906_v27  ;;  %v6004_v2 = vld [vmem:[%s6878_s23 + $0x10] sm:$0xff]  }
 0xe91   : > { %v6005_v27 = vld [vmem:[%s6878_s23 + $0x90] sm:$0xff]  }
 0xe92   : > { %6192 = vrsqrt.f32 %v2908_v36  ;;  %v6006_v36 = vld [vmem:[%s6878_s23 + $0x58] sm:$0xff]  }
 0xe9a   : > { %v6191_v23 = vpop.eup %6190 }
 0xe9b   : > { %v2911_v24 = vmul.f32 %v6191_v23, %v2895_v60  ;;  %v2961_v60 = vld [vmem:[%s6858_s21 + $0xe0] sm:$0xff]  ;;  %v6008_v23 = vld [vmem:[%s6878_s23 + $0x18] sm:$0xff]  }
 0xe9c   : > { %v6193_v34 = vpop.eup %6192  ;;  %v5219_v45 = vcombine.high %v2953_v59, %v2961_v60  ;;  %v5218_v28 = vcombine.low %v2953_v59, %v2961_v60  ;;  %v6980_v60 = vld [vmem:[%s2966_s26 + $0x8] sm:$0xff] }
 0xe9d   : > { %v2919_v37 = vmul.f32 %v5189_v32, %v2911_v24  ;;  %v2912_v38 = vmul.f32 %v6193_v34, %v6848_v19  ;;  %v2962_v19 = vld [vmem:[%s6858_s21 + $0xe8] sm:$0xff]  ;;  %v6009_v24 = vld [vmem:[%s6878_s23 + $0x98] sm:$0xff]   ;;  %v6010_v34 = vld [vmem:[%s6878_s23 + $0x60] sm:$0xff]  }
 0xe9e   : > { %v5221_v0 = vcombine.high %v2954_v62, %v2962_v19  ;;  %v5220_v7 = vcombine.low %v2954_v62, %v2962_v19 }
 0xe9f   : > { %v2920_v41 = vmul.f32 %v5189_v32, %v2912_v38  ;;  %v6893_v43 = vadd.f32 %v5190_v40, %v2919_v37  ;;  %v6007_v32 = vld [vmem:[%s6878_s23 + $0xd8] sm:$0xff]   ;;  %v6011_v37 = vld [vmem:[%s6878_s23 + $0xe0] sm:$0xff]  }
 0xea0   : > { %v6012_v38 = vld [vmem:[%s6878_s23 + $0x20] sm:$0xff]  }
 0xea1   : > { %v6895_v39 = vadd.f32 %v5190_v40, %v2920_v41  ;;  %v6013_v40 = vld [vmem:[%s6878_s23 + $0xa0] sm:$0xff]   ;;  %v6014_v41 = vld [vmem:[%s6878_s23 + $0x68] sm:$0xff]  }
 0xea3   : > { %v6899_v46 = vpack.c.bf16 %v6895_v39, %v6893_v43 }
 0xea5   : > { %5226 = vmatmul.mubr.msk.bf16.vlgmr.msra.gmra.mrb[72].mxu1 %vm637_vm2, %v6899_v46  ;;  %5227 = vmatmul.mubr.msk.bf16.vlgmr.msra.gmra.mrb[76].mxu0 %vm637_vm2, %v6899_v46 }
 0xea6   : > { %3301 = vmatpush1.bf16.msra.mxu1 %v5198_v21  ;;  %3344 = vmatpush1.bf16.msra.mxu0 %v5200_v26  ;;  %v5995_v21 = vld [vmem:[%s6878_s23 + $0xc0] sm:$0xff]   ;;  %v5998_v26 = vld [vmem:[%s6878_s23 + $0x48] sm:$0xff]  }
 0xea7   : > { %3302 = vmatprep.subr.bf16.mxu1 %v5215_v47  ;;  %3345 = vmatprep.subr.bf16.mxu0 %v5217_v48  ;;  %v6020_v47 = vld [vmem:[%s6878_s23 + $0x30] sm:$0xff]  }
 0xea8   : > { %3332 = vmatprep.mubr.bf16.mxu1 %v6262_v6  ;;  %3375 = vmatprep.mubr.bf16.mxu0 %v6262_v6  ;;  %v6021_v48 = vld [vmem:[%s6878_s23 + $0xb0] sm:$0xff]  }
 0xeaa   : > { %3303 = vmatpush1.bf16.msra.mxu1 %v5214_v54  ;;  %3346 = vmatpush1.bf16.msra.mxu0 %v5216_v57  ;;  %v6026_v54 = vld [vmem:[%s6878_s23 + $0x140] sm:$0xff]  }
 0xeab   : > { %3386 = vmatprep.subr.bf16.mxu1 %v5203_v33  ;;  %3429 = vmatprep.subr.bf16.mxu0 %v5205_v58  ;;  %v6027_v57 = vld [vmem:[%s6878_s23 + $0x1c0] sm:$0xff]   ;;  %v2971_v33 = vlaneseq }
 0xead   : > { %5228 = vmatmul.mubr.msk.bf16.vlgmr.msra.gmra.mrb[76].mxu1 %vm637_vm2, %v6899_v46  ;;  %5229 = vmatmul.mubr.msk.bf16.vlgmr.msra.gmra.mrb[80].mxu0 %vm637_vm2, %v6899_v46  ;;  %v6973_v58 = vshrl.u32 %v2971_v33, 7 }
 0xeae   : > { %3387 = vmatpush1.bf16.msra.mxu1 %v5202_v44  ;;  %3430 = vmatpush1.bf16.msra.mxu0 %v5204_v20  ;;  %v2967_v20 = vld [vmem:[%s2966_s26] sm:$0xff]  ;;  %s4973_s26 = scalar_lea.vmem %s7223_s17, %s6242_s27 }
 0xeaf   : > { %3388 = vmatprep.subr.bf16.mxu1 %v5219_v45  ;;  %3431 = vmatprep.subr.bf16.mxu0 %v5221_v0  ;;  %v2997_v59 = vsub.s32 6, %v6973_v58  ;;  %v2973_v19 = vsub.s32 0, %v6973_v58  ;;  %v2981_v44 = vsub.s32 2, %v6973_v58  ;;  %v2977_v45 = vsub.s32 1, %v6973_v58 }
 0xeb0   : > { %3418 = vmatprep.mubr.bf16.mxu1 %v6262_v6  ;;  %3461 = vmatprep.mubr.bf16.mxu0 %v6262_v6  ;;  %v2985_v0 = vsub.s32 3, %v6973_v58  ;;  %v3001_v8 = vsub.s32 7, %v6973_v58 }
 0xeb1   : > { %v6983_v62 = vrot.slane %v6980_v60, %v2997_v59  ;;  %v2974_v56 = vrot.slane %v2967_v20, %v2973_v19  ;;  %v2982_v63 = vrot.slane %v2967_v20, %v2981_v44  ;;  %v2978_v1 = vrot.slane %v2967_v20, %v2977_v45 }
 0xeb2   : > { %3389 = vmatpush1.bf16.msra.mxu1 %v5218_v28  ;;  %3432 = vmatpush1.bf16.msra.mxu0 %v5220_v7  ;;  %v2986_v10 = vrot.slane %v2967_v20, %v2985_v0  ;;  %v2989_v28 = vsub.s32 4, %v6973_v58 }
 0xeb3   : > { %3472 = vmatprep.subr.bf16.mxu1 %v5207_v4  ;;  %3515 = vmatprep.subr.bf16.mxu0 %v5209_v3  ;;  %v2993_v3 = vsub.s32 5, %v6973_v58 }
 0xeb5   : > { %5230 = vmatmul.mubr.msk.bf16.vlgmr.msra.gmra.mrb[80].mxu1 %vm637_vm2, %v6899_v46  ;;  %5231 = vmatmul.mubr.msk.bf16.vlgmr.msra.gmra.mrb[84].mxu0 %vm637_vm2, %v6899_v46 }
 0xeb6   : > { %3473 = vmatpush1.bf16.msra.mxu1 %v5206_v13  ;;  %3516 = vmatpush1.bf16.msra.mxu0 %v5208_v14 }
 0xeb7   : > { %3474 = vmatprep.subr.bf16.mxu1 %v5223_v15  ;;  %3517 = vmatprep.subr.bf16.mxu0 %v5225_v16 }
 0xeb8   : > { %3504 = vmatprep.mubr.bf16.mxu1 %v6262_v6  ;;  %3547 = vmatprep.mubr.bf16.mxu0 %v6262_v6  ;;  %v6000_v6 = vld [vmem:[%s6878_s23 + $0x8] sm:$0xff]  }
 0xeba   : > { %3475 = vmatpush1.bf16.msra.mxu1 %v5222_v17  ;;  %3518 = vmatpush1.bf16.msra.mxu0 %v5224_v5 }
 0xebb   : > { %5458 = vmatprep.subr.bf16.mxu1 %v5994_v18  ;;  %5480 = vmatprep.subr.bf16.mxu0 %v5995_v21 }
 0xebd   : > { %5232 = vmatmul.mubr.msk.bf16.vlgmr.msra.gmra.mrb[84].mxu1 %vm637_vm2, %v6899_v46  ;;  %5233 = vmatmul.mubr.msk.bf16.vlgmr.msra.gmra.mrb[88].mxu0 %vm637_vm2, %v6899_v46  ;;  %v6019_v46 = vld [vmem:[%s6878_s23 + $0xf0] sm:$0xff]  }
 0xebe   : > { %5459 = vmatpush3.bf16.msra.mxu1 %v5996_v22  ;;  %5481 = vmatpush3.bf16.msra.mxu0 %v5997_v25  ;;  %v2990_v25 = vrot.slane %v2967_v20, %v2989_v28 }
 0xebf   : > { %5460 = vmatprep.subr.bf16.mxu1 %v5998_v26  ;;  %5482 = vmatprep.subr.bf16.mxu0 %v5999_v29  ;;  %v2998_v26 = vrot.slane %v2967_v20, %v2997_v59 }
 0xec2   : > { %5461 = vmatpush3.bf16.msra.mxu1 %v6000_v6  ;;  %5483 = vmatpush3.bf16.msra.mxu0 %v6001_v30  ;;  %v2994_v30 = vrot.slane %v2967_v20, %v2993_v3 }
 0xec3   : > { %5462 = vmatprep.subr.bf16.mxu1 %v6002_v31  ;;  %5484 = vmatprep.subr.bf16.mxu0 %v6003_v35  ;;  %v3002_v31 = vrot.slane %v2967_v20, %v3001_v8  ;;  %v3014_v20 = vrot.slane %v6980_v60, %v2981_v44  ;;  %v3018_v44 = vrot.slane %v6980_v60, %v2985_v0 }
 0xec6   : > { %5463 = vmatpush3.bf16.msra.mxu1 %v6004_v2  ;;  %5485 = vmatpush3.bf16.msra.mxu0 %v6005_v27 }
 0xec7   : > { %5464 = vmatprep.subr.bf16.mxu1 %v6006_v36  ;;  %5486 = vmatprep.subr.bf16.mxu0 %v6007_v32 }
 0xeca   : > { %5465 = vmatpush3.bf16.msra.mxu1 %v6008_v23  ;;  %5487 = vmatpush3.bf16.msra.mxu0 %v6009_v24 }
 0xecb   : > { %5466 = vmatprep.subr.bf16.mxu1 %v6010_v34  ;;  %5488 = vmatprep.subr.bf16.mxu0 %v6011_v37 }
 0xece   : > { %5467 = vmatpush3.bf16.msra.mxu1 %v6012_v38  ;;  %5489 = vmatpush3.bf16.msra.mxu0 %v6013_v40 }
 0xecf   : > { %5468 = vmatprep.subr.bf16.mxu1 %v6014_v41  ;;  %5490 = vmatprep.subr.bf16.mxu0 %v6015_v51 }
 0xed2   : > { %5469 = vmatpush3.bf16.msra.mxu1 %v6016_v55  ;;  %5491 = vmatpush3.bf16.msra.mxu0 %v6017_v61  ;;  %v6028_v61 = vld [vmem:[%s6878_s23 + $0x100] sm:$0xff]  }
 0xed3   : > { %5470 = vmatprep.subr.bf16.mxu1 %v6018_v42  ;;  %5492 = vmatprep.subr.bf16.mxu0 %v6019_v46  ;;  %v6029_v42 = vld [vmem:[%s6878_s23 + $0x180] sm:$0xff]  }
 0xed6   : > { %5471 = vmatpush3.bf16.msra.mxu1 %v6020_v47  ;;  %5493 = vmatpush3.bf16.msra.mxu0 %v6021_v48 }
 0xed7   : > { %5472 = vmatprep.subr.bf16.mxu1 %v6022_v49  ;;  %5494 = vmatprep.subr.bf16.mxu0 %v6023_v50  ;;  %v6030_v50 = vld [vmem:[%s6878_s23 + $0x148] sm:$0xff]  }
 0xeda   : > { %5473 = vmatpush3.bf16.msra.mxu1 %v6024_v52  ;;  %5495 = vmatpush3.bf16.msra.mxu0 %v6025_v53  ;;  %v6031_v52 = vld [vmem:[%s6878_s23 + $0x1c8] sm:$0xff]   ;;  %v3006_v53 = vrot.slane %v6980_v60, %v2973_v19  ;;  %v3010_v19 = vrot.slane %v6980_v60, %v2977_v45  ;;  %v6035_v45 = vld [vmem:[%s6878_s23 + $0x1d0] sm:$0xff]  }
 0xedb   : > { %5502 = vmatprep.subr.bf16.mxu1 %v6026_v54  ;;  %5524 = vmatprep.subr.bf16.mxu0 %v6027_v57 }
 0xf78   : > { %v3248_v7 = vpop.f32.mrb[72].mxu1  ;;  %v3291_v4 = vpop.f32.mrb[76].mxu0 }
 0xf79   : > { %v3249_v9 = vadd.f32 %v3248_v7, %v2974_v56  ;;  %v3292_v11 = vadd.f32 %v3291_v4, %v2982_v63  ;;  %v3250_v12 = vpop.f32.mrb[73].mxu1  ;;  %v3293_v13 = vpop.f32.mrb[77].mxu0 }
 0xf7a   : > { %v3251_v14 = vadd.f32 %v3250_v12, %v2978_v1  ;;  %v3294_v15 = vadd.f32 %v3293_v13, %v2986_v10  ;;  %v3252_v16 = vpop.f32.mrb[74].mxu1  ;;  %v3295_v17 = vpop.f32.mrb[78].mxu0 }
 0xf7b   : > { %v3253_v5 = vadd.f32 %v3252_v16, %v2974_v56  ;;  %v3296_v18 = vadd.f32 %v3295_v17, %v2982_v63  ;;  %v3254_v21 = vpop.f32.mrb[75].mxu1  ;;  %v3297_v22 = vpop.f32.mrb[79].mxu0  ;;  %v3558_v35 = vmax.f32 %v3249_v9, 0.0  ;;  %v3560_v2 = vmax.f32 %v3292_v11, 0.0  ;;  %v6032_v9 = vld [vmem:[%s6878_s23 + $0x108] sm:$0xff]   ;;  %v6034_v16 = vld [vmem:[%s6878_s23 + $0x150] sm:$0xff]  }
 0xf7c   : > { %v3255_v29 = vadd.f32 %v3254_v21, %v2978_v1  ;;  %v3298_v6 = vadd.f32 %v3297_v22, %v2986_v10  ;;  %v3559_v32 = vmax.f32 %v3251_v14, 0.0  ;;  %v3561_v23 = vmax.f32 %v3294_v15, 0.0  ;;  %v6033_v11 = vld [vmem:[%s6878_s23 + $0x188] sm:$0xff]  }
 0xf7d   : > { %v3574_v27 = vmax.f32 %v3253_v5, 0.0  ;;  %v3576_v36 = vmax.f32 %v3296_v18, 0.0 }
 0xf7e   : > { %v3575_v24 = vmax.f32 %v3255_v29, 0.0  ;;  %v3577_v34 = vmax.f32 %v3298_v6, 0.0 }
 0xf7f   : > { %v3590_v37 = vpack.c.bf16 %v3574_v27, %v3558_v35  ;;  %v3592_v38 = vpack.c.bf16 %v3576_v36, %v3560_v2 }
 0xf80   : > { %v3591_v40 = vpack.c.bf16 %v3575_v24, %v3559_v32  ;;  %v3593_v41 = vpack.c.bf16 %v3577_v34, %v3561_v23  ;;  %v3334_v51 = vpop.f32.mrb[76].mxu1  ;;  %v3377_v55 = vpop.f32.mrb[80].mxu0  ;;  %v6038_v32 = vld [vmem:[%s6878_s23 + $0x158] sm:$0xff]  }
 0xf81   : > { %v3335_v46 = vadd.f32 %v3334_v51, %v2990_v25  ;;  %v3378_v47 = vadd.f32 %v3377_v55, %v2998_v26  ;;  %v3336_v48 = vpop.f32.mrb[77].mxu1  ;;  %v3379_v49 = vpop.f32.mrb[81].mxu0  ;;  %v6039_v23 = vld [vmem:[%s6878_s23 + $0x1d8] sm:$0xff]  }
 0xf82   : > { %v3337_v54 = vadd.f32 %v3336_v48, %v2994_v30  ;;  %v3380_v57 = vadd.f32 %v3379_v49, %v3002_v31  ;;  %v3338_v33 = vpop.f32.mrb[78].mxu1  ;;  %v3381_v59 = vpop.f32.mrb[82].mxu0  ;;  %4673 = vmatprep.mubr.bf16.mxu1 %v3591_v40  ;;  %4714 = vmatprep.mubr.bf16.mxu0 %v3593_v41  ;;  %v6040_v48 = vld [vmem:[%s6878_s23 + $0x118] sm:$0xff]  }
 0xf83   : > { %v3339_v56 = vadd.f32 %v3338_v33, %v2990_v25  ;;  %v3382_v63 = vadd.f32 %v3381_v59, %v2998_v26  ;;  %v3340_v1 = vpop.f32.mrb[79].mxu1  ;;  %v3383_v10 = vpop.f32.mrb[83].mxu0  ;;  %4674 = vmatmul.mubr.bf16.vlgmr.msra.gmra.mrb[88].mxu1 %v3590_v37  ;;  %4715 = vmatmul.mubr.bf16.vlgmr.msra.gmra.mrb[92].mxu0 %v3592_v38  ;;  %v3562_v12 = vmax.f32 %v3335_v46, 0.0  ;;  %v3564_v13 = vmax.f32 %v3378_v47, 0.0  ;;  %v6041_v49 = vld [vmem:[%s6878_s23 + $0x198] sm:$0xff]  }
 0xf84   : > { %v3341_v7 = vadd.f32 %v3340_v1, %v2994_v30  ;;  %v3384_v4 = vadd.f32 %v3383_v10, %v3002_v31  ;;  %5503 = vmatpush3.bf16.msra.mxu1 %v6028_v61  ;;  %5525 = vmatpush3.bf16.msra.mxu0 %v6029_v42  ;;  %v3563_v17 = vmax.f32 %v3337_v54, 0.0  ;;  %v3565_v5 = vmax.f32 %v3380_v57, 0.0  ;;  %v6036_v30 = vld [vmem:[%s6878_s23 + $0x110] sm:$0xff]  }
 0xf85   : > { %v3578_v14 = vmax.f32 %v3339_v56, 0.0  ;;  %v3580_v15 = vmax.f32 %v3382_v63, 0.0  ;;  %5504 = vmatprep.subr.bf16.mxu1 %v6030_v50  ;;  %5526 = vmatprep.subr.bf16.mxu0 %v6031_v52  ;;  %v6037_v31 = vld [vmem:[%s6878_s23 + $0x190] sm:$0xff]   ;;  %v3022_v61 = vrot.slane %v6980_v60, %v2989_v28  ;;  %v3026_v42 = vrot.slane %v6980_v60, %v2993_v3  ;;  %v6042_v28 = vld [vmem:[%s6878_s23 + $0x160] sm:$0xff]  }
 0xf86   : > { %v3579_v18 = vmax.f32 %v3341_v7, 0.0  ;;  %v3581_v21 = vmax.f32 %v3384_v4, 0.0  ;;  %v3034_v50 = vrot.slane %v6980_v60, %v3001_v8  ;;  %v6043_v3 = vld [vmem:[%s6878_s23 + $0x1e0] sm:$0xff]  }
 0xf87   : > { %v7018_v22 = vpack.c.bf16 %v3578_v14, %v3562_v12  ;;  %v7020_v25 = vpack.c.bf16 %v3580_v15, %v3564_v13  ;;  %v6045_v7 = vld [vmem:[%s6878_s23 + $0x1a0] sm:$0xff]   ;;  %v6046_v12 = vld [vmem:[%s6878_s23 + $0x168] sm:$0xff]  }
 0xf88   : > { %v3595_v0 = vpack.c.bf16 %v3579_v18, %v3563_v17  ;;  %v3597_v26 = vpack.c.bf16 %v3581_v21, %v3565_v5  ;;  %5505 = vmatpush3.bf16.msra.mxu1 %v6032_v9  ;;  %5527 = vmatpush3.bf16.msra.mxu0 %v6033_v11  ;;  %v3420_v29 = vpop.f32.mrb[80].mxu1  ;;  %v3463_v6 = vpop.f32.mrb[84].mxu0  ;;  %v6047_v13 = vld [vmem:[%s6878_s23 + $0x1e8] sm:$0xff]  }
 0xf89   : > { %v3421_v35 = vadd.f32 %v3420_v29, %v3006_v53  ;;  %v3464_v2 = vadd.f32 %v3463_v6, %v3014_v20  ;;  %v3422_v27 = vpop.f32.mrb[81].mxu1  ;;  %v3465_v36 = vpop.f32.mrb[85].mxu0  ;;  %5506 = vmatprep.subr.bf16.mxu1 %v6034_v16  ;;  %5528 = vmatprep.subr.bf16.mxu0 %v6035_v45  ;;  %v6048_v29 = vld [vmem:[%s6878_s23 + $0x128] sm:$0xff]  }
 0xf8a   : > { %v3423_v24 = vadd.f32 %v3422_v27, %v3010_v19  ;;  %v3466_v34 = vadd.f32 %v3465_v36, %v3018_v44  ;;  %v3424_v37 = vpop.f32.mrb[82].mxu1  ;;  %v3467_v38 = vpop.f32.mrb[86].mxu0  ;;  %4755 = vmatprep.mubr.bf16.mxu1 %v3595_v0  ;;  %4796 = vmatprep.mubr.bf16.mxu0 %v3597_v26  ;;  %v6049_v6 = vld [vmem:[%s6878_s23 + $0x1a8] sm:$0xff]   ;;  %v6050_v27 = vld [vmem:[%s6878_s23 + $0x170] sm:$0xff]  }
 0xf8b   : > { %v3425_v40 = vadd.f32 %v3424_v37, %v3006_v53  ;;  %v3468_v41 = vadd.f32 %v3467_v38, %v3014_v20  ;;  %v3426_v51 = vpop.f32.mrb[83].mxu1  ;;  %v3469_v55 = vpop.f32.mrb[87].mxu0  ;;  %v3566_v52 = vmax.f32 %v3421_v35, 0.0  ;;  %v3568_v53 = vmax.f32 %v3464_v2, 0.0 }
 0xf8c   : > { %v3427_v46 = vadd.f32 %v3426_v51, %v3010_v19  ;;  %v3470_v47 = vadd.f32 %v3469_v55, %v3018_v44  ;;  %5507 = vmatpush3.bf16.msra.mxu1 %v6036_v30  ;;  %5529 = vmatpush3.bf16.msra.mxu0 %v6037_v31  ;;  %v3567_v33 = vmax.f32 %v3423_v24, 0.0  ;;  %v3569_v59 = vmax.f32 %v3466_v34, 0.0  ;;  %v6044_v19 = vld [vmem:[%s6878_s23 + $0x120] sm:$0xff]   ;;  %v6053_v51 = vld [vmem:[%s6878_s23 + $0x1b0] sm:$0xff]   ;;  %v6054_v55 = vld [vmem:[%s6878_s23 + $0x178] sm:$0xff]  }
 0xf8d   : > { %v3582_v54 = vmax.f32 %v3425_v40, 0.0  ;;  %v3584_v57 = vmax.f32 %v3468_v41, 0.0  ;;  %5508 = vmatprep.subr.bf16.mxu1 %v6038_v32  ;;  %5530 = vmatprep.subr.bf16.mxu0 %v6039_v23  ;;  %v6052_v41 = vld [vmem:[%s6878_s23 + $0x130] sm:$0xff]  }
 0xf8e   : > { %v3583_v20 = vmax.f32 %v3427_v46, 0.0  ;;  %v3585_v56 = vmax.f32 %v3470_v47, 0.0  ;;  %v6057_v46 = vld [vmem:[%s6878_s23 + $0x1b8] sm:$0xff]   ;;  %v6058_v47 = vld [vmem:[%s6878_s23 + $0x240] sm:$0xff]  }
 0xf8f   : > { %v7039_v63 = vpack.c.bf16 %v3582_v54, %v3566_v52  ;;  %v7041_v58 = vpack.c.bf16 %v3584_v57, %v3568_v53  ;;  %v6062_v52 = vld [vmem:[%s6878_s23 + $0x248] sm:$0xff]  }
 0xf90   : > { %v7043_v60 = vpack.c.bf16 %v3583_v20, %v3567_v33  ;;  %v7045_v8 = vpack.c.bf16 %v3585_v56, %v3569_v59  ;;  %5509 = vmatpush3.bf16.msra.mxu1 %v6040_v48  ;;  %5531 = vmatpush3.bf16.msra.mxu0 %v6041_v49  ;;  %v3506_v1 = vpop.f32.mrb[84].mxu1  ;;  %v3549_v10 = vpop.f32.mrb[88].mxu0  ;;  %v6059_v48 = vld [vmem:[%s6878_s23 + $0x2c0] sm:$0xff]   ;;  %v6063_v53 = vld [vmem:[%s6878_s23 + $0x2c8] sm:$0xff]   ;;  %v6070_v33 = vld [vmem:[%s6878_s23 + $0x258] sm:$0xff]  }
 0xf91   : > { %v3507_v4 = vadd.f32 %v3506_v1, %v3022_v61  ;;  %v3550_v9 = vadd.f32 %v3549_v10, %v6983_v62  ;;  %v3508_v11 = vpop.f32.mrb[85].mxu1  ;;  %v3551_v44 = vpop.f32.mrb[89].mxu0  ;;  %5510 = vmatprep.subr.bf16.mxu1 %v6042_v28  ;;  %5532 = vmatprep.subr.bf16.mxu0 %v6043_v3  ;;  %v6060_v49 = vld [vmem:[%s6878_s23 + $0x200] sm:$0xff]   ;;  %v6064_v54 = vld [vmem:[%s6878_s23 + $0x208] sm:$0xff]   ;;  %v6066_v28 = vld [vmem:[%s6878_s23 + $0x250] sm:$0xff]  }
 0xf92   : > { %v3509_v14 = vadd.f32 %v3508_v11, %v3026_v42  ;;  %v3552_v15 = vadd.f32 %v3551_v44, %v3034_v50  ;;  %v3510_v16 = vpop.f32.mrb[86].mxu1  ;;  %v3553_v45 = vpop.f32.mrb[90].mxu0  ;;  %v6065_v57 = vld [vmem:[%s6878_s23 + $0x288] sm:$0xff]   ;;  %v6069_v3 = vld [vmem:[%s6878_s23 + $0x290] sm:$0xff]   ;;  %v6071_v59 = vld [vmem:[%s6878_s23 + $0x2d8] sm:$0xff]  }
 0xf93   : > { %v3511_v17 = vadd.f32 %v3510_v16, %v3022_v61  ;;  %v3554_v5 = vadd.f32 %v3553_v45, %v6983_v62  ;;  %v3512_v18 = vpop.f32.mrb[87].mxu1  ;;  %v3555_v21 = vpop.f32.mrb[91].mxu0  ;;  %v3570_v30 = vmax.f32 %v3507_v4, 0.0  ;;  %v3572_v31 = vmax.f32 %v3550_v9, 0.0  ;;  %v6051_v62 = vld [vmem:[%s6878_s23 + $0x1f0] sm:$0xff]   ;;  %v6055_v61 = vld [vmem:[%s6878_s23 + $0x1f8] sm:$0xff]  }
 0xf94   : > { %v3513_v0 = vadd.f32 %v3512_v18, %v3026_v42  ;;  %v3556_v26 = vadd.f32 %v3555_v21, %v3034_v50  ;;  %5511 = vmatpush3.bf16.msra.mxu1 %v6044_v19  ;;  %5533 = vmatpush3.bf16.msra.mxu0 %v6045_v7  ;;  %v3571_v36 = vmax.f32 %v3509_v14, 0.0  ;;  %v3573_v32 = vmax.f32 %v3552_v15, 0.0  ;;  %v6056_v42 = vld [vmem:[%s6878_s23 + $0x138] sm:$0xff]   ;;  %v6061_v50 = vld [vmem:[%s6878_s23 + $0x280] sm:$0xff]   ;;  %v6078_v19 = vld [vmem:[%s6878_s23 + $0x268] sm:$0xff]  }
 0xf95   : > { %v3586_v35 = vmax.f32 %v3511_v17, 0.0  ;;  %v3588_v2 = vmax.f32 %v3554_v5, 0.0  ;;  %5512 = vmatprep.subr.bf16.mxu1 %v6046_v12  ;;  %5534 = vmatprep.subr.bf16.mxu0 %v6047_v13  ;;  %v6072_v20 = vld [vmem:[%s6878_s23 + $0x218] sm:$0xff]   ;;  %v6076_v1 = vld [vmem:[%s6878_s23 + $0x220] sm:$0xff]   ;;  %v6079_v7 = vld [vmem:[%s6878_s23 + $0x2e8] sm:$0xff]  }
 0xf96   : > { %v3587_v23 = vmax.f32 %v3513_v0, 0.0  ;;  %v3589_v24 = vmax.f32 %v3556_v26, 0.0  ;;  %v6073_v56 = vld [vmem:[%s6878_s23 + $0x298] sm:$0xff]   ;;  %v6077_v10 = vld [vmem:[%s6878_s23 + $0x2a0] sm:$0xff]   ;;  %v6080_v4 = vld [vmem:[%s6878_s23 + $0x228] sm:$0xff]  }
 0xf97   : > { %v7057_v34 = vpack.c.bf16 %v3586_v35, %v3570_v30  ;;  %v7059_v37 = vpack.c.bf16 %v3588_v2, %v3572_v31  ;;  %v6081_v9 = vld [vmem:[%s6878_s23 + $0x2a8] sm:$0xff]   ;;  %v6082_v11 = vld [vmem:[%s6878_s23 + $0x270] sm:$0xff]   ;;  %v6086_v14 = vld [vmem:[%s6878_s23 + $0x278] sm:$0xff]  }
 0xf98   : > { %v7061_v38 = vpack.c.bf16 %v3587_v23, %v3571_v36  ;;  %v7063_v40 = vpack.c.bf16 %v3589_v24, %v3573_v32  ;;  %5513 = vmatpush3.bf16.msra.mxu1 %v6048_v29  ;;  %5535 = vmatpush3.bf16.msra.mxu0 %v6049_v6  ;;  %v6083_v44 = vld [vmem:[%s6878_s23 + $0x2f0] sm:$0xff]   ;;  %v6087_v15 = vld [vmem:[%s6878_s23 + $0x2f8] sm:$0xff]   ;;  %v6090_v17 = vld [vmem:[%s6878_s23 + $0x340] sm:$0xff]  }
 0xf99   : > { %5514 = vmatprep.subr.bf16.mxu1 %v6050_v27  ;;  %5536 = vmatprep.subr.bf16.mxu0 %v6051_v62  ;;  %v6084_v12 = vld [vmem:[%s6878_s23 + $0x230] sm:$0xff]   ;;  %v6088_v16 = vld [vmem:[%s6878_s23 + $0x238] sm:$0xff]   ;;  %v6091_v5 = vld [vmem:[%s6878_s23 + $0x3c0] sm:$0xff]  }
 0xf9a   : > { %v6085_v13 = vld [vmem:[%s6878_s23 + $0x2b0] sm:$0xff]   ;;  %v6089_v45 = vld [vmem:[%s6878_s23 + $0x2b8] sm:$0xff]   ;;  %v6092_v18 = vld [vmem:[%s6878_s23 + $0x300] sm:$0xff]  }
 0xf9b   : > { %v6093_v21 = vld [vmem:[%s6878_s23 + $0x380] sm:$0xff]   ;;  %v6094_v0 = vld [vmem:[%s6878_s23 + $0x348] sm:$0xff]   ;;  %v6098_v30 = vld [vmem:[%s6878_s23 + $0x350] sm:$0xff]  }
 0xf9c   : > { %5515 = vmatpush3.bf16.msra.mxu1 %v6052_v41  ;;  %5537 = vmatpush3.bf16.msra.mxu0 %v6053_v51  ;;  %v6095_v26 = vld [vmem:[%s6878_s23 + $0x3c8] sm:$0xff]   ;;  %v6101_v31 = vld [vmem:[%s6878_s23 + $0x390] sm:$0xff]   ;;  %v6102_v35 = vld [vmem:[%s6878_s23 + $0x358] sm:$0xff]  }
 0xf9d   : > { %5516 = vmatprep.subr.bf16.mxu1 %v6054_v55  ;;  %5538 = vmatprep.subr.bf16.mxu0 %v6055_v61  ;;  %v6096_v29 = vld [vmem:[%s6878_s23 + $0x308] sm:$0xff]   ;;  %v6103_v2 = vld [vmem:[%s6878_s23 + $0x3d8] sm:$0xff]   ;;  %v6106_v36 = vld [vmem:[%s6878_s23 + $0x360] sm:$0xff]  }
 0xf9e   : > { %v6097_v6 = vld [vmem:[%s6878_s23 + $0x388] sm:$0xff]   ;;  %v6104_v27 = vld [vmem:[%s6878_s23 + $0x318] sm:$0xff]   ;;  %v6107_v32 = vld [vmem:[%s6878_s23 + $0x3e0] sm:$0xff]  }
 0xf9f   : > { %v6105_v62 = vld [vmem:[%s6878_s23 + $0x398] sm:$0xff]   ;;  %v6108_v23 = vld [vmem:[%s6878_s23 + $0x320] sm:$0xff]   ;;  %v6112_v41 = vld [vmem:[%s6878_s23 + $0x328] sm:$0xff]  }
 0xfa0   : > { %5517 = vmatpush3.bf16.msra.mxu1 %v6056_v42  ;;  %5539 = vmatpush3.bf16.msra.mxu0 %v6057_v46  ;;  %v6109_v24 = vld [vmem:[%s6878_s23 + $0x3a0] sm:$0xff]   ;;  %v6113_v51 = vld [vmem:[%s6878_s23 + $0x3a8] sm:$0xff]   ;;  %v6114_v55 = vld [vmem:[%s6878_s23 + $0x370] sm:$0xff]  }
 0xfa1   : > { %5546 = vmatprep.subr.bf16.mxu1 %v6058_v47  ;;  %5568 = vmatprep.subr.bf16.mxu0 %v6059_v48  ;;  %v6115_v61 = vld [vmem:[%s6878_s23 + $0x3f0] sm:$0xff]   ;;  %v6118_v47 = vld [vmem:[%s6878_s23 + $0x378] sm:$0xff]  }
 0xfa2   : > { %v6116_v42 = vld [vmem:[%s6878_s23 + $0x330] sm:$0xff]   ;;  %v6119_v48 = vld [vmem:[%s6878_s23 + $0x3f8] sm:$0xff]  }
 0xfa3   : > { %4756 = vmatmul.mubr.bf16.vlgmr.msra.gmra.mrb[92].mxu1 %v7018_v22  ;;  %4797 = vmatmul.mubr.bf16.vlgmr.msra.gmra.mrb[96].mxu0 %v7020_v25  ;;  %v6067_v22 = vld [vmem:[%s6878_s23 + $0x2d0] sm:$0xff]  }
 0xfa4   : > { %5547 = vmatpush3.bf16.msra.mxu1 %v6060_v49  ;;  %4837 = vmatprep.mubr.bf16.mxu1 %v7043_v60  ;;  %v6068_v25 = vld [vmem:[%s6878_s23 + $0x210] sm:$0xff]   ;;  %v6074_v60 = vld [vmem:[%s6878_s23 + $0x260] sm:$0xff]   ;;  %v6120_v49 = vld [vmem:[%s6878_s23 + $0x338] sm:$0xff]  }
 0xfa5   : > { %5569 = vmatpush3.bf16.msra.mxu0 %v6061_v50  ;;  %4878 = vmatprep.mubr.bf16.mxu0 %v7045_v8  ;;  %v6075_v8 = vld [vmem:[%s6878_s23 + $0x2e0] sm:$0xff]   ;;  %v6117_v46 = vld [vmem:[%s6878_s23 + $0x3b0] sm:$0xff]   ;;  %v6121_v50 = vld [vmem:[%s6878_s23 + $0x3b8] sm:$0xff]  }
 0xfa6   : > { %5548 = vmatprep.subr.bf16.mxu1 %v6062_v52  ;;  %5570 = vmatprep.subr.bf16.mxu0 %v6063_v53 }
 0xfa8   : > { %5549 = vmatpush3.bf16.msra.mxu1 %v6064_v54  ;;  %v5236_v54 = vld [vmem:[%s3865_s22] ss:$0 sm:$0xff] }
 0xfa9   : > { %5571 = vmatpush3.bf16.msra.mxu0 %v6065_v57  ;;  %5550 = vmatprep.subr.bf16.mxu1 %v6066_v28 }
 0xfaa   : > { %5572 = vmatprep.subr.bf16.mxu0 %v6067_v22 }
 0xfac   : > { %5551 = vmatpush3.bf16.msra.mxu1 %v6068_v25 }
 0xfad   : > { %5573 = vmatpush3.bf16.msra.mxu0 %v6069_v3  ;;  %5552 = vmatprep.subr.bf16.mxu1 %v6070_v33 }
 0xfae   : > { %5574 = vmatprep.subr.bf16.mxu0 %v6071_v59 }
 0xfb0   : > { %5553 = vmatpush3.bf16.msra.mxu1 %v6072_v20 }
 0xfb1   : > { %5575 = vmatpush3.bf16.msra.mxu0 %v6073_v56  ;;  %5554 = vmatprep.subr.bf16.mxu1 %v6074_v60 }
 0xfb2   : > { %5576 = vmatprep.subr.bf16.mxu0 %v6075_v8 }
 0xfb4   : > { %5555 = vmatpush3.bf16.msra.mxu1 %v6076_v1 }
 0xfb5   : > { %5577 = vmatpush3.bf16.msra.mxu0 %v6077_v10  ;;  %5556 = vmatprep.subr.bf16.mxu1 %v6078_v19 }
 0xfb6   : > { %5578 = vmatprep.subr.bf16.mxu0 %v6079_v7 }
 0xfb8   : > { %5557 = vmatpush3.bf16.msra.mxu1 %v6080_v4 }
 0xfb9   : > { %5579 = vmatpush3.bf16.msra.mxu0 %v6081_v9  ;;  %5558 = vmatprep.subr.bf16.mxu1 %v6082_v11 }
 0xfba   : > { %5580 = vmatprep.subr.bf16.mxu0 %v6083_v44 }
 0xfbc   : > { %5559 = vmatpush3.bf16.msra.mxu1 %v6084_v12 }
 0xfbd   : > { %5581 = vmatpush3.bf16.msra.mxu0 %v6085_v13  ;;  %5560 = vmatprep.subr.bf16.mxu1 %v6086_v14 }
 0xfbe   : > { %5582 = vmatprep.subr.bf16.mxu0 %v6087_v15 }
 0xfc0   : > { %5561 = vmatpush3.bf16.msra.mxu1 %v6088_v16 }
 0xfc1   : > { %5583 = vmatpush3.bf16.msra.mxu0 %v6089_v45  ;;  %5590 = vmatprep.subr.bf16.mxu1 %v6090_v17 }
 0xfc2   : > { %5612 = vmatprep.subr.bf16.mxu0 %v6091_v5 }
 0xfc3   : > { %4838 = vmatmul.mubr.bf16.vlgmr.msra.gmra.mrb[96].mxu1 %v7039_v63  ;;  %v6099_v63 = vld [vmem:[%s6878_s23 + $0x3d0] sm:$0xff]  }
 0xfc4   : > { %4879 = vmatmul.mubr.bf16.vlgmr.msra.gmra.mrb[100].mxu0 %v7041_v58  ;;  %5591 = vmatpush3.bf16.msra.mxu1 %v6092_v18  ;;  %v6100_v58 = vld [vmem:[%s6878_s23 + $0x310] sm:$0xff]  }
 0xfc5   : > { %4919 = vmatprep.mubr.bf16.mxu1 %v7061_v38  ;;  %5613 = vmatpush3.bf16.msra.mxu0 %v6093_v21  ;;  %v6110_v38 = vld [vmem:[%s6878_s23 + $0x368] sm:$0xff]  }
 0xfc6   : > { %4960 = vmatprep.mubr.bf16.mxu0 %v7063_v40  ;;  %5592 = vmatprep.subr.bf16.mxu1 %v6094_v0  ;;  %v6111_v40 = vld [vmem:[%s6878_s23 + $0x3e8] sm:$0xff]  }
 0xfc7   : > { %5614 = vmatprep.subr.bf16.mxu0 %v6095_v26 }
 0xfc8   : > { %5593 = vmatpush3.bf16.msra.mxu1 %v6096_v29 }
 0xfc9   : > { %5615 = vmatpush3.bf16.msra.mxu0 %v6097_v6  ;;  %5594 = vmatprep.subr.bf16.mxu1 %v6098_v30 }
 0xfca   : > { %5616 = vmatprep.subr.bf16.mxu0 %v6099_v63 }
 0xfcc   : > { %5595 = vmatpush3.bf16.msra.mxu1 %v6100_v58 }
 0xfcd   : > { %5617 = vmatpush3.bf16.msra.mxu0 %v6101_v31  ;;  %5596 = vmatprep.subr.bf16.mxu1 %v6102_v35 }
 0xfce   : > { %5618 = vmatprep.subr.bf16.mxu0 %v6103_v2 }
 0xfd0   : > { %5597 = vmatpush3.bf16.msra.mxu1 %v6104_v27 }
 0xfd1   : > { %5619 = vmatpush3.bf16.msra.mxu0 %v6105_v62  ;;  %5598 = vmatprep.subr.bf16.mxu1 %v6106_v36 }
 0xfd2   : > { %5620 = vmatprep.subr.bf16.mxu0 %v6107_v32 }
 0xfd4   : > { %5599 = vmatpush3.bf16.msra.mxu1 %v6108_v23 }
 0xfd5   : > { %5621 = vmatpush3.bf16.msra.mxu0 %v6109_v24  ;;  %5600 = vmatprep.subr.bf16.mxu1 %v6110_v38 }
 0xfd6   : > { %5622 = vmatprep.subr.bf16.mxu0 %v6111_v40 }
 0xfd8   : > { %5601 = vmatpush3.bf16.msra.mxu1 %v6112_v41 }
 0xfd9   : > { %5623 = vmatpush3.bf16.msra.mxu0 %v6113_v51  ;;  %5602 = vmatprep.subr.bf16.mxu1 %v6114_v55 }
 0xfda   : > { %5624 = vmatprep.subr.bf16.mxu0 %v6115_v61 }
 0xfdc   : > { %5603 = vmatpush3.bf16.msra.mxu1 %v6116_v42 }
 0xfdd   : > { %5625 = vmatpush3.bf16.msra.mxu0 %v6117_v46  ;;  %5604 = vmatprep.subr.bf16.mxu1 %v6118_v47 }
 0xfde   : > { %5626 = vmatprep.subr.bf16.mxu0 %v6119_v48 }
 0xfe0   : > { %5605 = vmatpush3.bf16.msra.mxu1 %v6120_v49 }
 0xfe1   : > { %5627 = vmatpush3.bf16.msra.mxu0 %v6121_v50 }
 0xfe3   : > { %4920 = vmatmul.mubr.bf16.vlgmr.msra.gmra.mrb[100].mxu1 %v7057_v34 }
 0xfe4   : > { %4961 = vmatmul.mubr.bf16.vlgmr.msra.gmra.mrb[104].mxu0 %v7059_v37 }
0x1056   : > { %v5474_v52 = vpop.f32.mrb[88].mxu1  ;;  %v5496_v53 = vpop.f32.mrb[92].mxu0 }
0x1057   : > { %v5475_v57 = vpop.f32.mrb[89].mxu1  ;;  %v5497_v28 = vpop.f32.mrb[93].mxu0 }
0x1058   : > { %v5476_v22 = vadd.f32 %v5475_v57, %v5474_v52  ;;  %v5498_v25 = vadd.f32 %v5497_v28, %v5496_v53  ;;  %v5477_v3 = vpop.f32.mrb[90].mxu1  ;;  %v5499_v33 = vpop.f32.mrb[94].mxu0 }
0x1059   : > { %v5478_v59 = vpop.f32.mrb[91].mxu1  ;;  %v5500_v20 = vpop.f32.mrb[95].mxu0 }
0x105a   : > { %v4676_v56 = vadd.f32 %v5476_v22, %v5236_v54  ;;  %v5479_v60 = vadd.f32 %v5478_v59, %v5477_v3  ;;  %v5501_v34 = vadd.f32 %v5500_v20, %v5499_v33 }
0x105c   : > { %v4717_v8 = vadd.f32 %v5498_v25, %v4676_v56  ;;  %v4679_v37 = vadd.f32 %v5479_v60, %v5236_v54 }
0x105e   : > { %v4720_v1 = vadd.f32 %v5501_v34, %v4679_v37 }
0x1076   : > { %v5518_v10 = vpop.f32.mrb[92].mxu1  ;;  %v5540_v19 = vpop.f32.mrb[96].mxu0 }
0x1077   : > { %v5519_v7 = vpop.f32.mrb[93].mxu1  ;;  %v5541_v4 = vpop.f32.mrb[97].mxu0 }
0x1078   : > { %v5520_v9 = vadd.f32 %v5519_v7, %v5518_v10  ;;  %v5542_v11 = vadd.f32 %v5541_v4, %v5540_v19  ;;  %v5521_v44 = vpop.f32.mrb[94].mxu1  ;;  %v5543_v12 = vpop.f32.mrb[98].mxu0 }
0x1079   : > { %v5522_v13 = vpop.f32.mrb[95].mxu1  ;;  %v5544_v14 = vpop.f32.mrb[99].mxu0 }
0x107a   : > { %v4758_v15 = vadd.f32 %v5520_v9, %v4717_v8  ;;  %v5523_v16 = vadd.f32 %v5522_v13, %v5521_v44  ;;  %v5545_v45 = vadd.f32 %v5544_v14, %v5543_v12  ;;  %v5366_v13 = vld [vmem:[%s4973_s26] ss:$0 sm:$0xff] }
0x107c   : > { %v4799_v17 = vadd.f32 %v5542_v11, %v4758_v15  ;;  %v4761_v5 = vadd.f32 %v5523_v16, %v4720_v1  ;;  %v5365_v11 = vld [vmem:[%s4971_s25] ss:$0 sm:$0xff] }
0x107e   : > { %v4802_v18 = vadd.f32 %v5545_v45, %v4761_v5 }
0x1096   : > { %v5562_v21 = vpop.f32.mrb[96].mxu1 }
0x1097   : > { %v5584_v0 = vpop.f32.mrb[100].mxu0  ;;  %v5563_v26 = vpop.f32.mrb[97].mxu1 }
0x1098   : > { %v5564_v29 = vadd.f32 %v5563_v26, %v5562_v21  ;;  %v5585_v6 = vpop.f32.mrb[101].mxu0  ;;  %v5565_v30 = vpop.f32.mrb[98].mxu1 }
0x1099   : > { %v5586_v63 = vadd.f32 %v5585_v6, %v5584_v0  ;;  %v5587_v58 = vpop.f32.mrb[102].mxu0  ;;  %v5566_v31 = vpop.f32.mrb[99].mxu1 }
0x109a   : > { %v4840_v35 = vadd.f32 %v5564_v29, %v4799_v17  ;;  %v5567_v2 = vadd.f32 %v5566_v31, %v5565_v30  ;;  %v5588_v27 = vpop.f32.mrb[103].mxu0 }
0x109b   : > { %v5589_v62 = vadd.f32 %v5588_v27, %v5587_v58 }
0x109c   : > { %v4881_v36 = vadd.f32 %v5586_v63, %v4840_v35  ;;  %v4843_v32 = vadd.f32 %v5567_v2, %v4802_v18 }
0x109e   : > { %v4884_v23 = vadd.f32 %v5589_v62, %v4843_v32 }
0x10b6   : > { %v5606_v24 = vpop.f32.mrb[100].mxu1 }
0x10b7   : > { %v5628_v38 = vpop.f32.mrb[104].mxu0  ;;  %v5607_v40 = vpop.f32.mrb[101].mxu1 }
0x10b8   : > { %v5608_v41 = vadd.f32 %v5607_v40, %v5606_v24  ;;  %v5629_v51 = vpop.f32.mrb[105].mxu0  ;;  %v5609_v55 = vpop.f32.mrb[102].mxu1 }
0x10b9   : > { %v5630_v61 = vadd.f32 %v5629_v51, %v5628_v38  ;;  %v5631_v42 = vpop.f32.mrb[106].mxu0  ;;  %v5610_v46 = vpop.f32.mrb[103].mxu1 }
0x10ba   : > { %v4922_v47 = vadd.f32 %v5608_v41, %v4881_v36  ;;  %v5611_v48 = vadd.f32 %v5610_v46, %v5609_v55  ;;  %v5632_v49 = vpop.f32.mrb[107].mxu0 }
0x10bb   : > { %v5633_v50 = vadd.f32 %v5632_v49, %v5631_v42 }
0x10bc   : > { %v4963_v52 = vadd.f32 %v5630_v61, %v4922_v47  ;;  %v4925_v53 = vadd.f32 %v5611_v48, %v4884_v23 }
0x10be   : > { %v4966_v54 = vadd.f32 %v5633_v50, %v4925_v53  ;;  %v4969_v57 = vadd.f32 %v4963_v52, %v6893_v43 }
0x10c0   : > { %v4975_v28 = vsel %vm637_vm2, %v4969_v57, 0.0  ;;  %v4970_v22 = vadd.f32 %v4966_v54, %v6895_v39 }
0x10c1   : > { %4976 = vadd.xlane.f32.xlu0 %v4975_v28 }
0x10c2   : > { %v4978_v25 = vsel %vm637_vm2, %v4970_v22, 0.0 }
0x10c3   : > { %4979 = vadd.xlane.f32.xlu1 %v4978_v25 }
0x114e   : > { %v4977_v3 = vpop.xlane.xlu0 %4976 }
0x114f   : > { %v4981_v33 = vmul.f32 0.03125, %v4977_v3 }
0x1150   : > { %v4980_v59 = vpop.xlane.xlu1 %4979 }
0x1151   : > { %v4983_v20 = vsub.f32 %v4969_v57, %v4981_v33  ;;  %v4982_v56 = vmul.f32 0.03125, %v4980_v59 }
0x1153   : > { %v4984_v60 = vsub.f32 %v4970_v22, %v4982_v56  ;;  %v4985_v34 = vmul.f32 %v4983_v20, %v4983_v20 }
0x1155   : > { %v4987_v8 = vsel %vm637_vm2, %v4985_v34, 0.0  ;;  %v4986_v43 = vmul.f32 %v4984_v60, %v4984_v60 }
0x1156   : > { %4988 = vadd.xlane.f32.xlu0 %v4987_v8 }
0x1157   : > { %v4990_v37 = vsel %vm637_vm2, %v4986_v43, 0.0 }
0x1158   : > { %4991 = vadd.xlane.f32.xlu1 %v4990_v37 }
0x11e3   : > { %v4989_v39 = vpop.xlane.xlu0 %4988 }
0x11e4   : > { %v4993_v1 = vmul.f32 0.03125, %v4989_v39 }
0x11e5   : > { %v4992_v10 = vpop.xlane.xlu1 %4991 }
0x11e6   : > { %v4995_v19 = vadd.f32 1e-05, %v4993_v1  ;;  %v4994_v7 = vmul.f32 0.03125, %v4992_v10 }
0x11e8   : > { %6194 = vrsqrt.f32 %v4995_v19  ;;  %v4996_v4 = vadd.f32 1e-05, %v4994_v7 }
0x11ea   : > { %6196 = vrsqrt.f32 %v4996_v4 }
0x11f2   : > { %v6195_v9 = vpop.eup %6194 }
0x11f3   : > { %v4999_v44 = vmul.f32 %v6195_v9, %v4983_v20 }
0x11f4   : > { %v6197_v12 = vpop.eup %6196 }
0x11f5   : > { %v5007_v14 = vmul.f32 %v5365_v11, %v4999_v44  ;;  %v5000_v15 = vmul.f32 %v6197_v12, %v4984_v60  ;;  %5022 = sbr.rel (%p5367_p5) target bundleno = 4604 (0x11fc), region = 100 }
0x11f7   : > { %v5015_v16 = vadd.f32 %v5366_v13, %v5007_v14  ;;  %v5008_v45 = vmul.f32 %v5365_v11, %v5000_v15 }
0x11f9   : > { %5017 = vst.msk [vmem:[#allocation2] sm:$0xff] %vm637_vm2, %v5015_v16  ;;  %v5016_v17 = vadd.f32 %v5366_v13, %v5008_v45  ;;  %5023 = vst.msk [vmem:[#allocation3] sm:$0xff] (!%p5367_p5), %vm637_vm2, %v5015_v16 }
0x11fb   : > { %5018 = vst.msk [vmem:[#allocation2 + $0x8] sm:$0xff] %vm637_vm2, %v5016_v17  ;;  %5024 = vst.msk [vmem:[#allocation3 + $0x8] sm:$0xff] (!%p5367_p5), %vm637_vm2, %v5016_v17 }
0x11fc PF: > { %s7249_s2 = sadd.s32 4294967295, %s6250_s29   ;;  %s6263_s22 = smov [#allocation3]  }
0x11fd   : > { %p7170_p6 = scmp.eq.s32.totalorder %s7249_s2, 5  ;;  %s5034_s23 = sshll.u32 %s6263_s22, 4  ;;  %s5035_s23 = int_to_ptr.vmem [resolvable:$true] %s5034_s23 }
0x11fe   : > { %s6198_s24 = scalar_lea.vmem %s5035_s23, 256  ;;  %p6205_p10 = scmp.lt.s32.totalorder %s5035_s23, %s5035_s23 }
0x11ff   : > { %p6199_p7 = scmp.ne.s32.totalorder %s5035_s23, %s6198_s24  ;;  %p6206_p11 = scmp.lt.s32.totalorder %s6198_s24, %s6198_s24 }
0x1201   : > { %p6200_p8 = pnand %p6199_p7, %p7170_p6  ;;  %p6207_p12 = por %p6206_p11, %p6205_p10 }
0x1203   : > { %p6201_p9 = pneg %p6200_p8 }
0x1205   : > { %p6208_p13 = pnand %p6207_p12, %p6201_p9 }
0x1207   : > { %6211 = shalt.err (!%p6208_p13)
}
0x1208   : > { %s6212_s21 = scalar_lea.hbm %s7224_s18, 256 }
0x1209   : > { %p6213_p0 = scmp.ne.s32.totalorder %s7224_s18, %s6212_s21  ;;  %p6218_p3 = scmp.lt.u32.totalorder %s6212_s21, %s7224_s18 }
0x120b   : > { %p6214_p1 = pnand %p6213_p0, %p7170_p6 }
0x120d   : > { %p6215_p2 = pneg %p6214_p1 }
0x120f   : > { %p6220_p4 = pnand %p6218_p3, %p6215_p2 }
0x1211   : > { %6223 = shalt.err (!%p6220_p4)
}
0x1212   : > { %s6264_s24 = smov 128   ;;  %s7251_s1 = smov 8  }
0x1213   : > { %5867 = dma.vmem_to_hbm [thread:$0]  (%p7170_p6), %s5035_s23, 256, %s7224_s18, [#allocation4], %s6264_s24, %s6264_s24, %s7251_s1  }
0x1214   : > { %6237 = dma.done.wait (%p7170_p6), [#allocation4], 256  }
0x1215   : > { %6239 = vsyncadd (%p7170_p6), [#allocation4], 4294967040 }
0x1216 PF: > { %s29_s29 = sadd.s32 1, %s6250_s29   ;;  %s7252_s27 = smov %s6246_s28 }
0x1217   : > { %p26_p5 = scmp.ge.s32.totalorder %s29_s29, 8   ;;  %s7253_s28 = smov %s7255_s0 }
0x1219   :  { %28 = sbr.rel (!%p26_p5) target bundleno = 6 (0x6), region = 146 }
0x1220   :  { %5050 = vsyncpa [#allocation4], 1 }
0x1221   :  { %5052 = vsyncpa [#allocation4 + $0x1], 1 }

</bundles_post_ra>
